<compile_context>
chip_gen: v5e
topology: v5e:2x2
jax: 0.10.0
libtpu: 0.0.40
codegen_flags: <defaults>
</compile_context>

<pallas_src>
import math
from functools import partial

import jax
import jax.numpy as jnp
from jax.experimental import pallas as pl
from jax.experimental.pallas import tpu as pltpu


# ----------------------------- tiling helpers -----------------------------

_TM, _TN, _TK = 256, 256, 512  # tile targets (f32 x / bf16 w / f32 acc ~ a few MiB)


def _pick_tile(dim, target, mult):
    """Largest tile <= target that divides `dim` and is a multiple of `mult`;
    falls back to the full dimension (always a legal TPU block shape)."""
    if dim <= target:
        return dim
    if dim % mult != 0:
        return dim
    top = (target // mult) * mult
    for cand in range(top, 0, -mult):
        if dim % cand == 0:
            return cand
    return dim


# ----------------------------- LayerNorm row stats -----------------------------

def _ln_stats_kernel(x_ref, mu_ref, rs_ref, *, eps):
    x = x_ref[...]
    mu = jnp.mean(x, axis=-1, keepdims=True)
    xc = x - mu
    var = jnp.mean(xc * xc, axis=-1, keepdims=True)
    mu_ref[...] = mu
    rs_ref[...] = jax.lax.rsqrt(var + eps)


def ln_row_stats(x, eps=1e-5):
    """Per-row mean / rsqrt(var + eps) over the last axis. x: (M, K) f32."""
    M, K = x.shape
    tm = _pick_tile(M, _TM, 8)
    return pl.pallas_call(
        partial(_ln_stats_kernel, eps=eps),
        out_shape=(jax.ShapeDtypeStruct((M, 1), jnp.float32),
                   jax.ShapeDtypeStruct((M, 1), jnp.float32)),
        grid=(M // tm,),
        in_specs=[pl.BlockSpec((tm, K), lambda i: (i, 0))],
        out_specs=(pl.BlockSpec((tm, 1), lambda i: (i, 0)),
                   pl.BlockSpec((tm, 1), lambda i: (i, 0))),
        compiler_params=pltpu.CompilerParams(dimension_semantics=("parallel",)),
    )(x)


# ----------------------------- fused tiled linear -----------------------------

def _epilogue(y, refs_epi, act, has_epi, has_res):
    if has_epi:
        s_ref, t_ref = refs_epi[0], refs_epi[1]
        y = y * s_ref[...] + t_ref[...]
    if act == "gelu":  # exact (erf) GELU, matching torch.nn.GELU default
        y = 0.5 * y * (1.0 + jax.lax.erf(y * 0.7071067811865476))
    elif act == "relu":
        y = jnp.maximum(y, 0.0)
    if has_res:
        r_ref = refs_epi[2 if has_epi else 0]
        y = y + r_ref[...]
    return y


def _fused_linear_kernel(*refs, act, has_ln, has_epi, has_res, single_k):
    if single_k:
        o_ref = refs[-1]
        in_refs = refs[:-1]
    else:
        o_ref, acc_ref = refs[-2], refs[-1]
        in_refs = refs[:-2]

    x_ref, w_ref = in_refs[0], in_refs[1]
    i = 2
    if has_ln:
        g_ref, bta_ref, mu_ref, rs_ref = in_refs[i:i + 4]
        i += 4
    refs_epi = in_refs[i:]

    x = x_ref[...]
    if has_ln:  # fused pre-LayerNorm prologue (stats precomputed per row)
        x = (x - mu_ref[...]) * rs_ref[...] * g_ref[...] + bta_ref[...]
    part = jnp.dot(x.astype(jnp.bfloat16), w_ref[...],
                   preferred_element_type=jnp.float32)

    if single_k:
        # Fast path: whole reduction in one tile -> no scratch, no phase gates.
        o_ref[...] = _epilogue(part, refs_epi, act, has_epi, has_res).astype(o_ref.dtype)
    else:
        @pl.when(pl.program_id(2) == 0)
        def _():
            acc_ref[...] = jnp.zeros_like(acc_ref)

        acc_ref[...] += part

        @pl.when(pl.program_id(2) == pl.num_programs(2) - 1)
        def _():
            y = _epilogue(acc_ref[...], refs_epi, act, has_epi, has_res)
            o_ref[...] = y.astype(o_ref.dtype)


def fused_linear(x, w, *, bias=None, ln=None, ln_eps=1e-5,
                 scale=None, shift=None, act="none", residual=None):
    """y = act((LN?(x) @ w) * scale + shift) + residual
    - LN (affine) is fused as a matmul prologue; bias / eval-BN are folded into one
      (1, N) scale/shift pair; residual add is fused into the epilogue.
    - matmul operands are bf16 on the MXU; accumulation & epilogue stay f32.
    """
    x = x.astype(jnp.float32)
    M, K = x.shape
    K2, N = w.shape
    assert K == K2
    wb = w.astype(jnp.bfloat16)

    has_ln = ln is not None
    has_res = residual is not None
    has_epi = (bias is not None) or (scale is not None) or (shift is not None)

    tm = _pick_tile(M, _TM, 8)
    tn = _pick_tile(N, _TN, 128)
    tk = _pick_tile(K, _TK, 128)
    grid = (M // tm, N // tn, K // tk)
    single_k = grid[2] == 1

    inputs = [x, wb]
    in_specs = [pl.BlockSpec((tm, tk), lambda i, j, k: (i, k)),
                pl.BlockSpec((tk, tn), lambda i, j, k: (k, j))]

    if has_ln:
        g, b = ln
        mu, rs = ln_row_stats(x, ln_eps)
        inputs += [g.reshape(1, K).astype(jnp.float32),
                   b.reshape(1, K).astype(jnp.float32), mu, rs]
        in_specs += [pl.BlockSpec((1, tk), lambda i, j, k: (0, k)),
                     pl.BlockSpec((1, tk), lambda i, j, k: (0, k)),
                     pl.BlockSpec((tm, 1), lambda i, j, k: (i, 0)),
                     pl.BlockSpec((tm, 1), lambda i, j, k: (i, 0))]

    if has_epi:
        sc = jnp.ones((N,), jnp.float32) if scale is None else scale.astype(jnp.float32)
        sh = jnp.zeros((N,), jnp.float32) if shift is None else shift.astype(jnp.float32)
        if bias is not None:  # (acc + b)*s + t == acc*s + (b*s + t)
            sh = sh + bias.astype(jnp.float32) * sc
        inputs += [sc.reshape(1, N), sh.reshape(1, N)]
        in_specs += [pl.BlockSpec((1, tn), lambda i, j, k: (0, j)),
                     pl.BlockSpec((1, tn), lambda i, j, k: (0, j))]

    if has_res:
        inputs += [residual.astype(jnp.float32)]
        in_specs += [pl.BlockSpec((tm, tn), lambda i, j, k: (i, j))]

    return pl.pallas_call(
        partial(_fused_linear_kernel, act=act, has_ln=has_ln,
                has_epi=has_epi, has_res=has_res, single_k=single_k),
        out_shape=jax.ShapeDtypeStruct((M, N), jnp.float32),
        grid=grid,
        in_specs=in_specs,
        out_specs=pl.BlockSpec((tm, tn), lambda i, j, k: (i, j)),
        scratch_shapes=([] if single_k else [pltpu.VMEM((tm, tn), jnp.float32)]),
        compiler_params=pltpu.CompilerParams(
            dimension_semantics=("parallel", "parallel", "arbitrary")),
    )(*inputs)


# ----------------------------- standalone LayerNorm -----------------------------

def _layernorm_kernel(x_ref, g_ref, b_ref, o_ref, *, eps):
    x = x_ref[...]
    mu = jnp.mean(x, axis=-1, keepdims=True)
    xc = x - mu
    var = jnp.mean(xc * xc, axis=-1, keepdims=True)
    o_ref[...] = xc * jax.lax.rsqrt(var + eps) * g_ref[...] + b_ref[...]


def pallas_layernorm(x, p, eps=1e-5):
    """LayerNorm over the last axis (torch.nn.LayerNorm semantics, eps=1e-5)."""
    sh = x.shape
    C = sh[-1]
    x2 = x.reshape(-1, C).astype(jnp.float32)
    M = x2.shape[0]
    tm = _pick_tile(M, _TM, 8)
    out = pl.pallas_call(
        partial(_layernorm_kernel, eps=eps),
        out_shape=jax.ShapeDtypeStruct((M, C), jnp.float32),
        grid=(M // tm,),
        in_specs=[pl.BlockSpec((tm, C), lambda i: (i, 0)),
                  pl.BlockSpec((1, C), lambda i: (0, 0)),
                  pl.BlockSpec((1, C), lambda i: (0, 0))],
        out_specs=pl.BlockSpec((tm, C), lambda i: (i, 0)),
        compiler_params=pltpu.CompilerParams(dimension_semantics=("parallel",)),
    )(x2, p["g"].reshape(1, C), p["b"].reshape(1, C))
    return out.reshape(sh)


# ----------------------------- attention core -----------------------------

def _attn_core_kernel(qkv_ref, o_ref, *, num_heads, C, scale):
    qkv = qkv_ref[0]                       # (N, 3C) f32, heads packed along lanes
    Dh = C // num_heads
    outs = []
    for h in range(num_heads):             # static unroll over heads
        q = qkv[:, h * Dh:(h + 1) * Dh].astype(jnp.bfloat16)
        k = qkv[:, C + h * Dh:C + (h + 1) * Dh].astype(jnp.bfloat16)
        v = qkv[:, 2 * C + h * Dh:2 * C + (h + 1) * Dh].astype(jnp.bfloat16)
        s = jax.lax.dot_general(q, k, (((1,), (1,)), ((), ())),
                                preferred_element_type=jnp.float32) * scale
        s = s - jnp.max(s, axis=-1, keepdims=True)
        p = jnp.exp(s)
        p = p * pl.reciprocal(jnp.sum(p, axis=-1, keepdims=True), approx=True)
        outs.append(jnp.dot(p.astype(jnp.bfloat16), v,
                            preferred_element_type=jnp.float32))
    o = outs[0] if num_heads == 1 else jnp.concatenate(outs, axis=-1)
    o_ref[0] = o                           # one lane-dense (N, C) store


def pallas_attn_core(qkv, num_heads, C, scale):
    """Multi-head softmax(q k^T * scale) @ v; all heads of one batch item per grid step.
    qkv: (B, N, 3C) laid out as [q heads | k heads | v heads]."""
    # TODO(synk): flash-style KV tiling (online softmax) for large N; here the full
    # (N, N) per-head score matrix fits comfortably in VMEM.
    B, N, C3 = qkv.shape
    return pl.pallas_call(
        partial(_attn_core_kernel, num_heads=num_heads, C=C, scale=scale),
        out_shape=jax.ShapeDtypeStruct((B, N, C), jnp.float32),
        grid=(B,),
        in_specs=[pl.BlockSpec((1, N, C3), lambda b: (b, 0, 0))],
        out_specs=pl.BlockSpec((1, N, C), lambda b: (b, 0, 0)),
        compiler_params=pltpu.CompilerParams(dimension_semantics=("parallel",)),
    )(qkv)


# ----------------------------- 3x3 conv + BN + ReLU -----------------------------

def _conv3x3_kernel(x_ref, w_ref, s_ref, t_ref, o_ref, *, H, W):
    xp = x_ref[0]                          # (H+2, W+2, C1) padded NHWC slab
    C2 = w_ref.shape[-1]
    acc = jnp.zeros((H * W, C2), jnp.float32)
    for kh in range(3):                    # 9 taps accumulated in-kernel (no im2col)
        for kw in range(3):
            xs = xp[kh:kh + H, kw:kw + W, :].reshape(H * W, -1).astype(jnp.bfloat16)
            acc = acc + jnp.dot(xs, w_ref[kh, kw],
                                preferred_element_type=jnp.float32)
    y = acc * s_ref[...] + t_ref[...]
    y = jnp.maximum(y, 0.0)
    o_ref[0] = y


def pallas_conv3x3_bn_relu(x, w, b, scale, shift):
    """3x3 conv (stride 1, pad 1) + folded eval-BatchNorm + ReLU, NHWC layout."""
    # TODO(synk): spatial tiling with halo exchange for large H/W; one batch image
    # per grid step is plenty for the shapes in this stage.
    B, H, W, C1 = x.shape
    C2 = w.shape[-1]
    xp = jnp.pad(x, ((0, 0), (1, 1), (1, 1), (0, 0)))
    scale = scale.astype(jnp.float32)
    sc = scale.reshape(1, C2)
    sh = (shift.astype(jnp.float32) + b.astype(jnp.float32) * scale).reshape(1, C2)
    out = pl.pallas_call(
        partial(_conv3x3_kernel, H=H, W=W),
        out_shape=jax.ShapeDtypeStruct((B, H * W, C2), jnp.float32),
        grid=(B,),
        in_specs=[pl.BlockSpec((1, H + 2, W + 2, C1), lambda i: (i, 0, 0, 0)),
                  pl.BlockSpec((3, 3, C1, C2), lambda i: (0, 0, 0, 0)),
                  pl.BlockSpec((1, C2), lambda i: (0, 0)),
                  pl.BlockSpec((1, C2), lambda i: (0, 0))],
        out_specs=pl.BlockSpec((1, H * W, C2), lambda i: (i, 0, 0)),
        compiler_params=pltpu.CompilerParams(dimension_semantics=("parallel",)),
    )(xp, w.astype(jnp.bfloat16), sc, sh)
    return out.reshape(B, H, W, C2)


# ----------------------------- module forwards -----------------------------

def attention_forward(x, p, ln_p, num_heads):
    """x + Attention(LayerNorm(x)). Pre-norm fused into the (C,3C) qkv matmul,
    residual fused into the output-projection epilogue, heads handled in-kernel."""
    B, N, C = x.shape
    Dh = C // num_heads
    scale = Dh ** (-0.5)
    x2 = x.reshape(B * N, C)
    w_qkv = jnp.concatenate([p["qk"]["w"], p["v"]["w"]], axis=1)  # qkv_bias=False
    qkv = fused_linear(x2, w_qkv, ln=(ln_p["g"], ln_p["b"]))
    o = pallas_attn_core(qkv.reshape(B, N, 3 * C), num_heads, C, scale)
    y = fused_linear(o.reshape(B * N, C), p["proj"]["w"], bias=p["proj"]["b"],
                     residual=x2)
    return y.reshape(B, N, C)


def mlp_forward(x, p, ln_p):
    """x + MLP(LayerNorm(x)); LN fused into fc1, GELU in fc1 epilogue, residual in fc2."""
    sh = x.shape
    x2 = x.reshape(-1, sh[-1])
    h = fused_linear(x2, p["fc1"]["w"], bias=p["fc1"]["b"],
                     ln=(ln_p["g"], ln_p["b"]), act="gelu")
    o = fused_linear(h, p["fc2"]["w"], bias=p["fc2"]["b"], residual=x2)
    return o.reshape(sh)


def to_embed_forward(x, p, cfg):
    B, C, H, W = x.shape
    ps, dim = cfg["patch_size"], cfg["dim"]
    G = H // ps
    # unfold(k=ps, s=ps) + reshape -> x6[b, gi, gj, c, kh, kw] = x[b, c, gi*ps+kh, gj*ps+kw]
    x6 = x.reshape(B, C, G, ps, G, ps).transpose(0, 2, 4, 1, 3, 5)
    pixel = x6.transpose(0, 1, 2, 4, 5, 3).reshape(B * G, G, ps * ps * dim)
    row_in = x6.transpose(0, 1, 4, 2, 5, 3).reshape(B, G, G * ps * ps * dim)
    col_in = x6.transpose(0, 2, 1, 4, 5, 3).reshape(B, G, G * ps * ps * dim)
    row = pallas_layernorm(row_in, p["norm_proj"])
    col = pallas_layernorm(col_in, p["norm_proj"])
    return pixel, pixel, row, col


def block_forward(pe1, pe2, row, col, p, cfg):
    ps, dim = cfg["patch_size"], cfg["dim"]
    num_heads, num_inner = cfg["num_heads"], cfg["num_inner_heads"]
    BG, G, Cw = pe1.shape
    B, N, Cs = row.shape
    assert N == G

    # outer (sentence-level) transformer on row / column embeddings
    row = attention_forward(row, p["attn_out1"], p["norm_out"], num_heads)
    row = mlp_forward(row, p["mlp1"], p["norm_mlp"])
    col = attention_forward(col, p["attn_out2"], p["norm_out"], num_heads)
    col = mlp_forward(col, p["mlp2"], p["norm_mlp"])

    # re-layout row/col embeddings to the pixel-patch layout (pure layout glue)
    row_px = row.reshape(B * G, ps, G, ps, dim).transpose(0, 2, 1, 3, 4).reshape(B * G * G, Cw)
    col_px = col.reshape(B, G, G, Cw).transpose(0, 2, 1, 3).reshape(B * G * G, Cw)

    # proj1(norm_proj(row)) / proj2(norm_proj(col)) are shared by both pixel streams
    ln = p["norm_proj"]
    proj_row = fused_linear(row_px, p["proj1"]["w"], bias=p["proj1"]["b"],
                            ln=(ln["g"], ln["b"])).reshape(BG, G, Cw)
    proj_col = fused_linear(col_px, p["proj2"]["w"], bias=p["proj2"]["b"],
                            ln=(ln["g"], ln["b"])).reshape(BG, G, Cw)

    def inner_attn(pe, attn_p):
        y = attention_forward(pe.reshape(B, G * G, Cw), attn_p, p["norm_in"], num_inner)
        return y.reshape(BG, G, Cw)

    pe1 = pe1 + proj_row
    pe1 = inner_attn(pe1, p["attn_in1"])
    pe1 = pe1 + proj_col
    pe1 = inner_attn(pe1, p["attn_in2"])
    pe1 = mlp_forward(pe1, p["mlp_in1"], p["norm_mlp_in"])

    pe2 = pe2 + proj_col
    pe2 = inner_attn(pe2, p["attn_in2"])
    pe2 = pe2 + proj_row
    pe2 = inner_attn(pe2, p["attn_in1"])
    pe2 = mlp_forward(pe2, p["mlp_in2"], p["norm_mlp_in"])

    return pe1, pe2, row, col


def merge_forward(pe1, pe2, p, cfg):
    ps, dim = cfg["patch_size"], cfg["dim"]
    BG, G, Cw = pe1.shape
    B = BG // G
    H = W = G * ps

    def to_img(pe):  # (B*G, G, ps*ps*dim) -> NHWC (B, H, W, dim)
        t = pe.reshape(B, G, G, ps, ps, dim).transpose(0, 1, 3, 2, 4, 5)
        return t.reshape(B, H, W, dim)

    img = jnp.concatenate([to_img(pe1), to_img(pe2)], axis=-1)  # (B, H, W, 2*dim)

    def bn_fold(bn):  # eval-mode BatchNorm folded to per-channel scale/shift
        sc = bn["g"] * jax.lax.rsqrt(bn["var"] + 1e-5)
        return sc, bn["b"] - bn["mean"] * sc

    s1, t1 = bn_fold(p["bn1"])
    s2, t2 = bn_fold(p["bn2"])
    s3, t3 = bn_fold(p["bn3"])

    C1 = p["conv1"]["w"].shape[-1]
    y = fused_linear(img.reshape(B * H * W, 2 * dim), p["conv1"]["w"],
                     bias=p["conv1"]["b"], scale=s1, shift=t1,
                     act="relu").reshape(B, H, W, C1)

    y = pallas_conv3x3_bn_relu(y, p["conv2"]["w"], p["conv2"]["b"], s2, t2)

    C2 = p["conv2"]["w"].shape[-1]
    out_dim = p["conv3"]["w"].shape[-1]
    y = fused_linear(y.reshape(B * H * W, C2), p["conv3"]["w"],
                     bias=p["conv3"]["b"], scale=s3, shift=t3,
                     act="relu").reshape(B, H, W, out_dim)
    return y.transpose(0, 3, 1, 2)  # back to NCHW


def stage_forward(x, params, cfg):
    pe1, pe2, row, col = to_embed_forward(x, params["to_embed"], cfg)
    # pixel_pos / row_pos / column_pos are None; pos_drop is identity (inference)
    for blk in params["blocks"]:
        pe1, pe2, row, col = block_forward(pe1, pe2, row, col, blk, cfg)
    return merge_forward(pe1, pe2, params["merge"], cfg)


# ----------------------------- parameter init -----------------------------

def init_params(key, cfg):
    dim, ps, img = cfg["dim"], cfg["patch_size"], cfg["img_size"]
    out_dim, depth = cfg["out_dim"], cfg["depth"]
    row_pixel = ps * img
    Cw = dim * ps * ps       # pixel-level feature dim
    Cs = dim * row_pixel     # sentence-level feature dim

    keys = list(jax.random.split(key, 512))
    ctr = [0]

    def nk():
        k = keys[ctr[0]]
        ctr[0] += 1
        return k

    def lin(fi, fo, bias=True):
        d = {"w": 0.02 * jax.random.normal(nk(), (fi, fo), jnp.float32)}
        d["b"] = 0.02 * jax.random.normal(nk(), (fo,), jnp.float32) if bias else None
        return d

    def ln(c):
        return {"g": jnp.ones((c,), jnp.float32),
                "b": 0.02 * jax.random.normal(nk(), (c,), jnp.float32)}

    def attn(c):
        return {"qk": lin(c, 2 * c, bias=False),
                "v": lin(c, c, bias=False),
                "proj": lin(c, c, bias=True)}

    def mlp(c, h):
        return {"fc1": lin(c, h), "fc2": lin(h, c)}

    def bn(c):
        return {"g": jnp.ones((c,), jnp.float32),
                "b": 0.02 * jax.random.normal(nk(), (c,), jnp.float32),
                "mean": 0.1 * jax.random.normal(nk(), (c,), jnp.float32),
                "var": 1.0 + 0.1 * jax.nn.sigmoid(jax.random.normal(nk(), (c,), jnp.float32))}

    params = {"to_embed": {"norm_proj": ln(Cs)}}
    blocks = []
    for _ in range(depth):
        blocks.append({
            "norm_in": ln(Cw),
            "attn_in1": attn(Cw), "attn_in2": attn(Cw),
            "norm_mlp_in": ln(Cw),
            "mlp_in1": mlp(Cw, 4 * Cw), "mlp_in2": mlp(Cw, 4 * Cw),
            "norm_proj": ln(Cw),
            "proj1": lin(Cw, Cw), "proj2": lin(Cw, Cw),
            "norm_out": ln(Cs),
            "attn_out1": attn(Cs), "attn_out2": attn(Cs),
            "norm_mlp": ln(Cs),
            "mlp1": mlp(Cs, int(Cs * cfg["mlp_ratio"])),
            "mlp2": mlp(Cs, int(Cs * cfg["mlp_ratio"])),
        })
    params["blocks"] = blocks

    c4 = dim * 4
    params["merge"] = {
        "conv1": lin(2 * dim, c4), "bn1": bn(c4),
        "conv2": {"w": 0.02 * jax.random.normal(nk(), (3, 3, c4, c4), jnp.float32),
                  "b": 0.02 * jax.random.normal(nk(), (c4,), jnp.float32)},
        "bn2": bn(c4),
        "conv3": lin(c4, out_dim), "bn3": bn(out_dim),
    }
    # ToEmbed.proj1/proj2 and Merge.norm_in/norm_out are unused in the reference forward -> omitted.
    return params


# ----------------------------- main -----------------------------

if __name__ == "__main__":
    cfg = dict(img_size=8, patch_size=2, in_chans=4, dim=4, out_dim=8,
               num_heads=2, num_inner_heads=2, depth=1, mlp_ratio=4.0)
    # ToEmbed requires in_chans == dim (unfold channel count must equal dim*ps*ps).
    B = 2
    key = jax.random.PRNGKey(0)
    k_x, k_p = jax.random.split(key)
    x = jax.random.normal(k_x, (B, cfg["in_chans"], cfg["img_size"], cfg["img_size"]), jnp.float32)
    params = init_params(k_p, cfg)

    fwd = jax.jit(lambda xx, pp: stage_forward(xx, pp, cfg))
    out = fwd(x, params)
    out = jax.block_until_ready(out)
    assert out.shape == (B, cfg["out_dim"], cfg["img_size"], cfg["img_size"]), out.shape
    print("KERNEL_OK")
</pallas_src>

<mosaic_0001>
module attributes {stable_mosaic.version = 11 : i64} {
  func.func @_layernorm_kernel(%arg0: i32, %arg1: memref<8x64xf32, #tpu.memory_space<vmem>>, %arg2: memref<1x64xf32, #tpu.memory_space<vmem>>, %arg3: memref<1x64xf32, #tpu.memory_space<vmem>>, %arg4: memref<8x64xf32, #tpu.memory_space<vmem>>) attributes {dimension_semantics = [#tpu.dimension_semantics<parallel>], iteration_bounds = array<i64: 1>, scalar_prefetch = 0 : i64, scratch_operands = 0 : i64, tpu.core_type = #tpu.core_type<tc>, window_params = [{transform_indices = @transform_0, window_bounds = array<i64: 8, 64>}, {pipeline_mode = #tpu.pipeline_mode<synchronous>, transform_indices = @transform_1, window_bounds = array<i64: 1, 64>}, {pipeline_mode = #tpu.pipeline_mode<synchronous>, transform_indices = @transform_2, window_bounds = array<i64: 1, 64>}, {transform_indices = @transform_3, window_bounds = array<i64: 8, 64>}]} {
    %c0 = arith.constant 0 : index
    %c0_0 = arith.constant 0 : index
    %0 = vector.load %arg1[%c0, %c0_0] : memref<8x64xf32, #tpu.memory_space<vmem>>, vector<8x64xf32>
    %cst = arith.constant dense<0.000000e+00> : vector<8xf32>
    %1 = vector.multi_reduction <add>, %0, %cst [1] : vector<8x64xf32> to vector<8xf32>
    %2 = vector.shape_cast %1 : vector<8xf32> to vector<8x1xf32>
    %cst_1 = arith.constant 6.400000e+01 : f32
    %3 = vector.broadcast %cst_1 : f32 to vector<8x1xf32>
    %4 = arith.divf %2, %3 : vector<8x1xf32>
    %5 = vector.broadcast %4 : vector<8x1xf32> to vector<8x64xf32>
    %6 = arith.subf %0, %5 : vector<8x64xf32>
    %7 = arith.mulf %6, %6 : vector<8x64xf32>
    %cst_2 = arith.constant dense<0.000000e+00> : vector<8xf32>
    %8 = vector.multi_reduction <add>, %7, %cst_2 [1] : vector<8x64xf32> to vector<8xf32>
    %9 = vector.shape_cast %8 : vector<8xf32> to vector<8x1xf32>
    %cst_3 = arith.constant 6.400000e+01 : f32
    %10 = vector.broadcast %cst_3 : f32 to vector<8x1xf32>
    %11 = arith.divf %9, %10 : vector<8x1xf32>
    %cst_4 = arith.constant 9.99999974E-6 : f32
    %12 = vector.broadcast %cst_4 : f32 to vector<8x1xf32>
    %13 = arith.addf %11, %12 : vector<8x1xf32>
    %14 = math.rsqrt %13 : vector<8x1xf32>
    %15 = vector.broadcast %14 : vector<8x1xf32> to vector<8x64xf32>
    %16 = arith.mulf %6, %15 : vector<8x64xf32>
    %c0_5 = arith.constant 0 : index
    %c0_6 = arith.constant 0 : index
    %17 = vector.load %arg2[%c0_5, %c0_6] : memref<1x64xf32, #tpu.memory_space<vmem>>, vector<1x64xf32>
    %18 = vector.broadcast %17 : vector<1x64xf32> to vector<8x64xf32>
    %19 = arith.mulf %16, %18 : vector<8x64xf32>
    %c0_7 = arith.constant 0 : index
    %c0_8 = arith.constant 0 : index
    %20 = vector.load %arg3[%c0_7, %c0_8] : memref<1x64xf32, #tpu.memory_space<vmem>>, vector<1x64xf32>
    %21 = vector.broadcast %20 : vector<1x64xf32> to vector<8x64xf32>
    %22 = arith.addf %19, %21 : vector<8x64xf32>
    %c0_9 = arith.constant 0 : index
    %c0_10 = arith.constant 0 : index
    %23 = vector.load %arg4[%c0_9, %c0_10] : memref<8x64xf32, #tpu.memory_space<vmem>>, vector<8x64xf32>
    tpu.vector_store %arg4[%c0_9, %c0_10], %22 {strides = array<i32>} : memref<8x64xf32, #tpu.memory_space<vmem>>, vector<8x64xf32>,
    return
  }
  func.func @transform_0(%arg0: i32) -> (i32, i32) {
    %c0_i32 = arith.constant 0 : i32
    %c0_i32_0 = arith.constant 0 : i32
    return %arg0, %c0_i32 : i32, i32
  }
  func.func @transform_1(%arg0: i32) -> (i32, i32) {
    %c0_i32 = arith.constant 0 : i32
    %c0_i32_0 = arith.constant 0 : i32
    %c0_i32_1 = arith.constant 0 : i32
    return %c0_i32, %c0_i32_0 : i32, i32
  }
  func.func @transform_2(%arg0: i32) -> (i32, i32) {
    %c0_i32 = arith.constant 0 : i32
    %c0_i32_0 = arith.constant 0 : i32
    %c0_i32_1 = arith.constant 0 : i32
    return %c0_i32, %c0_i32_0 : i32, i32
  }
  func.func @transform_3(%arg0: i32) -> (i32, i32) {
    %c0_i32 = arith.constant 0 : i32
    %c0_i32_0 = arith.constant 0 : i32
    return %arg0, %c0_i32 : i32, i32
  }
}

module attributes {stable_mosaic.version = 11 : i64} {
  func.func @_ln_stats_kernel(%arg0: i32, %arg1: memref<8x64xf32, #tpu.memory_space<vmem>>, %arg2: memref<8x1xf32, #tpu.memory_space<vmem>>, %arg3: memref<8x1xf32, #tpu.memory_space<vmem>>) attributes {dimension_semantics = [#tpu.dimension_semantics<parallel>], iteration_bounds = array<i64: 1>, scalar_prefetch = 0 : i64, scratch_operands = 0 : i64, tpu.core_type = #tpu.core_type<tc>, window_params = [{transform_indices = @transform_0, window_bounds = array<i64: 8, 64>}, {transform_indices = @transform_1, window_bounds = array<i64: 8, 1>}, {transform_indices = @transform_2, window_bounds = array<i64: 8, 1>}]} {
    %c0 = arith.constant 0 : index
    %c0_0 = arith.constant 0 : index
    %0 = vector.load %arg1[%c0, %c0_0] : memref<8x64xf32, #tpu.memory_space<vmem>>, vector<8x64xf32>
    %cst = arith.constant dense<0.000000e+00> : vector<8xf32>
    %1 = vector.multi_reduction <add>, %0, %cst [1] : vector<8x64xf32> to vector<8xf32>
    %2 = vector.shape_cast %1 : vector<8xf32> to vector<8x1xf32>
    %cst_1 = arith.constant 6.400000e+01 : f32
    %3 = vector.broadcast %cst_1 : f32 to vector<8x1xf32>
    %4 = arith.divf %2, %3 : vector<8x1xf32>
    %5 = vector.broadcast %4 : vector<8x1xf32> to vector<8x64xf32>
    %6 = arith.subf %0, %5 : vector<8x64xf32>
    %7 = arith.mulf %6, %6 : vector<8x64xf32>
    %cst_2 = arith.constant dense<0.000000e+00> : vector<8xf32>
    %8 = vector.multi_reduction <add>, %7, %cst_2 [1] : vector<8x64xf32> to vector<8xf32>
    %9 = vector.shape_cast %8 : vector<8xf32> to vector<8x1xf32>
    %cst_3 = arith.constant 6.400000e+01 : f32
    %10 = vector.broadcast %cst_3 : f32 to vector<8x1xf32>
    %11 = arith.divf %9, %10 : vector<8x1xf32>
    %c0_4 = arith.constant 0 : index
    %c0_5 = arith.constant 0 : index
    %12 = vector.load %arg2[%c0_4, %c0_5] : memref<8x1xf32, #tpu.memory_space<vmem>>, vector<8x1xf32>
    tpu.vector_store %arg2[%c0_4, %c0_5], %4 {strides = array<i32>} : memref<8x1xf32, #tpu.memory_space<vmem>>, vector<8x1xf32>,
    %cst_6 = arith.constant 9.99999974E-6 : f32
    %13 = vector.broadcast %cst_6 : f32 to vector<8x1xf32>
    %14 = arith.addf %11, %13 : vector<8x1xf32>
    %15 = math.rsqrt %14 : vector<8x1xf32>
    %c0_7 = arith.constant 0 : index
    %c0_8 = arith.constant 0 : index
    %16 = vector.load %arg3[%c0_7, %c0_8] : memref<8x1xf32, #tpu.memory_space<vmem>>, vector<8x1xf32>
    tpu.vector_store %arg3[%c0_7, %c0_8], %15 {strides = array<i32>} : memref<8x1xf32, #tpu.memory_space<vmem>>, vector<8x1xf32>,
    return
  }
  func.func @transform_0(%arg0: i32) -> (i32, i32) {
    %c0_i32 = arith.constant 0 : i32
    %c0_i32_0 = arith.constant 0 : i32
    return %arg0, %c0_i32 : i32, i32
  }
  func.func @transform_1(%arg0: i32) -> (i32, i32) {
    %c0_i32 = arith.constant 0 : i32
    %c0_i32_0 = arith.constant 0 : i32
    return %arg0, %c0_i32 : i32, i32
  }
  func.func @transform_2(%arg0: i32) -> (i32, i32) {
    %c0_i32 = arith.constant 0 : i32
    %c0_i32_0 = arith.constant 0 : i32
    return %arg0, %c0_i32 : i32, i32
  }
}

module attributes {stable_mosaic.version = 11 : i64} {
  func.func @_fused_linear_kernel(%arg0: i32, %arg1: i32, %arg2: i32, %arg3: memref<8x64xf32, #tpu.memory_space<vmem>>, %arg4: memref<64x192xbf16, #tpu.memory_space<vmem>>, %arg5: memref<1x64xf32, #tpu.memory_space<vmem>>, %arg6: memref<1x64xf32, #tpu.memory_space<vmem>>, %arg7: memref<8x1xf32, #tpu.memory_space<vmem>>, %arg8: memref<8x1xf32, #tpu.memory_space<vmem>>, %arg9: memref<8x192xf32, #tpu.memory_space<vmem>>) attributes {dimension_semantics = [#tpu.dimension_semantics<parallel>, #tpu.dimension_semantics<parallel>, #tpu.dimension_semantics<arbitrary>], iteration_bounds = array<i64: 1, 1, 1>, scalar_prefetch = 0 : i64, scratch_operands = 0 : i64, tpu.core_type = #tpu.core_type<tc>, window_params = [{transform_indices = @transform_0, window_bounds = array<i64: 8, 64>}, {transform_indices = @transform_1, window_bounds = array<i64: 64, 192>}, {transform_indices = @transform_2, window_bounds = array<i64: 1, 64>}, {transform_indices = @transform_3, window_bounds = array<i64: 1, 64>}, {transform_indices = @transform_4, window_bounds = array<i64: 8, 1>}, {transform_indices = @transform_5, window_bounds = array<i64: 8, 1>}, {transform_indices = @transform_6, window_bounds = array<i64: 8, 192>}]} {
    %c0 = arith.constant 0 : index
    %c0_0 = arith.constant 0 : index
    %0 = vector.load %arg3[%c0, %c0_0] : memref<8x64xf32, #tpu.memory_space<vmem>>, vector<8x64xf32>
    %c0_1 = arith.constant 0 : index
    %c0_2 = arith.constant 0 : index
    %1 = vector.load %arg7[%c0_1, %c0_2] : memref<8x1xf32, #tpu.memory_space<vmem>>, vector<8x1xf32>
    %2 = vector.broadcast %1 : vector<8x1xf32> to vector<8x64xf32>
    %3 = arith.subf %0, %2 : vector<8x64xf32>
    %c0_3 = arith.constant 0 : index
    %c0_4 = arith.constant 0 : index
    %4 = vector.load %arg8[%c0_3, %c0_4] : memref<8x1xf32, #tpu.memory_space<vmem>>, vector<8x1xf32>
    %5 = vector.broadcast %4 : vector<8x1xf32> to vector<8x64xf32>
    %6 = arith.mulf %3, %5 : vector<8x64xf32>
    %c0_5 = arith.constant 0 : index
    %c0_6 = arith.constant 0 : index
    %7 = vector.load %arg5[%c0_5, %c0_6] : memref<1x64xf32, #tpu.memory_space<vmem>>, vector<1x64xf32>
    %8 = vector.broadcast %7 : vector<1x64xf32> to vector<8x64xf32>
    %9 = arith.mulf %6, %8 : vector<8x64xf32>
    %c0_7 = arith.constant 0 : index
    %c0_8 = arith.constant 0 : index
    %10 = vector.load %arg6[%c0_7, %c0_8] : memref<1x64xf32, #tpu.memory_space<vmem>>, vector<1x64xf32>
    %11 = vector.broadcast %10 : vector<1x64xf32> to vector<8x64xf32>
    %12 = arith.addf %9, %11 : vector<8x64xf32>
    %13 = arith.truncf %12 : vector<8x64xf32> to vector<8x64xbf16>
    %c0_9 = arith.constant 0 : index
    %c0_10 = arith.constant 0 : index
    %14 = vector.load %arg4[%c0_9, %c0_10] : memref<64x192xbf16, #tpu.memory_space<vmem>>, vector<64x192xbf16>
    %cst = arith.constant dense<0.000000e+00> : vector<8x192xf32>
    %15 = tpu.matmul %13, %14, %cst {dimension_numbers = #tpu.dot_dimension_numbers<[1], [0], [0], [1], [0, 0, 1, 1], [], []>} : vector<8x64xbf16>, vector<64x192xbf16>, vector<8x192xf32> -> vector<8x192xf32>
    %c0_11 = arith.constant 0 : index
    %c0_12 = arith.constant 0 : index
    %16 = vector.load %arg9[%c0_11, %c0_12] : memref<8x192xf32, #tpu.memory_space<vmem>>, vector<8x192xf32>
    tpu.vector_store %arg9[%c0_11, %c0_12], %15 {strides = array<i32>} : memref<8x192xf32, #tpu.memory_space<vmem>>, vector<8x192xf32>,
    return
  }
  func.func @transform_0(%arg0: i32, %arg1: i32, %arg2: i32) -> (i32, i32) {
    %c0_i32 = arith.constant 0 : i32
    return %arg0, %arg2 : i32, i32
  }
  func.func @transform_1(%arg0: i32, %arg1: i32, %arg2: i32) -> (i32, i32) {
    %c0_i32 = arith.constant 0 : i32
    return %arg2, %arg1 : i32, i32
  }
  func.func @transform_2(%arg0: i32, %arg1: i32, %arg2: i32) -> (i32, i32) {
    %c0_i32 = arith.constant 0 : i32
    %c0_i32_0 = arith.constant 0 : i32
    return %c0_i32, %arg2 : i32, i32
  }
  func.func @transform_3(%arg0: i32, %arg1: i32, %arg2: i32) -> (i32, i32) {
    %c0_i32 = arith.constant 0 : i32
    %c0_i32_0 = arith.constant 0 : i32
    return %c0_i32, %arg2 : i32, i32
  }
  func.func @transform_4(%arg0: i32, %arg1: i32, %arg2: i32) -> (i32, i32) {
    %c0_i32 = arith.constant 0 : i32
    %c0_i32_0 = arith.constant 0 : i32
    return %arg0, %c0_i32 : i32, i32
  }
  func.func @transform_5(%arg0: i32, %arg1: i32, %arg2: i32) -> (i32, i32) {
    %c0_i32 = arith.constant 0 : i32
    %c0_i32_0 = arith.constant 0 : i32
    return %arg0, %c0_i32 : i32, i32
  }
  func.func @transform_6(%arg0: i32, %arg1: i32, %arg2: i32) -> (i32, i32) {
    %c0_i32 = arith.constant 0 : i32
    return %arg0, %arg1 : i32, i32
  }
}

module attributes {stable_mosaic.version = 11 : i64} {
  func.func @_attn_core_kernel(%arg0: i32, %arg1: memref<1x4x192xf32, #tpu.memory_space<vmem>>, %arg2: memref<1x4x64xf32, #tpu.memory_space<vmem>>) attributes {dimension_semantics = [#tpu.dimension_semantics<parallel>], iteration_bounds = array<i64: 2>, scalar_prefetch = 0 : i64, scratch_operands = 0 : i64, tpu.core_type = #tpu.core_type<tc>, window_params = [{transform_indices = @transform_0, window_bounds = array<i64: 1, 4, 192>}, {transform_indices = @transform_1, window_bounds = array<i64: 1, 4, 64>}]} {
    %c0 = arith.constant 0 : index
    %c0_0 = arith.constant 0 : index
    %c0_1 = arith.constant 0 : index
    %0 = vector.load %arg1[%c0, %c0_0, %c0_1] : memref<1x4x192xf32, #tpu.memory_space<vmem>>, vector<1x4x192xf32>
    %1 = vector.shape_cast %0 : vector<1x4x192xf32> to vector<4x192xf32>
    %2 = vector.extract_strided_slice %1 {offsets = [0, 0], sizes = [4, 32], strides = [1, 1]} : vector<4x192xf32> to vector<4x32xf32>
    %3 = arith.truncf %2 : vector<4x32xf32> to vector<4x32xbf16>
    %4 = vector.extract_strided_slice %1 {offsets = [0, 64], sizes = [4, 32], strides = [1, 1]} : vector<4x192xf32> to vector<4x32xf32>
    %5 = arith.truncf %4 : vector<4x32xf32> to vector<4x32xbf16>
    %6 = vector.extract_strided_slice %1 {offsets = [0, 128], sizes = [4, 32], strides = [1, 1]} : vector<4x192xf32> to vector<4x32xf32>
    %7 = arith.truncf %6 : vector<4x32xf32> to vector<4x32xbf16>
    %cst = arith.constant dense<0.000000e+00> : vector<4x4xf32>
    %8 = tpu.matmul %3, %5, %cst {dimension_numbers = #tpu.dot_dimension_numbers<[1], [1], [0], [0], [0, 0, 1, 0], [], []>} : vector<4x32xbf16>, vector<4x32xbf16>, vector<4x4xf32> -> vector<4x4xf32>
    %cst_2 = arith.constant 0.176776692 : f32
    %9 = vector.broadcast %cst_2 : f32 to vector<4x4xf32>
    %10 = arith.mulf %8, %9 : vector<4x4xf32>
    %cst_3 = arith.constant dense<0xFF800000> : vector<4xf32>
    %11 = vector.multi_reduction <maximumf>, %10, %cst_3 [1] : vector<4x4xf32> to vector<4xf32>
    %12 = vector.shape_cast %11 : vector<4xf32> to vector<4x1xf32>
    %13 = vector.broadcast %12 : vector<4x1xf32> to vector<4x4xf32>
    %14 = arith.subf %10, %13 : vector<4x4xf32>
    %15 = math.exp %14 : vector<4x4xf32>
    %cst_4 = arith.constant dense<0.000000e+00> : vector<4xf32>
    %16 = vector.multi_reduction <add>, %15, %cst_4 [1] : vector<4x4xf32> to vector<4xf32>
    %17 = vector.shape_cast %16 : vector<4xf32> to vector<4x1xf32>
    %18 = tpu.reciprocal %17 {approx = true} : vector<4x1xf32> -> vector<4x1xf32>
    %19 = vector.broadcast %18 : vector<4x1xf32> to vector<4x4xf32>
    %20 = arith.mulf %15, %19 : vector<4x4xf32>
    %21 = arith.truncf %20 : vector<4x4xf32> to vector<4x4xbf16>
    %cst_5 = arith.constant dense<0.000000e+00> : vector<4x32xf32>
    %22 = tpu.matmul %21, %7, %cst_5 {dimension_numbers = #tpu.dot_dimension_numbers<[1], [0], [0], [1], [0, 0, 1, 1], [], []>} : vector<4x4xbf16>, vector<4x32xbf16>, vector<4x32xf32> -> vector<4x32xf32>
    %23 = vector.extract_strided_slice %1 {offsets = [0, 32], sizes = [4, 32], strides = [1, 1]} : vector<4x192xf32> to vector<4x32xf32>
    %24 = arith.truncf %23 : vector<4x32xf32> to vector<4x32xbf16>
    %25 = vector.extract_strided_slice %1 {offsets = [0, 96], sizes = [4, 32], strides = [1, 1]} : vector<4x192xf32> to vector<4x32xf32>
    %26 = arith.truncf %25 : vector<4x32xf32> to vector<4x32xbf16>
    %27 = vector.extract_strided_slice %1 {offsets = [0, 160], sizes = [4, 32], strides = [1, 1]} : vector<4x192xf32> to vector<4x32xf32>
    %28 = arith.truncf %27 : vector<4x32xf32> to vector<4x32xbf16>
    %cst_6 = arith.constant dense<0.000000e+00> : vector<4x4xf32>
    %29 = tpu.matmul %24, %26, %cst_6 {dimension_numbers = #tpu.dot_dimension_numbers<[1], [1], [0], [0], [0, 0, 1, 0], [], []>} : vector<4x32xbf16>, vector<4x32xbf16>, vector<4x4xf32> -> vector<4x4xf32>
    %cst_7 = arith.constant 0.176776692 : f32
    %30 = vector.broadcast %cst_7 : f32 to vector<4x4xf32>
    %31 = arith.mulf %29, %30 : vector<4x4xf32>
    %cst_8 = arith.constant dense<0xFF800000> : vector<4xf32>
    %32 = vector.multi_reduction <maximumf>, %31, %cst_8 [1] : vector<4x4xf32> to vector<4xf32>
    %33 = vector.shape_cast %32 : vector<4xf32> to vector<4x1xf32>
    %34 = vector.broadcast %33 : vector<4x1xf32> to vector<4x4xf32>
    %35 = arith.subf %31, %34 : vector<4x4xf32>
    %36 = math.exp %35 : vector<4x4xf32>
    %cst_9 = arith.constant dense<0.000000e+00> : vector<4xf32>
    %37 = vector.multi_reduction <add>, %36, %cst_9 [1] : vector<4x4xf32> to vector<4xf32>
    %38 = vector.shape_cast %37 : vector<4xf32> to vector<4x1xf32>
    %39 = tpu.reciprocal %38 {approx = true} : vector<4x1xf32> -> vector<4x1xf32>
    %40 = vector.broadcast %39 : vector<4x1xf32> to vector<4x4xf32>
    %41 = arith.mulf %36, %40 : vector<4x4xf32>
    %42 = arith.truncf %41 : vector<4x4xf32> to vector<4x4xbf16>
    %cst_10 = arith.constant dense<0.000000e+00> : vector<4x32xf32>
    %43 = tpu.matmul %42, %28, %cst_10 {dimension_numbers = #tpu.dot_dimension_numbers<[1], [0], [0], [1], [0, 0, 1, 1], [], []>} : vector<4x4xbf16>, vector<4x32xbf16>, vector<4x32xf32> -> vector<4x32xf32>
    %44 = tpu.concatenate %22, %43 in 1 : vector<4x32xf32>, vector<4x32xf32> -> vector<4x64xf32>
    %c0_11 = arith.constant 0 : index
    %c0_12 = arith.constant 0 : index
    %c0_13 = arith.constant 0 : index
    %45 = vector.load %arg2[%c0_11, %c0_12, %c0_13] : memref<1x4x64xf32, #tpu.memory_space<vmem>>, vector<1x4x64xf32>
    %46 = vector.shape_cast %45 : vector<1x4x64xf32> to vector<4x64xf32>
    %47 = vector.shape_cast %44 : vector<4x64xf32> to vector<1x4x64xf32>
    tpu.vector_store %arg2[%c0_11, %c0_12, %c0_13], %47 {strides = array<i32>} : memref<1x4x64xf32, #tpu.memory_space<vmem>>, vector<1x4x64xf32>,
    return
  }
  func.func @transform_0(%arg0: i32) -> (i32, i32, i32) {
    %c0_i32 = arith.constant 0 : i32
    %c0_i32_0 = arith.constant 0 : i32
    %c0_i32_1 = arith.constant 0 : i32
    return %arg0, %c0_i32, %c0_i32_0 : i32, i32, i32
  }
  func.func @transform_1(%arg0: i32) -> (i32, i32, i32) {
    %c0_i32 = arith.constant 0 : i32
    %c0_i32_0 = arith.constant 0 : i32
    %c0_i32_1 = arith.constant 0 : i32
    return %arg0, %c0_i32, %c0_i32_0 : i32, i32, i32
  }
}

module attributes {stable_mosaic.version = 11 : i64} {
  func.func @_fused_linear_kernel(%arg0: i32, %arg1: i32, %arg2: i32, %arg3: memref<8x64xf32, #tpu.memory_space<vmem>>, %arg4: memref<64x64xbf16, #tpu.memory_space<vmem>>, %arg5: memref<1x64xf32, #tpu.memory_space<vmem>>, %arg6: memref<1x64xf32, #tpu.memory_space<vmem>>, %arg7: memref<8x64xf32, #tpu.memory_space<vmem>>, %arg8: memref<8x64xf32, #tpu.memory_space<vmem>>) attributes {dimension_semantics = [#tpu.dimension_semantics<parallel>, #tpu.dimension_semantics<parallel>, #tpu.dimension_semantics<arbitrary>], iteration_bounds = array<i64: 1, 1, 1>, scalar_prefetch = 0 : i64, scratch_operands = 0 : i64, tpu.core_type = #tpu.core_type<tc>, window_params = [{transform_indices = @transform_0, window_bounds = array<i64: 8, 64>}, {transform_indices = @transform_1, window_bounds = array<i64: 64, 64>}, {transform_indices = @transform_2, window_bounds = array<i64: 1, 64>}, {transform_indices = @transform_3, window_bounds = array<i64: 1, 64>}, {transform_indices = @transform_4, window_bounds = array<i64: 8, 64>}, {transform_indices = @transform_5, window_bounds = array<i64: 8, 64>}]} {
    %c0 = arith.constant 0 : index
    %c0_0 = arith.constant 0 : index
    %0 = vector.load %arg3[%c0, %c0_0] : memref<8x64xf32, #tpu.memory_space<vmem>>, vector<8x64xf32>
    %1 = arith.truncf %0 : vector<8x64xf32> to vector<8x64xbf16>
    %c0_1 = arith.constant 0 : index
    %c0_2 = arith.constant 0 : index
    %2 = vector.load %arg4[%c0_1, %c0_2] : memref<64x64xbf16, #tpu.memory_space<vmem>>, vector<64x64xbf16>
    %cst = arith.constant dense<0.000000e+00> : vector<8x64xf32>
    %3 = tpu.matmul %1, %2, %cst {dimension_numbers = #tpu.dot_dimension_numbers<[1], [0], [0], [1], [0, 0, 1, 1], [], []>} : vector<8x64xbf16>, vector<64x64xbf16>, vector<8x64xf32> -> vector<8x64xf32>
    %c0_3 = arith.constant 0 : index
    %c0_4 = arith.constant 0 : index
    %4 = vector.load %arg5[%c0_3, %c0_4] : memref<1x64xf32, #tpu.memory_space<vmem>>, vector<1x64xf32>
    %5 = vector.broadcast %4 : vector<1x64xf32> to vector<8x64xf32>
    %6 = arith.mulf %3, %5 : vector<8x64xf32>
    %c0_5 = arith.constant 0 : index
    %c0_6 = arith.constant 0 : index
    %7 = vector.load %arg6[%c0_5, %c0_6] : memref<1x64xf32, #tpu.memory_space<vmem>>, vector<1x64xf32>
    %8 = vector.broadcast %7 : vector<1x64xf32> to vector<8x64xf32>
    %9 = arith.addf %6, %8 : vector<8x64xf32>
    %c0_7 = arith.constant 0 : index
    %c0_8 = arith.constant 0 : index
    %10 = vector.load %arg7[%c0_7, %c0_8] : memref<8x64xf32, #tpu.memory_space<vmem>>, vector<8x64xf32>
    %11 = arith.addf %9, %10 : vector<8x64xf32>
    %c0_9 = arith.constant 0 : index
    %c0_10 = arith.constant 0 : index
    %12 = vector.load %arg8[%c0_9, %c0_10] : memref<8x64xf32, #tpu.memory_space<vmem>>, vector<8x64xf32>
    tpu.vector_store %arg8[%c0_9, %c0_10], %11 {strides = array<i32>} : memref<8x64xf32, #tpu.memory_space<vmem>>, vector<8x64xf32>,
    return
  }
  func.func @transform_0(%arg0: i32, %arg1: i32, %arg2: i32) -> (i32, i32) {
    %c0_i32 = arith.constant 0 : i32
    return %arg0, %arg2 : i32, i32
  }
  func.func @transform_1(%arg0: i32, %arg1: i32, %arg2: i32) -> (i32, i32) {
    %c0_i32 = arith.constant 0 : i32
    return %arg2, %arg1 : i32, i32
  }
  func.func @transform_2(%arg0: i32, %arg1: i32, %arg2: i32) -> (i32, i32) {
    %c0_i32 = arith.constant 0 : i32
    %c0_i32_0 = arith.constant 0 : i32
    return %c0_i32, %arg1 : i32, i32
  }
  func.func @transform_3(%arg0: i32, %arg1: i32, %arg2: i32) -> (i32, i32) {
    %c0_i32 = arith.constant 0 : i32
    %c0_i32_0 = arith.constant 0 : i32
    return %c0_i32, %arg1 : i32, i32
  }
  func.func @transform_4(%arg0: i32, %arg1: i32, %arg2: i32) -> (i32, i32) {
    %c0_i32 = arith.constant 0 : i32
    return %arg0, %arg1 : i32, i32
  }
  func.func @transform_5(%arg0: i32, %arg1: i32, %arg2: i32) -> (i32, i32) {
    %c0_i32 = arith.constant 0 : i32
    return %arg0, %arg1 : i32, i32
  }
}

module attributes {stable_mosaic.version = 11 : i64} {
  func.func @_fused_linear_kernel(%arg0: i32, %arg1: i32, %arg2: i32, %arg3: memref<8x64xf32, #tpu.memory_space<vmem>>, %arg4: memref<64x256xbf16, #tpu.memory_space<vmem>>, %arg5: memref<1x64xf32, #tpu.memory_space<vmem>>, %arg6: memref<1x64xf32, #tpu.memory_space<vmem>>, %arg7: memref<8x1xf32, #tpu.memory_space<vmem>>, %arg8: memref<8x1xf32, #tpu.memory_space<vmem>>, %arg9: memref<1x256xf32, #tpu.memory_space<vmem>>, %arg10: memref<1x256xf32, #tpu.memory_space<vmem>>, %arg11: memref<8x256xf32, #tpu.memory_space<vmem>>) attributes {dimension_semantics = [#tpu.dimension_semantics<parallel>, #tpu.dimension_semantics<parallel>, #tpu.dimension_semantics<arbitrary>], iteration_bounds = array<i64: 1, 1, 1>, scalar_prefetch = 0 : i64, scratch_operands = 0 : i64, tpu.core_type = #tpu.core_type<tc>, window_params = [{transform_indices = @transform_0, window_bounds = array<i64: 8, 64>}, {transform_indices = @transform_1, window_bounds = array<i64: 64, 256>}, {transform_indices = @transform_2, window_bounds = array<i64: 1, 64>}, {transform_indices = @transform_3, window_bounds = array<i64: 1, 64>}, {transform_indices = @transform_4, window_bounds = array<i64: 8, 1>}, {transform_indices = @transform_5, window_bounds = array<i64: 8, 1>}, {transform_indices = @transform_6, window_bounds = array<i64: 1, 256>}, {transform_indices = @transform_7, window_bounds = array<i64: 1, 256>}, {transform_indices = @transform_8, window_bounds = array<i64: 8, 256>}]} {
    %c0 = arith.constant 0 : index
    %c0_0 = arith.constant 0 : index
    %0 = vector.load %arg3[%c0, %c0_0] : memref<8x64xf32, #tpu.memory_space<vmem>>, vector<8x64xf32>
    %c0_1 = arith.constant 0 : index
    %c0_2 = arith.constant 0 : index
    %1 = vector.load %arg7[%c0_1, %c0_2] : memref<8x1xf32, #tpu.memory_space<vmem>>, vector<8x1xf32>
    %2 = vector.broadcast %1 : vector<8x1xf32> to vector<8x64xf32>
    %3 = arith.subf %0, %2 : vector<8x64xf32>
    %c0_3 = arith.constant 0 : index
    %c0_4 = arith.constant 0 : index
    %4 = vector.load %arg8[%c0_3, %c0_4] : memref<8x1xf32, #tpu.memory_space<vmem>>, vector<8x1xf32>
    %5 = vector.broadcast %4 : vector<8x1xf32> to vector<8x64xf32>
    %6 = arith.mulf %3, %5 : vector<8x64xf32>
    %c0_5 = arith.constant 0 : index
    %c0_6 = arith.constant 0 : index
    %7 = vector.load %arg5[%c0_5, %c0_6] : memref<1x64xf32, #tpu.memory_space<vmem>>, vector<1x64xf32>
    %8 = vector.broadcast %7 : vector<1x64xf32> to vector<8x64xf32>
    %9 = arith.mulf %6, %8 : vector<8x64xf32>
    %c0_7 = arith.constant 0 : index
    %c0_8 = arith.constant 0 : index
    %10 = vector.load %arg6[%c0_7, %c0_8] : memref<1x64xf32, #tpu.memory_space<vmem>>, vector<1x64xf32>
    %11 = vector.broadcast %10 : vector<1x64xf32> to vector<8x64xf32>
    %12 = arith.addf %9, %11 : vector<8x64xf32>
    %13 = arith.truncf %12 : vector<8x64xf32> to vector<8x64xbf16>
    %c0_9 = arith.constant 0 : index
    %c0_10 = arith.constant 0 : index
    %14 = vector.load %arg4[%c0_9, %c0_10] : memref<64x256xbf16, #tpu.memory_space<vmem>>, vector<64x256xbf16>
    %cst = arith.constant dense<0.000000e+00> : vector<8x256xf32>
    %15 = tpu.matmul %13, %14, %cst {dimension_numbers = #tpu.dot_dimension_numbers<[1], [0], [0], [1], [0, 0, 1, 1], [], []>} : vector<8x64xbf16>, vector<64x256xbf16>, vector<8x256xf32> -> vector<8x256xf32>
    %c0_11 = arith.constant 0 : index
    %c0_12 = arith.constant 0 : index
    %16 = vector.load %arg9[%c0_11, %c0_12] : memref<1x256xf32, #tpu.memory_space<vmem>>, vector<1x256xf32>
    %17 = vector.broadcast %16 : vector<1x256xf32> to vector<8x256xf32>
    %18 = arith.mulf %15, %17 : vector<8x256xf32>
    %c0_13 = arith.constant 0 : index
    %c0_14 = arith.constant 0 : index
    %19 = vector.load %arg10[%c0_13, %c0_14] : memref<1x256xf32, #tpu.memory_space<vmem>>, vector<1x256xf32>
    %20 = vector.broadcast %19 : vector<1x256xf32> to vector<8x256xf32>
    %21 = arith.addf %18, %20 : vector<8x256xf32>
    %cst_15 = arith.constant 5.000000e-01 : f32
    %22 = vector.broadcast %cst_15 : f32 to vector<8x256xf32>
    %23 = arith.mulf %22, %21 : vector<8x256xf32>
    %cst_16 = arith.constant 0.707106769 : f32
    %24 = vector.broadcast %cst_16 : f32 to vector<8x256xf32>
    %25 = arith.mulf %21, %24 : vector<8x256xf32>
    %26 = math.erf %25 : vector<8x256xf32>
    %cst_17 = arith.constant 1.000000e+00 : f32
    %27 = vector.broadcast %cst_17 : f32 to vector<8x256xf32>
    %28 = arith.addf %27, %26 : vector<8x256xf32>
    %29 = arith.mulf %23, %28 : vector<8x256xf32>
    %c0_18 = arith.constant 0 : index
    %c0_19 = arith.constant 0 : index
    %30 = vector.load %arg11[%c0_18, %c0_19] : memref<8x256xf32, #tpu.memory_space<vmem>>, vector<8x256xf32>
    tpu.vector_store %arg11[%c0_18, %c0_19], %29 {strides = array<i32>} : memref<8x256xf32, #tpu.memory_space<vmem>>, vector<8x256xf32>,
    return
  }
  func.func @transform_0(%arg0: i32, %arg1: i32, %arg2: i32) -> (i32, i32) {
    %c0_i32 = arith.constant 0 : i32
    return %arg0, %arg2 : i32, i32
  }
  func.func @transform_1(%arg0: i32, %arg1: i32, %arg2: i32) -> (i32, i32) {
    %c0_i32 = arith.constant 0 : i32
    return %arg2, %arg1 : i32, i32
  }
  func.func @transform_2(%arg0: i32, %arg1: i32, %arg2: i32) -> (i32, i32) {
    %c0_i32 = arith.constant 0 : i32
    %c0_i32_0 = arith.constant 0 : i32
    return %c0_i32, %arg2 : i32, i32
  }
  func.func @transform_3(%arg0: i32, %arg1: i32, %arg2: i32) -> (i32, i32) {
    %c0_i32 = arith.constant 0 : i32
    %c0_i32_0 = arith.constant 0 : i32
    return %c0_i32, %arg2 : i32, i32
  }
  func.func @transform_4(%arg0: i32, %arg1: i32, %arg2: i32) -> (i32, i32) {
    %c0_i32 = arith.constant 0 : i32
    %c0_i32_0 = arith.constant 0 : i32
    return %arg0, %c0_i32 : i32, i32
  }
  func.func @transform_5(%arg0: i32, %arg1: i32, %arg2: i32) -> (i32, i32) {
    %c0_i32 = arith.constant 0 : i32
    %c0_i32_0 = arith.constant 0 : i32
    return %arg0, %c0_i32 : i32, i32
  }
  func.func @transform_6(%arg0: i32, %arg1: i32, %arg2: i32) -> (i32, i32) {
    %c0_i32 = arith.constant 0 : i32
    %c0_i32_0 = arith.constant 0 : i32
    return %c0_i32, %arg1 : i32, i32
  }
  func.func @transform_7(%arg0: i32, %arg1: i32, %arg2: i32) -> (i32, i32) {
    %c0_i32 = arith.constant 0 : i32
    %c0_i32_0 = arith.constant 0 : i32
    return %c0_i32, %arg1 : i32, i32
  }
  func.func @transform_8(%arg0: i32, %arg1: i32, %arg2: i32) -> (i32, i32) {
    %c0_i32 = arith.constant 0 : i32
    return %arg0, %arg1 : i32, i32
  }
}

module attributes {stable_mosaic.version = 11 : i64} {
  func.func @_fused_linear_kernel(%arg0: i32, %arg1: i32, %arg2: i32, %arg3: memref<8x256xf32, #tpu.memory_space<vmem>>, %arg4: memref<256x64xbf16, #tpu.memory_space<vmem>>, %arg5: memref<1x64xf32, #tpu.memory_space<vmem>>, %arg6: memref<1x64xf32, #tpu.memory_space<vmem>>, %arg7: memref<8x64xf32, #tpu.memory_space<vmem>>, %arg8: memref<8x64xf32, #tpu.memory_space<vmem>>) attributes {dimension_semantics = [#tpu.dimension_semantics<parallel>, #tpu.dimension_semantics<parallel>, #tpu.dimension_semantics<arbitrary>], iteration_bounds = array<i64: 1, 1, 1>, scalar_prefetch = 0 : i64, scratch_operands = 0 : i64, tpu.core_type = #tpu.core_type<tc>, window_params = [{transform_indices = @transform_0, window_bounds = array<i64: 8, 256>}, {transform_indices = @transform_1, window_bounds = array<i64: 256, 64>}, {transform_indices = @transform_2, window_bounds = array<i64: 1, 64>}, {transform_indices = @transform_3, window_bounds = array<i64: 1, 64>}, {transform_indices = @transform_4, window_bounds = array<i64: 8, 64>}, {transform_indices = @transform_5, window_bounds = array<i64: 8, 64>}]} {
    %c0 = arith.constant 0 : index
    %c0_0 = arith.constant 0 : index
    %0 = vector.load %arg3[%c0, %c0_0] : memref<8x256xf32, #tpu.memory_space<vmem>>, vector<8x256xf32>
    %1 = arith.truncf %0 : vector<8x256xf32> to vector<8x256xbf16>
    %c0_1 = arith.constant 0 : index
    %c0_2 = arith.constant 0 : index
    %2 = vector.load %arg4[%c0_1, %c0_2] : memref<256x64xbf16, #tpu.memory_space<vmem>>, vector<256x64xbf16>
    %cst = arith.constant dense<0.000000e+00> : vector<8x64xf32>
    %3 = tpu.matmul %1, %2, %cst {dimension_numbers = #tpu.dot_dimension_numbers<[1], [0], [0], [1], [0, 0, 1, 1], [], []>} : vector<8x256xbf16>, vector<256x64xbf16>, vector<8x64xf32> -> vector<8x64xf32>
    %c0_3 = arith.constant 0 : index
    %c0_4 = arith.constant 0 : index
    %4 = vector.load %arg5[%c0_3, %c0_4] : memref<1x64xf32, #tpu.memory_space<vmem>>, vector<1x64xf32>
    %5 = vector.broadcast %4 : vector<1x64xf32> to vector<8x64xf32>
    %6 = arith.mulf %3, %5 : vector<8x64xf32>
    %c0_5 = arith.constant 0 : index
    %c0_6 = arith.constant 0 : index
    %7 = vector.load %arg6[%c0_5, %c0_6] : memref<1x64xf32, #tpu.memory_space<vmem>>, vector<1x64xf32>
    %8 = vector.broadcast %7 : vector<1x64xf32> to vector<8x64xf32>
    %9 = arith.addf %6, %8 : vector<8x64xf32>
    %c0_7 = arith.constant 0 : index
    %c0_8 = arith.constant 0 : index
    %10 = vector.load %arg7[%c0_7, %c0_8] : memref<8x64xf32, #tpu.memory_space<vmem>>, vector<8x64xf32>
    %11 = arith.addf %9, %10 : vector<8x64xf32>
    %c0_9 = arith.constant 0 : index
    %c0_10 = arith.constant 0 : index
    %12 = vector.load %arg8[%c0_9, %c0_10] : memref<8x64xf32, #tpu.memory_space<vmem>>, vector<8x64xf32>
    tpu.vector_store %arg8[%c0_9, %c0_10], %11 {strides = array<i32>} : memref<8x64xf32, #tpu.memory_space<vmem>>, vector<8x64xf32>,
    return
  }
  func.func @transform_0(%arg0: i32, %arg1: i32, %arg2: i32) -> (i32, i32) {
    %c0_i32 = arith.constant 0 : i32
    return %arg0, %arg2 : i32, i32
  }
  func.func @transform_1(%arg0: i32, %arg1: i32, %arg2: i32) -> (i32, i32) {
    %c0_i32 = arith.constant 0 : i32
    return %arg2, %arg1 : i32, i32
  }
  func.func @transform_2(%arg0: i32, %arg1: i32, %arg2: i32) -> (i32, i32) {
    %c0_i32 = arith.constant 0 : i32
    %c0_i32_0 = arith.constant 0 : i32
    return %c0_i32, %arg1 : i32, i32
  }
  func.func @transform_3(%arg0: i32, %arg1: i32, %arg2: i32) -> (i32, i32) {
    %c0_i32 = arith.constant 0 : i32
    %c0_i32_0 = arith.constant 0 : i32
    return %c0_i32, %arg1 : i32, i32
  }
  func.func @transform_4(%arg0: i32, %arg1: i32, %arg2: i32) -> (i32, i32) {
    %c0_i32 = arith.constant 0 : i32
    return %arg0, %arg1 : i32, i32
  }
  func.func @transform_5(%arg0: i32, %arg1: i32, %arg2: i32) -> (i32, i32) {
    %c0_i32 = arith.constant 0 : i32
    return %arg0, %arg1 : i32, i32
  }
}

module attributes {stable_mosaic.version = 11 : i64} {
  func.func @_ln_stats_kernel(%arg0: i32, %arg1: memref<32x16xf32, #tpu.memory_space<vmem>>, %arg2: memref<32x1xf32, #tpu.memory_space<vmem>>, %arg3: memref<32x1xf32, #tpu.memory_space<vmem>>) attributes {dimension_semantics = [#tpu.dimension_semantics<parallel>], iteration_bounds = array<i64: 1>, scalar_prefetch = 0 : i64, scratch_operands = 0 : i64, tpu.core_type = #tpu.core_type<tc>, window_params = [{transform_indices = @transform_0, window_bounds = array<i64: 32, 16>}, {transform_indices = @transform_1, window_bounds = array<i64: 32, 1>}, {transform_indices = @transform_2, window_bounds = array<i64: 32, 1>}]} {
    %c0 = arith.constant 0 : index
    %c0_0 = arith.constant 0 : index
    %0 = vector.load %arg1[%c0, %c0_0] : memref<32x16xf32, #tpu.memory_space<vmem>>, vector<32x16xf32>
    %cst = arith.constant dense<0.000000e+00> : vector<32xf32>
    %1 = vector.multi_reduction <add>, %0, %cst [1] : vector<32x16xf32> to vector<32xf32>
    %2 = vector.shape_cast %1 : vector<32xf32> to vector<32x1xf32>
    %cst_1 = arith.constant 1.600000e+01 : f32
    %3 = vector.broadcast %cst_1 : f32 to vector<32x1xf32>
    %4 = arith.divf %2, %3 : vector<32x1xf32>
    %5 = vector.broadcast %4 : vector<32x1xf32> to vector<32x16xf32>
    %6 = arith.subf %0, %5 : vector<32x16xf32>
    %7 = arith.mulf %6, %6 : vector<32x16xf32>
    %cst_2 = arith.constant dense<0.000000e+00> : vector<32xf32>
    %8 = vector.multi_reduction <add>, %7, %cst_2 [1] : vector<32x16xf32> to vector<32xf32>
    %9 = vector.shape_cast %8 : vector<32xf32> to vector<32x1xf32>
    %cst_3 = arith.constant 1.600000e+01 : f32
    %10 = vector.broadcast %cst_3 : f32 to vector<32x1xf32>
    %11 = arith.divf %9, %10 : vector<32x1xf32>
    %c0_4 = arith.constant 0 : index
    %c0_5 = arith.constant 0 : index
    %12 = vector.load %arg2[%c0_4, %c0_5] : memref<32x1xf32, #tpu.memory_space<vmem>>, vector<32x1xf32>
    tpu.vector_store %arg2[%c0_4, %c0_5], %4 {strides = array<i32>} : memref<32x1xf32, #tpu.memory_space<vmem>>, vector<32x1xf32>,
    %cst_6 = arith.constant 9.99999974E-6 : f32
    %13 = vector.broadcast %cst_6 : f32 to vector<32x1xf32>
    %14 = arith.addf %11, %13 : vector<32x1xf32>
    %15 = math.rsqrt %14 : vector<32x1xf32>
    %c0_7 = arith.constant 0 : index
    %c0_8 = arith.constant 0 : index
    %16 = vector.load %arg3[%c0_7, %c0_8] : memref<32x1xf32, #tpu.memory_space<vmem>>, vector<32x1xf32>
    tpu.vector_store %arg3[%c0_7, %c0_8], %15 {strides = array<i32>} : memref<32x1xf32, #tpu.memory_space<vmem>>, vector<32x1xf32>,
    return
  }
  func.func @transform_0(%arg0: i32) -> (i32, i32) {
    %c0_i32 = arith.constant 0 : i32
    %c0_i32_0 = arith.constant 0 : i32
    return %arg0, %c0_i32 : i32, i32
  }
  func.func @transform_1(%arg0: i32) -> (i32, i32) {
    %c0_i32 = arith.constant 0 : i32
    %c0_i32_0 = arith.constant 0 : i32
    return %arg0, %c0_i32 : i32, i32
  }
  func.func @transform_2(%arg0: i32) -> (i32, i32) {
    %c0_i32 = arith.constant 0 : i32
    %c0_i32_0 = arith.constant 0 : i32
    return %arg0, %c0_i32 : i32, i32
  }
}

module attributes {stable_mosaic.version = 11 : i64} {
  func.func @_fused_linear_kernel(%arg0: i32, %arg1: i32, %arg2: i32, %arg3: memref<32x16xf32, #tpu.memory_space<vmem>>, %arg4: memref<16x16xbf16, #tpu.memory_space<vmem>>, %arg5: memref<1x16xf32, #tpu.memory_space<vmem>>, %arg6: memref<1x16xf32, #tpu.memory_space<vmem>>, %arg7: memref<32x1xf32, #tpu.memory_space<vmem>>, %arg8: memref<32x1xf32, #tpu.memory_space<vmem>>, %arg9: memref<1x16xf32, #tpu.memory_space<vmem>>, %arg10: memref<1x16xf32, #tpu.memory_space<vmem>>, %arg11: memref<32x16xf32, #tpu.memory_space<vmem>>) attributes {dimension_semantics = [#tpu.dimension_semantics<parallel>, #tpu.dimension_semantics<parallel>, #tpu.dimension_semantics<arbitrary>], iteration_bounds = array<i64: 1, 1, 1>, scalar_prefetch = 0 : i64, scratch_operands = 0 : i64, tpu.core_type = #tpu.core_type<tc>, window_params = [{transform_indices = @transform_0, window_bounds = array<i64: 32, 16>}, {transform_indices = @transform_1, window_bounds = array<i64: 16, 16>}, {transform_indices = @transform_2, window_bounds = array<i64: 1, 16>}, {transform_indices = @transform_3, window_bounds = array<i64: 1, 16>}, {transform_indices = @transform_4, window_bounds = array<i64: 32, 1>}, {transform_indices = @transform_5, window_bounds = array<i64: 32, 1>}, {transform_indices = @transform_6, window_bounds = array<i64: 1, 16>}, {transform_indices = @transform_7, window_bounds = array<i64: 1, 16>}, {transform_indices = @transform_8, window_bounds = array<i64: 32, 16>}]} {
    %c0 = arith.constant 0 : index
    %c0_0 = arith.constant 0 : index
    %0 = vector.load %arg3[%c0, %c0_0] : memref<32x16xf32, #tpu.memory_space<vmem>>, vector<32x16xf32>
    %c0_1 = arith.constant 0 : index
    %c0_2 = arith.constant 0 : index
    %1 = vector.load %arg7[%c0_1, %c0_2] : memref<32x1xf32, #tpu.memory_space<vmem>>, vector<32x1xf32>
    %2 = vector.broadcast %1 : vector<32x1xf32> to vector<32x16xf32>
    %3 = arith.subf %0, %2 : vector<32x16xf32>
    %c0_3 = arith.constant 0 : index
    %c0_4 = arith.constant 0 : index
    %4 = vector.load %arg8[%c0_3, %c0_4] : memref<32x1xf32, #tpu.memory_space<vmem>>, vector<32x1xf32>
    %5 = vector.broadcast %4 : vector<32x1xf32> to vector<32x16xf32>
    %6 = arith.mulf %3, %5 : vector<32x16xf32>
    %c0_5 = arith.constant 0 : index
    %c0_6 = arith.constant 0 : index
    %7 = vector.load %arg5[%c0_5, %c0_6] : memref<1x16xf32, #tpu.memory_space<vmem>>, vector<1x16xf32>
    %8 = vector.broadcast %7 : vector<1x16xf32> to vector<32x16xf32>
    %9 = arith.mulf %6, %8 : vector<32x16xf32>
    %c0_7 = arith.constant 0 : index
    %c0_8 = arith.constant 0 : index
    %10 = vector.load %arg6[%c0_7, %c0_8] : memref<1x16xf32, #tpu.memory_space<vmem>>, vector<1x16xf32>
    %11 = vector.broadcast %10 : vector<1x16xf32> to vector<32x16xf32>
    %12 = arith.addf %9, %11 : vector<32x16xf32>
    %13 = arith.truncf %12 : vector<32x16xf32> to vector<32x16xbf16>
    %c0_9 = arith.constant 0 : index
    %c0_10 = arith.constant 0 : index
    %14 = vector.load %arg4[%c0_9, %c0_10] : memref<16x16xbf16, #tpu.memory_space<vmem>>, vector<16x16xbf16>
    %cst = arith.constant dense<0.000000e+00> : vector<32x16xf32>
    %15 = tpu.matmul %13, %14, %cst {dimension_numbers = #tpu.dot_dimension_numbers<[1], [0], [0], [1], [0, 0, 1, 1], [], []>} : vector<32x16xbf16>, vector<16x16xbf16>, vector<32x16xf32> -> vector<32x16xf32>
    %c0_11 = arith.constant 0 : index
    %c0_12 = arith.constant 0 : index
    %16 = vector.load %arg9[%c0_11, %c0_12] : memref<1x16xf32, #tpu.memory_space<vmem>>, vector<1x16xf32>
    %17 = vector.broadcast %16 : vector<1x16xf32> to vector<32x16xf32>
    %18 = arith.mulf %15, %17 : vector<32x16xf32>
    %c0_13 = arith.constant 0 : index
    %c0_14 = arith.constant 0 : index
    %19 = vector.load %arg10[%c0_13, %c0_14] : memref<1x16xf32, #tpu.memory_space<vmem>>, vector<1x16xf32>
    %20 = vector.broadcast %19 : vector<1x16xf32> to vector<32x16xf32>
    %21 = arith.addf %18, %20 : vector<32x16xf32>
    %c0_15 = arith.constant 0 : index
    %c0_16 = arith.constant 0 : index
    %22 = vector.load %arg11[%c0_15, %c0_16] : memref<32x16xf32, #tpu.memory_space<vmem>>, vector<32x16xf32>
    tpu.vector_store %arg11[%c0_15, %c0_16], %21 {strides = array<i32>} : memref<32x16xf32, #tpu.memory_space<vmem>>, vector<32x16xf32>,
    return
  }
  func.func @transform_0(%arg0: i32, %arg1: i32, %arg2: i32) -> (i32, i32) {
    %c0_i32 = arith.constant 0 : i32
    return %arg0, %arg2 : i32, i32
  }
  func.func @transform_1(%arg0: i32, %arg1: i32, %arg2: i32) -> (i32, i32) {
    %c0_i32 = arith.constant 0 : i32
    return %arg2, %arg1 : i32, i32
  }
  func.func @transform_2(%arg0: i32, %arg1: i32, %arg2: i32) -> (i32, i32) {
    %c0_i32 = arith.constant 0 : i32
    %c0_i32_0 = arith.constant 0 : i32
    return %c0_i32, %arg2 : i32, i32
  }
  func.func @transform_3(%arg0: i32, %arg1: i32, %arg2: i32) -> (i32, i32) {
    %c0_i32 = arith.constant 0 : i32
    %c0_i32_0 = arith.constant 0 : i32
    return %c0_i32, %arg2 : i32, i32
  }
  func.func @transform_4(%arg0: i32, %arg1: i32, %arg2: i32) -> (i32, i32) {
    %c0_i32 = arith.constant 0 : i32
    %c0_i32_0 = arith.constant 0 : i32
    return %arg0, %c0_i32 : i32, i32
  }
  func.func @transform_5(%arg0: i32, %arg1: i32, %arg2: i32) -> (i32, i32) {
    %c0_i32 = arith.constant 0 : i32
    %c0_i32_0 = arith.constant 0 : i32
    return %arg0, %c0_i32 : i32, i32
  }
  func.func @transform_6(%arg0: i32, %arg1: i32, %arg2: i32) -> (i32, i32) {
    %c0_i32 = arith.constant 0 : i32
    %c0_i32_0 = arith.constant 0 : i32
    return %c0_i32, %arg1 : i32, i32
  }
  func.func @transform_7(%arg0: i32, %arg1: i32, %arg2: i32) -> (i32, i32) {
    %c0_i32 = arith.constant 0 : i32
    %c0_i32_0 = arith.constant 0 : i32
    return %c0_i32, %arg1 : i32, i32
  }
  func.func @transform_8(%arg0: i32, %arg1: i32, %arg2: i32) -> (i32, i32) {
    %c0_i32 = arith.constant 0 : i32
    return %arg0, %arg1 : i32, i32
  }
}

module attributes {stable_mosaic.version = 11 : i64} {
  func.func @_attn_core_kernel(%arg0: i32, %arg1: memref<1x16x48xf32, #tpu.memory_space<vmem>>, %arg2: memref<1x16x16xf32, #tpu.memory_space<vmem>>) attributes {dimension_semantics = [#tpu.dimension_semantics<parallel>], iteration_bounds = array<i64: 2>, scalar_prefetch = 0 : i64, scratch_operands = 0 : i64, tpu.core_type = #tpu.core_type<tc>, window_params = [{transform_indices = @transform_0, window_bounds = array<i64: 1, 16, 48>}, {transform_indices = @transform_1, window_bounds = array<i64: 1, 16, 16>}]} {
    %c0 = arith.constant 0 : index
    %c0_0 = arith.constant 0 : index
    %c0_1 = arith.constant 0 : index
    %0 = vector.load %arg1[%c0, %c0_0, %c0_1] : memref<1x16x48xf32, #tpu.memory_space<vmem>>, vector<1x16x48xf32>
    %1 = vector.shape_cast %0 : vector<1x16x48xf32> to vector<16x48xf32>
    %2 = vector.extract_strided_slice %1 {offsets = [0, 0], sizes = [16, 8], strides = [1, 1]} : vector<16x48xf32> to vector<16x8xf32>
    %3 = arith.truncf %2 : vector<16x8xf32> to vector<16x8xbf16>
    %4 = vector.extract_strided_slice %1 {offsets = [0, 16], sizes = [16, 8], strides = [1, 1]} : vector<16x48xf32> to vector<16x8xf32>
    %5 = arith.truncf %4 : vector<16x8xf32> to vector<16x8xbf16>
    %6 = vector.extract_strided_slice %1 {offsets = [0, 32], sizes = [16, 8], strides = [1, 1]} : vector<16x48xf32> to vector<16x8xf32>
    %7 = arith.truncf %6 : vector<16x8xf32> to vector<16x8xbf16>
    %cst = arith.constant dense<0.000000e+00> : vector<16x16xf32>
    %8 = tpu.matmul %3, %5, %cst {dimension_numbers = #tpu.dot_dimension_numbers<[1], [1], [0], [0], [0, 0, 1, 0], [], []>} : vector<16x8xbf16>, vector<16x8xbf16>, vector<16x16xf32> -> vector<16x16xf32>
    %cst_2 = arith.constant 0.353553385 : f32
    %9 = vector.broadcast %cst_2 : f32 to vector<16x16xf32>
    %10 = arith.mulf %8, %9 : vector<16x16xf32>
    %cst_3 = arith.constant dense<0xFF800000> : vector<16xf32>
    %11 = vector.multi_reduction <maximumf>, %10, %cst_3 [1] : vector<16x16xf32> to vector<16xf32>
    %12 = vector.shape_cast %11 : vector<16xf32> to vector<16x1xf32>
    %13 = vector.broadcast %12 : vector<16x1xf32> to vector<16x16xf32>
    %14 = arith.subf %10, %13 : vector<16x16xf32>
    %15 = math.exp %14 : vector<16x16xf32>
    %cst_4 = arith.constant dense<0.000000e+00> : vector<16xf32>
    %16 = vector.multi_reduction <add>, %15, %cst_4 [1] : vector<16x16xf32> to vector<16xf32>
    %17 = vector.shape_cast %16 : vector<16xf32> to vector<16x1xf32>
    %18 = tpu.reciprocal %17 {approx = true} : vector<16x1xf32> -> vector<16x1xf32>
    %19 = vector.broadcast %18 : vector<16x1xf32> to vector<16x16xf32>
    %20 = arith.mulf %15, %19 : vector<16x16xf32>
    %21 = arith.truncf %20 : vector<16x16xf32> to vector<16x16xbf16>
    %cst_5 = arith.constant dense<0.000000e+00> : vector<16x8xf32>
    %22 = tpu.matmul %21, %7, %cst_5 {dimension_numbers = #tpu.dot_dimension_numbers<[1], [0], [0], [1], [0, 0, 1, 1], [], []>} : vector<16x16xbf16>, vector<16x8xbf16>, vector<16x8xf32> -> vector<16x8xf32>
    %23 = vector.extract_strided_slice %1 {offsets = [0, 8], sizes = [16, 8], strides = [1, 1]} : vector<16x48xf32> to vector<16x8xf32>
    %24 = arith.truncf %23 : vector<16x8xf32> to vector<16x8xbf16>
    %25 = vector.extract_strided_slice %1 {offsets = [0, 24], sizes = [16, 8], strides = [1, 1]} : vector<16x48xf32> to vector<16x8xf32>
    %26 = arith.truncf %25 : vector<16x8xf32> to vector<16x8xbf16>
    %27 = vector.extract_strided_slice %1 {offsets = [0, 40], sizes = [16, 8], strides = [1, 1]} : vector<16x48xf32> to vector<16x8xf32>
    %28 = arith.truncf %27 : vector<16x8xf32> to vector<16x8xbf16>
    %cst_6 = arith.constant dense<0.000000e+00> : vector<16x16xf32>
    %29 = tpu.matmul %24, %26, %cst_6 {dimension_numbers = #tpu.dot_dimension_numbers<[1], [1], [0], [0], [0, 0, 1, 0], [], []>} : vector<16x8xbf16>, vector<16x8xbf16>, vector<16x16xf32> -> vector<16x16xf32>
    %cst_7 = arith.constant 0.353553385 : f32
    %30 = vector.broadcast %cst_7 : f32 to vector<16x16xf32>
    %31 = arith.mulf %29, %30 : vector<16x16xf32>
    %cst_8 = arith.constant dense<0xFF800000> : vector<16xf32>
    %32 = vector.multi_reduction <maximumf>, %31, %cst_8 [1] : vector<16x16xf32> to vector<16xf32>
    %33 = vector.shape_cast %32 : vector<16xf32> to vector<16x1xf32>
    %34 = vector.broadcast %33 : vector<16x1xf32> to vector<16x16xf32>
    %35 = arith.subf %31, %34 : vector<16x16xf32>
    %36 = math.exp %35 : vector<16x16xf32>
    %cst_9 = arith.constant dense<0.000000e+00> : vector<16xf32>
    %37 = vector.multi_reduction <add>, %36, %cst_9 [1] : vector<16x16xf32> to vector<16xf32>
    %38 = vector.shape_cast %37 : vector<16xf32> to vector<16x1xf32>
    %39 = tpu.reciprocal %38 {approx = true} : vector<16x1xf32> -> vector<16x1xf32>
    %40 = vector.broadcast %39 : vector<16x1xf32> to vector<16x16xf32>
    %41 = arith.mulf %36, %40 : vector<16x16xf32>
    %42 = arith.truncf %41 : vector<16x16xf32> to vector<16x16xbf16>
    %cst_10 = arith.constant dense<0.000000e+00> : vector<16x8xf32>
    %43 = tpu.matmul %42, %28, %cst_10 {dimension_numbers = #tpu.dot_dimension_numbers<[1], [0], [0], [1], [0, 0, 1, 1], [], []>} : vector<16x16xbf16>, vector<16x8xbf16>, vector<16x8xf32> -> vector<16x8xf32>
    %44 = tpu.concatenate %22, %43 in 1 : vector<16x8xf32>, vector<16x8xf32> -> vector<16x16xf32>
    %c0_11 = arith.constant 0 : index
    %c0_12 = arith.constant 0 : index
    %c0_13 = arith.constant 0 : index
    %45 = vector.load %arg2[%c0_11, %c0_12, %c0_13] : memref<1x16x16xf32, #tpu.memory_space<vmem>>, vector<1x16x16xf32>
    %46 = vector.shape_cast %45 : vector<1x16x16xf32> to vector<16x16xf32>
    %47 = vector.shape_cast %44 : vector<16x16xf32> to vector<1x16x16xf32>
    tpu.vector_store %arg2[%c0_11, %c0_12, %c0_13], %47 {strides = array<i32>} : memref<1x16x16xf32, #tpu.memory_space<vmem>>, vector<1x16x16xf32>,
    return
  }
  func.func @transform_0(%arg0: i32) -> (i32, i32, i32) {
    %c0_i32 = arith.constant 0 : i32
    %c0_i32_0 = arith.constant 0 : i32
    %c0_i32_1 = arith.constant 0 : i32
    return %arg0, %c0_i32, %c0_i32_0 : i32, i32, i32
  }
  func.func @transform_1(%arg0: i32) -> (i32, i32, i32) {
    %c0_i32 = arith.constant 0 : i32
    %c0_i32_0 = arith.constant 0 : i32
    %c0_i32_1 = arith.constant 0 : i32
    return %arg0, %c0_i32, %c0_i32_0 : i32, i32, i32
  }
}

module attributes {stable_mosaic.version = 11 : i64} {
  func.func @_fused_linear_kernel(%arg0: i32, %arg1: i32, %arg2: i32, %arg3: memref<32x16xf32, #tpu.memory_space<vmem>>, %arg4: memref<16x48xbf16, #tpu.memory_space<vmem>>, %arg5: memref<1x16xf32, #tpu.memory_space<vmem>>, %arg6: memref<1x16xf32, #tpu.memory_space<vmem>>, %arg7: memref<32x1xf32, #tpu.memory_space<vmem>>, %arg8: memref<32x1xf32, #tpu.memory_space<vmem>>, %arg9: memref<32x48xf32, #tpu.memory_space<vmem>>) attributes {dimension_semantics = [#tpu.dimension_semantics<parallel>, #tpu.dimension_semantics<parallel>, #tpu.dimension_semantics<arbitrary>], iteration_bounds = array<i64: 1, 1, 1>, scalar_prefetch = 0 : i64, scratch_operands = 0 : i64, tpu.core_type = #tpu.core_type<tc>, window_params = [{transform_indices = @transform_0, window_bounds = array<i64: 32, 16>}, {transform_indices = @transform_1, window_bounds = array<i64: 16, 48>}, {transform_indices = @transform_2, window_bounds = array<i64: 1, 16>}, {transform_indices = @transform_3, window_bounds = array<i64: 1, 16>}, {transform_indices = @transform_4, window_bounds = array<i64: 32, 1>}, {transform_indices = @transform_5, window_bounds = array<i64: 32, 1>}, {transform_indices = @transform_6, window_bounds = array<i64: 32, 48>}]} {
    %c0 = arith.constant 0 : index
    %c0_0 = arith.constant 0 : index
    %0 = vector.load %arg3[%c0, %c0_0] : memref<32x16xf32, #tpu.memory_space<vmem>>, vector<32x16xf32>
    %c0_1 = arith.constant 0 : index
    %c0_2 = arith.constant 0 : index
    %1 = vector.load %arg7[%c0_1, %c0_2] : memref<32x1xf32, #tpu.memory_space<vmem>>, vector<32x1xf32>
    %2 = vector.broadcast %1 : vector<32x1xf32> to vector<32x16xf32>
    %3 = arith.subf %0, %2 : vector<32x16xf32>
    %c0_3 = arith.constant 0 : index
    %c0_4 = arith.constant 0 : index
    %4 = vector.load %arg8[%c0_3, %c0_4] : memref<32x1xf32, #tpu.memory_space<vmem>>, vector<32x1xf32>
    %5 = vector.broadcast %4 : vector<32x1xf32> to vector<32x16xf32>
    %6 = arith.mulf %3, %5 : vector<32x16xf32>
    %c0_5 = arith.constant 0 : index
    %c0_6 = arith.constant 0 : index
    %7 = vector.load %arg5[%c0_5, %c0_6] : memref<1x16xf32, #tpu.memory_space<vmem>>, vector<1x16xf32>
    %8 = vector.broadcast %7 : vector<1x16xf32> to vector<32x16xf32>
    %9 = arith.mulf %6, %8 : vector<32x16xf32>
    %c0_7 = arith.constant 0 : index
    %c0_8 = arith.constant 0 : index
    %10 = vector.load %arg6[%c0_7, %c0_8] : memref<1x16xf32, #tpu.memory_space<vmem>>, vector<1x16xf32>
    %11 = vector.broadcast %10 : vector<1x16xf32> to vector<32x16xf32>
    %12 = arith.addf %9, %11 : vector<32x16xf32>
    %13 = arith.truncf %12 : vector<32x16xf32> to vector<32x16xbf16>
    %c0_9 = arith.constant 0 : index
    %c0_10 = arith.constant 0 : index
    %14 = vector.load %arg4[%c0_9, %c0_10] : memref<16x48xbf16, #tpu.memory_space<vmem>>, vector<16x48xbf16>
    %cst = arith.constant dense<0.000000e+00> : vector<32x48xf32>
    %15 = tpu.matmul %13, %14, %cst {dimension_numbers = #tpu.dot_dimension_numbers<[1], [0], [0], [1], [0, 0, 1, 1], [], []>} : vector<32x16xbf16>, vector<16x48xbf16>, vector<32x48xf32> -> vector<32x48xf32>
    %c0_11 = arith.constant 0 : index
    %c0_12 = arith.constant 0 : index
    %16 = vector.load %arg9[%c0_11, %c0_12] : memref<32x48xf32, #tpu.memory_space<vmem>>, vector<32x48xf32>
    tpu.vector_store %arg9[%c0_11, %c0_12], %15 {strides = array<i32>} : memref<32x48xf32, #tpu.memory_space<vmem>>, vector<32x48xf32>,
    return
  }
  func.func @transform_0(%arg0: i32, %arg1: i32, %arg2: i32) -> (i32, i32) {
    %c0_i32 = arith.constant 0 : i32
    return %arg0, %arg2 : i32, i32
  }
  func.func @transform_1(%arg0: i32, %arg1: i32, %arg2: i32) -> (i32, i32) {
    %c0_i32 = arith.constant 0 : i32
    return %arg2, %arg1 : i32, i32
  }
  func.func @transform_2(%arg0: i32, %arg1: i32, %arg2: i32) -> (i32, i32) {
    %c0_i32 = arith.constant 0 : i32
    %c0_i32_0 = arith.constant 0 : i32
    return %c0_i32, %arg2 : i32, i32
  }
  func.func @transform_3(%arg0: i32, %arg1: i32, %arg2: i32) -> (i32, i32) {
    %c0_i32 = arith.constant 0 : i32
    %c0_i32_0 = arith.constant 0 : i32
    return %c0_i32, %arg2 : i32, i32
  }
  func.func @transform_4(%arg0: i32, %arg1: i32, %arg2: i32) -> (i32, i32) {
    %c0_i32 = arith.constant 0 : i32
    %c0_i32_0 = arith.constant 0 : i32
    return %arg0, %c0_i32 : i32, i32
  }
  func.func @transform_5(%arg0: i32, %arg1: i32, %arg2: i32) -> (i32, i32) {
    %c0_i32 = arith.constant 0 : i32
    %c0_i32_0 = arith.constant 0 : i32
    return %arg0, %c0_i32 : i32, i32
  }
  func.func @transform_6(%arg0: i32, %arg1: i32, %arg2: i32) -> (i32, i32) {
    %c0_i32 = arith.constant 0 : i32
    return %arg0, %arg1 : i32, i32
  }
}

module attributes {stable_mosaic.version = 11 : i64} {
  func.func @_fused_linear_kernel(%arg0: i32, %arg1: i32, %arg2: i32, %arg3: memref<32x16xf32, #tpu.memory_space<vmem>>, %arg4: memref<16x16xbf16, #tpu.memory_space<vmem>>, %arg5: memref<1x16xf32, #tpu.memory_space<vmem>>, %arg6: memref<1x16xf32, #tpu.memory_space<vmem>>, %arg7: memref<32x16xf32, #tpu.memory_space<vmem>>, %arg8: memref<32x16xf32, #tpu.memory_space<vmem>>) attributes {dimension_semantics = [#tpu.dimension_semantics<parallel>, #tpu.dimension_semantics<parallel>, #tpu.dimension_semantics<arbitrary>], iteration_bounds = array<i64: 1, 1, 1>, scalar_prefetch = 0 : i64, scratch_operands = 0 : i64, tpu.core_type = #tpu.core_type<tc>, window_params = [{transform_indices = @transform_0, window_bounds = array<i64: 32, 16>}, {transform_indices = @transform_1, window_bounds = array<i64: 16, 16>}, {transform_indices = @transform_2, window_bounds = array<i64: 1, 16>}, {transform_indices = @transform_3, window_bounds = array<i64: 1, 16>}, {transform_indices = @transform_4, window_bounds = array<i64: 32, 16>}, {transform_indices = @transform_5, window_bounds = array<i64: 32, 16>}]} {
    %c0 = arith.constant 0 : index
    %c0_0 = arith.constant 0 : index
    %0 = vector.load %arg3[%c0, %c0_0] : memref<32x16xf32, #tpu.memory_space<vmem>>, vector<32x16xf32>
    %1 = arith.truncf %0 : vector<32x16xf32> to vector<32x16xbf16>
    %c0_1 = arith.constant 0 : index
    %c0_2 = arith.constant 0 : index
    %2 = vector.load %arg4[%c0_1, %c0_2] : memref<16x16xbf16, #tpu.memory_space<vmem>>, vector<16x16xbf16>
    %cst = arith.constant dense<0.000000e+00> : vector<32x16xf32>
    %3 = tpu.matmul %1, %2, %cst {dimension_numbers = #tpu.dot_dimension_numbers<[1], [0], [0], [1], [0, 0, 1, 1], [], []>} : vector<32x16xbf16>, vector<16x16xbf16>, vector<32x16xf32> -> vector<32x16xf32>
    %c0_3 = arith.constant 0 : index
    %c0_4 = arith.constant 0 : index
    %4 = vector.load %arg5[%c0_3, %c0_4] : memref<1x16xf32, #tpu.memory_space<vmem>>, vector<1x16xf32>
    %5 = vector.broadcast %4 : vector<1x16xf32> to vector<32x16xf32>
    %6 = arith.mulf %3, %5 : vector<32x16xf32>
    %c0_5 = arith.constant 0 : index
    %c0_6 = arith.constant 0 : index
    %7 = vector.load %arg6[%c0_5, %c0_6] : memref<1x16xf32, #tpu.memory_space<vmem>>, vector<1x16xf32>
    %8 = vector.broadcast %7 : vector<1x16xf32> to vector<32x16xf32>
    %9 = arith.addf %6, %8 : vector<32x16xf32>
    %c0_7 = arith.constant 0 : index
    %c0_8 = arith.constant 0 : index
    %10 = vector.load %arg7[%c0_7, %c0_8] : memref<32x16xf32, #tpu.memory_space<vmem>>, vector<32x16xf32>
    %11 = arith.addf %9, %10 : vector<32x16xf32>
    %c0_9 = arith.constant 0 : index
    %c0_10 = arith.constant 0 : index
    %12 = vector.load %arg8[%c0_9, %c0_10] : memref<32x16xf32, #tpu.memory_space<vmem>>, vector<32x16xf32>
    tpu.vector_store %arg8[%c0_9, %c0_10], %11 {strides = array<i32>} : memref<32x16xf32, #tpu.memory_space<vmem>>, vector<32x16xf32>,
    return
  }
  func.func @transform_0(%arg0: i32, %arg1: i32, %arg2: i32) -> (i32, i32) {
    %c0_i32 = arith.constant 0 : i32
    return %arg0, %arg2 : i32, i32
  }
  func.func @transform_1(%arg0: i32, %arg1: i32, %arg2: i32) -> (i32, i32) {
    %c0_i32 = arith.constant 0 : i32
    return %arg2, %arg1 : i32, i32
  }
  func.func @transform_2(%arg0: i32, %arg1: i32, %arg2: i32) -> (i32, i32) {
    %c0_i32 = arith.constant 0 : i32
    %c0_i32_0 = arith.constant 0 : i32
    return %c0_i32, %arg1 : i32, i32
  }
  func.func @transform_3(%arg0: i32, %arg1: i32, %arg2: i32) -> (i32, i32) {
    %c0_i32 = arith.constant 0 : i32
    %c0_i32_0 = arith.constant 0 : i32
    return %c0_i32, %arg1 : i32, i32
  }
  func.func @transform_4(%arg0: i32, %arg1: i32, %arg2: i32) -> (i32, i32) {
    %c0_i32 = arith.constant 0 : i32
    return %arg0, %arg1 : i32, i32
  }
  func.func @transform_5(%arg0: i32, %arg1: i32, %arg2: i32) -> (i32, i32) {
    %c0_i32 = arith.constant 0 : i32
    return %arg0, %arg1 : i32, i32
  }
}

module attributes {stable_mosaic.version = 11 : i64} {
  func.func @_fused_linear_kernel(%arg0: i32, %arg1: i32, %arg2: i32, %arg3: memref<32x16xf32, #tpu.memory_space<vmem>>, %arg4: memref<16x64xbf16, #tpu.memory_space<vmem>>, %arg5: memref<1x16xf32, #tpu.memory_space<vmem>>, %arg6: memref<1x16xf32, #tpu.memory_space<vmem>>, %arg7: memref<32x1xf32, #tpu.memory_space<vmem>>, %arg8: memref<32x1xf32, #tpu.memory_space<vmem>>, %arg9: memref<1x64xf32, #tpu.memory_space<vmem>>, %arg10: memref<1x64xf32, #tpu.memory_space<vmem>>, %arg11: memref<32x64xf32, #tpu.memory_space<vmem>>) attributes {dimension_semantics = [#tpu.dimension_semantics<parallel>, #tpu.dimension_semantics<parallel>, #tpu.dimension_semantics<arbitrary>], iteration_bounds = array<i64: 1, 1, 1>, scalar_prefetch = 0 : i64, scratch_operands = 0 : i64, tpu.core_type = #tpu.core_type<tc>, window_params = [{transform_indices = @transform_0, window_bounds = array<i64: 32, 16>}, {transform_indices = @transform_1, window_bounds = array<i64: 16, 64>}, {transform_indices = @transform_2, window_bounds = array<i64: 1, 16>}, {transform_indices = @transform_3, window_bounds = array<i64: 1, 16>}, {transform_indices = @transform_4, window_bounds = array<i64: 32, 1>}, {transform_indices = @transform_5, window_bounds = array<i64: 32, 1>}, {transform_indices = @transform_6, window_bounds = array<i64: 1, 64>}, {transform_indices = @transform_7, window_bounds = array<i64: 1, 64>}, {transform_indices = @transform_8, window_bounds = array<i64: 32, 64>}]} {
    %c0 = arith.constant 0 : index
    %c0_0 = arith.constant 0 : index
    %0 = vector.load %arg3[%c0, %c0_0] : memref<32x16xf32, #tpu.memory_space<vmem>>, vector<32x16xf32>
    %c0_1 = arith.constant 0 : index
    %c0_2 = arith.constant 0 : index
    %1 = vector.load %arg7[%c0_1, %c0_2] : memref<32x1xf32, #tpu.memory_space<vmem>>, vector<32x1xf32>
    %2 = vector.broadcast %1 : vector<32x1xf32> to vector<32x16xf32>
    %3 = arith.subf %0, %2 : vector<32x16xf32>
    %c0_3 = arith.constant 0 : index
    %c0_4 = arith.constant 0 : index
    %4 = vector.load %arg8[%c0_3, %c0_4] : memref<32x1xf32, #tpu.memory_space<vmem>>, vector<32x1xf32>
    %5 = vector.broadcast %4 : vector<32x1xf32> to vector<32x16xf32>
    %6 = arith.mulf %3, %5 : vector<32x16xf32>
    %c0_5 = arith.constant 0 : index
    %c0_6 = arith.constant 0 : index
    %7 = vector.load %arg5[%c0_5, %c0_6] : memref<1x16xf32, #tpu.memory_space<vmem>>, vector<1x16xf32>
    %8 = vector.broadcast %7 : vector<1x16xf32> to vector<32x16xf32>
    %9 = arith.mulf %6, %8 : vector<32x16xf32>
    %c0_7 = arith.constant 0 : index
    %c0_8 = arith.constant 0 : index
    %10 = vector.load %arg6[%c0_7, %c0_8] : memref<1x16xf32, #tpu.memory_space<vmem>>, vector<1x16xf32>
    %11 = vector.broadcast %10 : vector<1x16xf32> to vector<32x16xf32>
    %12 = arith.addf %9, %11 : vector<32x16xf32>
    %13 = arith.truncf %12 : vector<32x16xf32> to vector<32x16xbf16>
    %c0_9 = arith.constant 0 : index
    %c0_10 = arith.constant 0 : index
    %14 = vector.load %arg4[%c0_9, %c0_10] : memref<16x64xbf16, #tpu.memory_space<vmem>>, vector<16x64xbf16>
    %cst = arith.constant dense<0.000000e+00> : vector<32x64xf32>
    %15 = tpu.matmul %13, %14, %cst {dimension_numbers = #tpu.dot_dimension_numbers<[1], [0], [0], [1], [0, 0, 1, 1], [], []>} : vector<32x16xbf16>, vector<16x64xbf16>, vector<32x64xf32> -> vector<32x64xf32>
    %c0_11 = arith.constant 0 : index
    %c0_12 = arith.constant 0 : index
    %16 = vector.load %arg9[%c0_11, %c0_12] : memref<1x64xf32, #tpu.memory_space<vmem>>, vector<1x64xf32>
    %17 = vector.broadcast %16 : vector<1x64xf32> to vector<32x64xf32>
    %18 = arith.mulf %15, %17 : vector<32x64xf32>
    %c0_13 = arith.constant 0 : index
    %c0_14 = arith.constant 0 : index
    %19 = vector.load %arg10[%c0_13, %c0_14] : memref<1x64xf32, #tpu.memory_space<vmem>>, vector<1x64xf32>
    %20 = vector.broadcast %19 : vector<1x64xf32> to vector<32x64xf32>
    %21 = arith.addf %18, %20 : vector<32x64xf32>
    %cst_15 = arith.constant 5.000000e-01 : f32
    %22 = vector.broadcast %cst_15 : f32 to vector<32x64xf32>
    %23 = arith.mulf %22, %21 : vector<32x64xf32>
    %cst_16 = arith.constant 0.707106769 : f32
    %24 = vector.broadcast %cst_16 : f32 to vector<32x64xf32>
    %25 = arith.mulf %21, %24 : vector<32x64xf32>
    %26 = math.erf %25 : vector<32x64xf32>
    %cst_17 = arith.constant 1.000000e+00 : f32
    %27 = vector.broadcast %cst_17 : f32 to vector<32x64xf32>
    %28 = arith.addf %27, %26 : vector<32x64xf32>
    %29 = arith.mulf %23, %28 : vector<32x64xf32>
    %c0_18 = arith.constant 0 : index
    %c0_19 = arith.constant 0 : index
    %30 = vector.load %arg11[%c0_18, %c0_19] : memref<32x64xf32, #tpu.memory_space<vmem>>, vector<32x64xf32>
    tpu.vector_store %arg11[%c0_18, %c0_19], %29 {strides = array<i32>} : memref<32x64xf32, #tpu.memory_space<vmem>>, vector<32x64xf32>,
    return
  }
  func.func @transform_0(%arg0: i32, %arg1: i32, %arg2: i32) -> (i32, i32) {
    %c0_i32 = arith.constant 0 : i32
    return %arg0, %arg2 : i32, i32
  }
  func.func @transform_1(%arg0: i32, %arg1: i32, %arg2: i32) -> (i32, i32) {
    %c0_i32 = arith.constant 0 : i32
    return %arg2, %arg1 : i32, i32
  }
  func.func @transform_2(%arg0: i32, %arg1: i32, %arg2: i32) -> (i32, i32) {
    %c0_i32 = arith.constant 0 : i32
    %c0_i32_0 = arith.constant 0 : i32
    return %c0_i32, %arg2 : i32, i32
  }
  func.func @transform_3(%arg0: i32, %arg1: i32, %arg2: i32) -> (i32, i32) {
    %c0_i32 = arith.constant 0 : i32
    %c0_i32_0 = arith.constant 0 : i32
    return %c0_i32, %arg2 : i32, i32
  }
  func.func @transform_4(%arg0: i32, %arg1: i32, %arg2: i32) -> (i32, i32) {
    %c0_i32 = arith.constant 0 : i32
    %c0_i32_0 = arith.constant 0 : i32
    return %arg0, %c0_i32 : i32, i32
  }
  func.func @transform_5(%arg0: i32, %arg1: i32, %arg2: i32) -> (i32, i32) {
    %c0_i32 = arith.constant 0 : i32
    %c0_i32_0 = arith.constant 0 : i32
    return %arg0, %c0_i32 : i32, i32
  }
  func.func @transform_6(%arg0: i32, %arg1: i32, %arg2: i32) -> (i32, i32) {
    %c0_i32 = arith.constant 0 : i32
    %c0_i32_0 = arith.constant 0 : i32
    return %c0_i32, %arg1 : i32, i32
  }
  func.func @transform_7(%arg0: i32, %arg1: i32, %arg2: i32) -> (i32, i32) {
    %c0_i32 = arith.constant 0 : i32
    %c0_i32_0 = arith.constant 0 : i32
    return %c0_i32, %arg1 : i32, i32
  }
  func.func @transform_8(%arg0: i32, %arg1: i32, %arg2: i32) -> (i32, i32) {
    %c0_i32 = arith.constant 0 : i32
    return %arg0, %arg1 : i32, i32
  }
}

module attributes {stable_mosaic.version = 11 : i64} {
  func.func @_fused_linear_kernel(%arg0: i32, %arg1: i32, %arg2: i32, %arg3: memref<32x64xf32, #tpu.memory_space<vmem>>, %arg4: memref<64x16xbf16, #tpu.memory_space<vmem>>, %arg5: memref<1x16xf32, #tpu.memory_space<vmem>>, %arg6: memref<1x16xf32, #tpu.memory_space<vmem>>, %arg7: memref<32x16xf32, #tpu.memory_space<vmem>>, %arg8: memref<32x16xf32, #tpu.memory_space<vmem>>) attributes {dimension_semantics = [#tpu.dimension_semantics<parallel>, #tpu.dimension_semantics<parallel>, #tpu.dimension_semantics<arbitrary>], iteration_bounds = array<i64: 1, 1, 1>, scalar_prefetch = 0 : i64, scratch_operands = 0 : i64, tpu.core_type = #tpu.core_type<tc>, window_params = [{transform_indices = @transform_0, window_bounds = array<i64: 32, 64>}, {transform_indices = @transform_1, window_bounds = array<i64: 64, 16>}, {transform_indices = @transform_2, window_bounds = array<i64: 1, 16>}, {transform_indices = @transform_3, window_bounds = array<i64: 1, 16>}, {transform_indices = @transform_4, window_bounds = array<i64: 32, 16>}, {transform_indices = @transform_5, window_bounds = array<i64: 32, 16>}]} {
    %c0 = arith.constant 0 : index
    %c0_0 = arith.constant 0 : index
    %0 = vector.load %arg3[%c0, %c0_0] : memref<32x64xf32, #tpu.memory_space<vmem>>, vector<32x64xf32>
    %1 = arith.truncf %0 : vector<32x64xf32> to vector<32x64xbf16>
    %c0_1 = arith.constant 0 : index
    %c0_2 = arith.constant 0 : index
    %2 = vector.load %arg4[%c0_1, %c0_2] : memref<64x16xbf16, #tpu.memory_space<vmem>>, vector<64x16xbf16>
    %cst = arith.constant dense<0.000000e+00> : vector<32x16xf32>
    %3 = tpu.matmul %1, %2, %cst {dimension_numbers = #tpu.dot_dimension_numbers<[1], [0], [0], [1], [0, 0, 1, 1], [], []>} : vector<32x64xbf16>, vector<64x16xbf16>, vector<32x16xf32> -> vector<32x16xf32>
    %c0_3 = arith.constant 0 : index
    %c0_4 = arith.constant 0 : index
    %4 = vector.load %arg5[%c0_3, %c0_4] : memref<1x16xf32, #tpu.memory_space<vmem>>, vector<1x16xf32>
    %5 = vector.broadcast %4 : vector<1x16xf32> to vector<32x16xf32>
    %6 = arith.mulf %3, %5 : vector<32x16xf32>
    %c0_5 = arith.constant 0 : index
    %c0_6 = arith.constant 0 : index
    %7 = vector.load %arg6[%c0_5, %c0_6] : memref<1x16xf32, #tpu.memory_space<vmem>>, vector<1x16xf32>
    %8 = vector.broadcast %7 : vector<1x16xf32> to vector<32x16xf32>
    %9 = arith.addf %6, %8 : vector<32x16xf32>
    %c0_7 = arith.constant 0 : index
    %c0_8 = arith.constant 0 : index
    %10 = vector.load %arg7[%c0_7, %c0_8] : memref<32x16xf32, #tpu.memory_space<vmem>>, vector<32x16xf32>
    %11 = arith.addf %9, %10 : vector<32x16xf32>
    %c0_9 = arith.constant 0 : index
    %c0_10 = arith.constant 0 : index
    %12 = vector.load %arg8[%c0_9, %c0_10] : memref<32x16xf32, #tpu.memory_space<vmem>>, vector<32x16xf32>
    tpu.vector_store %arg8[%c0_9, %c0_10], %11 {strides = array<i32>} : memref<32x16xf32, #tpu.memory_space<vmem>>, vector<32x16xf32>,
    return
  }
  func.func @transform_0(%arg0: i32, %arg1: i32, %arg2: i32) -> (i32, i32) {
    %c0_i32 = arith.constant 0 : i32
    return %arg0, %arg2 : i32, i32
  }
  func.func @transform_1(%arg0: i32, %arg1: i32, %arg2: i32) -> (i32, i32) {
    %c0_i32 = arith.constant 0 : i32
    return %arg2, %arg1 : i32, i32
  }
  func.func @transform_2(%arg0: i32, %arg1: i32, %arg2: i32) -> (i32, i32) {
    %c0_i32 = arith.constant 0 : i32
    %c0_i32_0 = arith.constant 0 : i32
    return %c0_i32, %arg1 : i32, i32
  }
  func.func @transform_3(%arg0: i32, %arg1: i32, %arg2: i32) -> (i32, i32) {
    %c0_i32 = arith.constant 0 : i32
    %c0_i32_0 = arith.constant 0 : i32
    return %c0_i32, %arg1 : i32, i32
  }
  func.func @transform_4(%arg0: i32, %arg1: i32, %arg2: i32) -> (i32, i32) {
    %c0_i32 = arith.constant 0 : i32
    return %arg0, %arg1 : i32, i32
  }
  func.func @transform_5(%arg0: i32, %arg1: i32, %arg2: i32) -> (i32, i32) {
    %c0_i32 = arith.constant 0 : i32
    return %arg0, %arg1 : i32, i32
  }
}

module attributes {stable_mosaic.version = 11 : i64} {
  func.func @_fused_linear_kernel(%arg0: i32, %arg1: i32, %arg2: i32, %arg3: memref<128x8xf32, #tpu.memory_space<vmem>>, %arg4: memref<8x16xbf16, #tpu.memory_space<vmem>>, %arg5: memref<1x16xf32, #tpu.memory_space<vmem>>, %arg6: memref<1x16xf32, #tpu.memory_space<vmem>>, %arg7: memref<128x16xf32, #tpu.memory_space<vmem>>) attributes {dimension_semantics = [#tpu.dimension_semantics<parallel>, #tpu.dimension_semantics<parallel>, #tpu.dimension_semantics<arbitrary>], iteration_bounds = array<i64: 1, 1, 1>, scalar_prefetch = 0 : i64, scratch_operands = 0 : i64, tpu.core_type = #tpu.core_type<tc>, window_params = [{transform_indices = @transform_0, window_bounds = array<i64: 128, 8>}, {transform_indices = @transform_1, window_bounds = array<i64: 8, 16>}, {transform_indices = @transform_2, window_bounds = array<i64: 1, 16>}, {transform_indices = @transform_3, window_bounds = array<i64: 1, 16>}, {transform_indices = @transform_4, window_bounds = array<i64: 128, 16>}]} {
    %c0 = arith.constant 0 : index
    %c0_0 = arith.constant 0 : index
    %0 = vector.load %arg3[%c0, %c0_0] : memref<128x8xf32, #tpu.memory_space<vmem>>, vector<128x8xf32>
    %1 = arith.truncf %0 : vector<128x8xf32> to vector<128x8xbf16>
    %c0_1 = arith.constant 0 : index
    %c0_2 = arith.constant 0 : index
    %2 = vector.load %arg4[%c0_1, %c0_2] : memref<8x16xbf16, #tpu.memory_space<vmem>>, vector<8x16xbf16>
    %cst = arith.constant dense<0.000000e+00> : vector<128x16xf32>
    %3 = tpu.matmul %1, %2, %cst {dimension_numbers = #tpu.dot_dimension_numbers<[1], [0], [0], [1], [0, 0, 1, 1], [], []>} : vector<128x8xbf16>, vector<8x16xbf16>, vector<128x16xf32> -> vector<128x16xf32>
    %c0_3 = arith.constant 0 : index
    %c0_4 = arith.constant 0 : index
    %4 = vector.load %arg5[%c0_3, %c0_4] : memref<1x16xf32, #tpu.memory_space<vmem>>, vector<1x16xf32>
    %5 = vector.broadcast %4 : vector<1x16xf32> to vector<128x16xf32>
    %6 = arith.mulf %3, %5 : vector<128x16xf32>
    %c0_5 = arith.constant 0 : index
    %c0_6 = arith.constant 0 : index
    %7 = vector.load %arg6[%c0_5, %c0_6] : memref<1x16xf32, #tpu.memory_space<vmem>>, vector<1x16xf32>
    %8 = vector.broadcast %7 : vector<1x16xf32> to vector<128x16xf32>
    %9 = arith.addf %6, %8 : vector<128x16xf32>
    %cst_7 = arith.constant 0.000000e+00 : f32
    %10 = vector.broadcast %cst_7 : f32 to vector<128x16xf32>
    %11 = arith.maximumf %9, %10 : vector<128x16xf32>
    %c0_8 = arith.constant 0 : index
    %c0_9 = arith.constant 0 : index
    %12 = vector.load %arg7[%c0_8, %c0_9] : memref<128x16xf32, #tpu.memory_space<vmem>>, vector<128x16xf32>
    tpu.vector_store %arg7[%c0_8, %c0_9], %11 {strides = array<i32>} : memref<128x16xf32, #tpu.memory_space<vmem>>, vector<128x16xf32>,
    return
  }
  func.func @transform_0(%arg0: i32, %arg1: i32, %arg2: i32) -> (i32, i32) {
    %c0_i32 = arith.constant 0 : i32
    return %arg0, %arg2 : i32, i32
  }
  func.func @transform_1(%arg0: i32, %arg1: i32, %arg2: i32) -> (i32, i32) {
    %c0_i32 = arith.constant 0 : i32
    return %arg2, %arg1 : i32, i32
  }
  func.func @transform_2(%arg0: i32, %arg1: i32, %arg2: i32) -> (i32, i32) {
    %c0_i32 = arith.constant 0 : i32
    %c0_i32_0 = arith.constant 0 : i32
    return %c0_i32, %arg1 : i32, i32
  }
  func.func @transform_3(%arg0: i32, %arg1: i32, %arg2: i32) -> (i32, i32) {
    %c0_i32 = arith.constant 0 : i32
    %c0_i32_0 = arith.constant 0 : i32
    return %c0_i32, %arg1 : i32, i32
  }
  func.func @transform_4(%arg0: i32, %arg1: i32, %arg2: i32) -> (i32, i32) {
    %c0_i32 = arith.constant 0 : i32
    return %arg0, %arg1 : i32, i32
  }
}

module attributes {stable_mosaic.version = 11 : i64} {
  func.func @_fused_linear_kernel(%arg0: i32, %arg1: i32, %arg2: i32, %arg3: memref<128x16xf32, #tpu.memory_space<vmem>>, %arg4: memref<16x8xbf16, #tpu.memory_space<vmem>>, %arg5: memref<1x8xf32, #tpu.memory_space<vmem>>, %arg6: memref<1x8xf32, #tpu.memory_space<vmem>>, %arg7: memref<128x8xf32, #tpu.memory_space<vmem>>) attributes {dimension_semantics = [#tpu.dimension_semantics<parallel>, #tpu.dimension_semantics<parallel>, #tpu.dimension_semantics<arbitrary>], iteration_bounds = array<i64: 1, 1, 1>, scalar_prefetch = 0 : i64, scratch_operands = 0 : i64, tpu.core_type = #tpu.core_type<tc>, window_params = [{transform_indices = @transform_0, window_bounds = array<i64: 128, 16>}, {transform_indices = @transform_1, window_bounds = array<i64: 16, 8>}, {transform_indices = @transform_2, window_bounds = array<i64: 1, 8>}, {transform_indices = @transform_3, window_bounds = array<i64: 1, 8>}, {transform_indices = @transform_4, window_bounds = array<i64: 128, 8>}]} {
    %c0 = arith.constant 0 : index
    %c0_0 = arith.constant 0 : index
    %0 = vector.load %arg3[%c0, %c0_0] : memref<128x16xf32, #tpu.memory_space<vmem>>, vector<128x16xf32>
    %1 = arith.truncf %0 : vector<128x16xf32> to vector<128x16xbf16>
    %c0_1 = arith.constant 0 : index
    %c0_2 = arith.constant 0 : index
    %2 = vector.load %arg4[%c0_1, %c0_2] : memref<16x8xbf16, #tpu.memory_space<vmem>>, vector<16x8xbf16>
    %cst = arith.constant dense<0.000000e+00> : vector<128x8xf32>
    %3 = tpu.matmul %1, %2, %cst {dimension_numbers = #tpu.dot_dimension_numbers<[1], [0], [0], [1], [0, 0, 1, 1], [], []>} : vector<128x16xbf16>, vector<16x8xbf16>, vector<128x8xf32> -> vector<128x8xf32>
    %c0_3 = arith.constant 0 : index
    %c0_4 = arith.constant 0 : index
    %4 = vector.load %arg5[%c0_3, %c0_4] : memref<1x8xf32, #tpu.memory_space<vmem>>, vector<1x8xf32>
    %5 = vector.broadcast %4 : vector<1x8xf32> to vector<128x8xf32>
    %6 = arith.mulf %3, %5 : vector<128x8xf32>
    %c0_5 = arith.constant 0 : index
    %c0_6 = arith.constant 0 : index
    %7 = vector.load %arg6[%c0_5, %c0_6] : memref<1x8xf32, #tpu.memory_space<vmem>>, vector<1x8xf32>
    %8 = vector.broadcast %7 : vector<1x8xf32> to vector<128x8xf32>
    %9 = arith.addf %6, %8 : vector<128x8xf32>
    %cst_7 = arith.constant 0.000000e+00 : f32
    %10 = vector.broadcast %cst_7 : f32 to vector<128x8xf32>
    %11 = arith.maximumf %9, %10 : vector<128x8xf32>
    %c0_8 = arith.constant 0 : index
    %c0_9 = arith.constant 0 : index
    %12 = vector.load %arg7[%c0_8, %c0_9] : memref<128x8xf32, #tpu.memory_space<vmem>>, vector<128x8xf32>
    tpu.vector_store %arg7[%c0_8, %c0_9], %11 {strides = array<i32>} : memref<128x8xf32, #tpu.memory_space<vmem>>, vector<128x8xf32>,
    return
  }
  func.func @transform_0(%arg0: i32, %arg1: i32, %arg2: i32) -> (i32, i32) {
    %c0_i32 = arith.constant 0 : i32
    return %arg0, %arg2 : i32, i32
  }
  func.func @transform_1(%arg0: i32, %arg1: i32, %arg2: i32) -> (i32, i32) {
    %c0_i32 = arith.constant 0 : i32
    return %arg2, %arg1 : i32, i32
  }
  func.func @transform_2(%arg0: i32, %arg1: i32, %arg2: i32) -> (i32, i32) {
    %c0_i32 = arith.constant 0 : i32
    %c0_i32_0 = arith.constant 0 : i32
    return %c0_i32, %arg1 : i32, i32
  }
  func.func @transform_3(%arg0: i32, %arg1: i32, %arg2: i32) -> (i32, i32) {
    %c0_i32 = arith.constant 0 : i32
    %c0_i32_0 = arith.constant 0 : i32
    return %c0_i32, %arg1 : i32, i32
  }
  func.func @transform_4(%arg0: i32, %arg1: i32, %arg2: i32) -> (i32, i32) {
    %c0_i32 = arith.constant 0 : i32
    return %arg0, %arg1 : i32, i32
  }
}

module attributes {stable_mosaic.version = 11 : i64} {
  func.func @_conv3x3_kernel(%arg0: i32, %arg1: memref<1x10x10x16xf32, #tpu.memory_space<vmem>>, %arg2: memref<3x3x16x16xbf16, #tpu.memory_space<vmem>>, %arg3: memref<1x16xf32, #tpu.memory_space<vmem>>, %arg4: memref<1x16xf32, #tpu.memory_space<vmem>>, %arg5: memref<1x64x16xf32, #tpu.memory_space<vmem>>) attributes {dimension_semantics = [#tpu.dimension_semantics<parallel>], iteration_bounds = array<i64: 2>, scalar_prefetch = 0 : i64, scratch_operands = 0 : i64, tpu.core_type = #tpu.core_type<tc>, window_params = [{transform_indices = @transform_0, window_bounds = array<i64: 1, 10, 10, 16>}, {pipeline_mode = #tpu.pipeline_mode<synchronous>, transform_indices = @transform_1, window_bounds = array<i64: 3, 3, 16, 16>}, {pipeline_mode = #tpu.pipeline_mode<synchronous>, transform_indices = @transform_2, window_bounds = array<i64: 1, 16>}, {pipeline_mode = #tpu.pipeline_mode<synchronous>, transform_indices = @transform_3, window_bounds = array<i64: 1, 16>}, {transform_indices = @transform_4, window_bounds = array<i64: 1, 64, 16>}]} {
    %c0 = arith.constant 0 : index
    %c0_0 = arith.constant 0 : index
    %c0_1 = arith.constant 0 : index
    %c0_2 = arith.constant 0 : index
    %0 = vector.load %arg1[%c0, %c0_0, %c0_1, %c0_2] : memref<1x10x10x16xf32, #tpu.memory_space<vmem>>, vector<1x10x10x16xf32>
    %1 = vector.shape_cast %0 : vector<1x10x10x16xf32> to vector<10x10x16xf32>
    %cst = arith.constant 0.000000e+00 : f32
    %2 = vector.broadcast %cst : f32 to vector<64x16xf32>
    %3 = vector.extract_strided_slice %1 {offsets = [0, 0, 0], sizes = [8, 8, 16], strides = [1, 1, 1]} : vector<10x10x16xf32> to vector<8x8x16xf32>
    %4 = vector.shape_cast %3 : vector<8x8x16xf32> to vector<64x16xf32>
    %5 = arith.truncf %4 : vector<64x16xf32> to vector<64x16xbf16>
    %c0_3 = arith.constant 0 : index
    %c0_4 = arith.constant 0 : index
    %c0_5 = arith.constant 0 : index
    %c0_6 = arith.constant 0 : index
    %6 = vector.load %arg2[%c0_3, %c0_4, %c0_5, %c0_6] : memref<3x3x16x16xbf16, #tpu.memory_space<vmem>>, vector<1x1x16x16xbf16>
    %7 = vector.shape_cast %6 : vector<1x1x16x16xbf16> to vector<16x16xbf16>
    %cst_7 = arith.constant dense<0.000000e+00> : vector<64x16xf32>
    %8 = tpu.matmul %5, %7, %cst_7 {dimension_numbers = #tpu.dot_dimension_numbers<[1], [0], [0], [1], [0, 0, 1, 1], [], []>} : vector<64x16xbf16>, vector<16x16xbf16>, vector<64x16xf32> -> vector<64x16xf32>
    %9 = arith.addf %2, %8 : vector<64x16xf32>
    %10 = vector.extract_strided_slice %1 {offsets = [0, 1, 0], sizes = [8, 8, 16], strides = [1, 1, 1]} : vector<10x10x16xf32> to vector<8x8x16xf32>
    %11 = vector.shape_cast %10 : vector<8x8x16xf32> to vector<64x16xf32>
    %12 = arith.truncf %11 : vector<64x16xf32> to vector<64x16xbf16>
    %c0_8 = arith.constant 0 : index
    %c1 = arith.constant 1 : index
    %c0_9 = arith.constant 0 : index
    %c0_10 = arith.constant 0 : index
    %13 = vector.load %arg2[%c0_8, %c1, %c0_9, %c0_10] : memref<3x3x16x16xbf16, #tpu.memory_space<vmem>>, vector<1x1x16x16xbf16>
    %14 = vector.shape_cast %13 : vector<1x1x16x16xbf16> to vector<16x16xbf16>
    %cst_11 = arith.constant dense<0.000000e+00> : vector<64x16xf32>
    %15 = tpu.matmul %12, %14, %cst_11 {dimension_numbers = #tpu.dot_dimension_numbers<[1], [0], [0], [1], [0, 0, 1, 1], [], []>} : vector<64x16xbf16>, vector<16x16xbf16>, vector<64x16xf32> -> vector<64x16xf32>
    %16 = arith.addf %9, %15 : vector<64x16xf32>
    %17 = vector.extract_strided_slice %1 {offsets = [0, 2, 0], sizes = [8, 8, 16], strides = [1, 1, 1]} : vector<10x10x16xf32> to vector<8x8x16xf32>
    %18 = vector.shape_cast %17 : vector<8x8x16xf32> to vector<64x16xf32>
    %19 = arith.truncf %18 : vector<64x16xf32> to vector<64x16xbf16>
    %c0_12 = arith.constant 0 : index
    %c2 = arith.constant 2 : index
    %c0_13 = arith.constant 0 : index
    %c0_14 = arith.constant 0 : index
    %20 = vector.load %arg2[%c0_12, %c2, %c0_13, %c0_14] : memref<3x3x16x16xbf16, #tpu.memory_space<vmem>>, vector<1x1x16x16xbf16>
    %21 = vector.shape_cast %20 : vector<1x1x16x16xbf16> to vector<16x16xbf16>
    %cst_15 = arith.constant dense<0.000000e+00> : vector<64x16xf32>
    %22 = tpu.matmul %19, %21, %cst_15 {dimension_numbers = #tpu.dot_dimension_numbers<[1], [0], [0], [1], [0, 0, 1, 1], [], []>} : vector<64x16xbf16>, vector<16x16xbf16>, vector<64x16xf32> -> vector<64x16xf32>
    %23 = arith.addf %16, %22 : vector<64x16xf32>
    %24 = vector.extract_strided_slice %1 {offsets = [1, 0, 0], sizes = [8, 8, 16], strides = [1, 1, 1]} : vector<10x10x16xf32> to vector<8x8x16xf32>
    %25 = vector.shape_cast %24 : vector<8x8x16xf32> to vector<64x16xf32>
    %26 = arith.truncf %25 : vector<64x16xf32> to vector<64x16xbf16>
    %c1_16 = arith.constant 1 : index
    %c0_17 = arith.constant 0 : index
    %c0_18 = arith.constant 0 : index
    %c0_19 = arith.constant 0 : index
    %27 = vector.load %arg2[%c1_16, %c0_17, %c0_18, %c0_19] : memref<3x3x16x16xbf16, #tpu.memory_space<vmem>>, vector<1x1x16x16xbf16>
    %28 = vector.shape_cast %27 : vector<1x1x16x16xbf16> to vector<16x16xbf16>
    %cst_20 = arith.constant dense<0.000000e+00> : vector<64x16xf32>
    %29 = tpu.matmul %26, %28, %cst_20 {dimension_numbers = #tpu.dot_dimension_numbers<[1], [0], [0], [1], [0, 0, 1, 1], [], []>} : vector<64x16xbf16>, vector<16x16xbf16>, vector<64x16xf32> -> vector<64x16xf32>
    %30 = arith.addf %23, %29 : vector<64x16xf32>
    %31 = vector.extract_strided_slice %1 {offsets = [1, 1, 0], sizes = [8, 8, 16], strides = [1, 1, 1]} : vector<10x10x16xf32> to vector<8x8x16xf32>
    %32 = vector.shape_cast %31 : vector<8x8x16xf32> to vector<64x16xf32>
    %33 = arith.truncf %32 : vector<64x16xf32> to vector<64x16xbf16>
    %c1_21 = arith.constant 1 : index
    %c1_22 = arith.constant 1 : index
    %c0_23 = arith.constant 0 : index
    %c0_24 = arith.constant 0 : index
    %34 = vector.load %arg2[%c1_21, %c1_22, %c0_23, %c0_24] : memref<3x3x16x16xbf16, #tpu.memory_space<vmem>>, vector<1x1x16x16xbf16>
    %35 = vector.shape_cast %34 : vector<1x1x16x16xbf16> to vector<16x16xbf16>
    %cst_25 = arith.constant dense<0.000000e+00> : vector<64x16xf32>
    %36 = tpu.matmul %33, %35, %cst_25 {dimension_numbers = #tpu.dot_dimension_numbers<[1], [0], [0], [1], [0, 0, 1, 1], [], []>} : vector<64x16xbf16>, vector<16x16xbf16>, vector<64x16xf32> -> vector<64x16xf32>
    %37 = arith.addf %30, %36 : vector<64x16xf32>
    %38 = vector.extract_strided_slice %1 {offsets = [1, 2, 0], sizes = [8, 8, 16], strides = [1, 1, 1]} : vector<10x10x16xf32> to vector<8x8x16xf32>
    %39 = vector.shape_cast %38 : vector<8x8x16xf32> to vector<64x16xf32>
    %40 = arith.truncf %39 : vector<64x16xf32> to vector<64x16xbf16>
    %c1_26 = arith.constant 1 : index
    %c2_27 = arith.constant 2 : index
    %c0_28 = arith.constant 0 : index
    %c0_29 = arith.constant 0 : index
    %41 = vector.load %arg2[%c1_26, %c2_27, %c0_28, %c0_29] : memref<3x3x16x16xbf16, #tpu.memory_space<vmem>>, vector<1x1x16x16xbf16>
    %42 = vector.shape_cast %41 : vector<1x1x16x16xbf16> to vector<16x16xbf16>
    %cst_30 = arith.constant dense<0.000000e+00> : vector<64x16xf32>
    %43 = tpu.matmul %40, %42, %cst_30 {dimension_numbers = #tpu.dot_dimension_numbers<[1], [0], [0], [1], [0, 0, 1, 1], [], []>} : vector<64x16xbf16>, vector<16x16xbf16>, vector<64x16xf32> -> vector<64x16xf32>
    %44 = arith.addf %37, %43 : vector<64x16xf32>
    %45 = vector.extract_strided_slice %1 {offsets = [2, 0, 0], sizes = [8, 8, 16], strides = [1, 1, 1]} : vector<10x10x16xf32> to vector<8x8x16xf32>
    %46 = vector.shape_cast %45 : vector<8x8x16xf32> to vector<64x16xf32>
    %47 = arith.truncf %46 : vector<64x16xf32> to vector<64x16xbf16>
    %c2_31 = arith.constant 2 : index
    %c0_32 = arith.constant 0 : index
    %c0_33 = arith.constant 0 : index
    %c0_34 = arith.constant 0 : index
    %48 = vector.load %arg2[%c2_31, %c0_32, %c0_33, %c0_34] : memref<3x3x16x16xbf16, #tpu.memory_space<vmem>>, vector<1x1x16x16xbf16>
    %49 = vector.shape_cast %48 : vector<1x1x16x16xbf16> to vector<16x16xbf16>
    %cst_35 = arith.constant dense<0.000000e+00> : vector<64x16xf32>
    %50 = tpu.matmul %47, %49, %cst_35 {dimension_numbers = #tpu.dot_dimension_numbers<[1], [0], [0], [1], [0, 0, 1, 1], [], []>} : vector<64x16xbf16>, vector<16x16xbf16>, vector<64x16xf32> -> vector<64x16xf32>
    %51 = arith.addf %44, %50 : vector<64x16xf32>
    %52 = vector.extract_strided_slice %1 {offsets = [2, 1, 0], sizes = [8, 8, 16], strides = [1, 1, 1]} : vector<10x10x16xf32> to vector<8x8x16xf32>
    %53 = vector.shape_cast %52 : vector<8x8x16xf32> to vector<64x16xf32>
    %54 = arith.truncf %53 : vector<64x16xf32> to vector<64x16xbf16>
    %c2_36 = arith.constant 2 : index
    %c1_37 = arith.constant 1 : index
    %c0_38 = arith.constant 0 : index
    %c0_39 = arith.constant 0 : index
    %55 = vector.load %arg2[%c2_36, %c1_37, %c0_38, %c0_39] : memref<3x3x16x16xbf16, #tpu.memory_space<vmem>>, vector<1x1x16x16xbf16>
    %56 = vector.shape_cast %55 : vector<1x1x16x16xbf16> to vector<16x16xbf16>
    %cst_40 = arith.constant dense<0.000000e+00> : vector<64x16xf32>
    %57 = tpu.matmul %54, %56, %cst_40 {dimension_numbers = #tpu.dot_dimension_numbers<[1], [0], [0], [1], [0, 0, 1, 1], [], []>} : vector<64x16xbf16>, vector<16x16xbf16>, vector<64x16xf32> -> vector<64x16xf32>
    %58 = arith.addf %51, %57 : vector<64x16xf32>
    %59 = vector.extract_strided_slice %1 {offsets = [2, 2, 0], sizes = [8, 8, 16], strides = [1, 1, 1]} : vector<10x10x16xf32> to vector<8x8x16xf32>
    %60 = vector.shape_cast %59 : vector<8x8x16xf32> to vector<64x16xf32>
    %61 = arith.truncf %60 : vector<64x16xf32> to vector<64x16xbf16>
    %c2_41 = arith.constant 2 : index
    %c2_42 = arith.constant 2 : index
    %c0_43 = arith.constant 0 : index
    %c0_44 = arith.constant 0 : index
    %62 = vector.load %arg2[%c2_41, %c2_42, %c0_43, %c0_44] : memref<3x3x16x16xbf16, #tpu.memory_space<vmem>>, vector<1x1x16x16xbf16>
    %63 = vector.shape_cast %62 : vector<1x1x16x16xbf16> to vector<16x16xbf16>
    %cst_45 = arith.constant dense<0.000000e+00> : vector<64x16xf32>
    %64 = tpu.matmul %61, %63, %cst_45 {dimension_numbers = #tpu.dot_dimension_numbers<[1], [0], [0], [1], [0, 0, 1, 1], [], []>} : vector<64x16xbf16>, vector<16x16xbf16>, vector<64x16xf32> -> vector<64x16xf32>
    %65 = arith.addf %58, %64 : vector<64x16xf32>
    %c0_46 = arith.constant 0 : index
    %c0_47 = arith.constant 0 : index
    %66 = vector.load %arg3[%c0_46, %c0_47] : memref<1x16xf32, #tpu.memory_space<vmem>>, vector<1x16xf32>
    %67 = vector.broadcast %66 : vector<1x16xf32> to vector<64x16xf32>
    %68 = arith.mulf %65, %67 : vector<64x16xf32>
    %c0_48 = arith.constant 0 : index
    %c0_49 = arith.constant 0 : index
    %69 = vector.load %arg4[%c0_48, %c0_49] : memref<1x16xf32, #tpu.memory_space<vmem>>, vector<1x16xf32>
    %70 = vector.broadcast %69 : vector<1x16xf32> to vector<64x16xf32>
    %71 = arith.addf %68, %70 : vector<64x16xf32>
    %cst_50 = arith.constant 0.000000e+00 : f32
    %72 = vector.broadcast %cst_50 : f32 to vector<64x16xf32>
    %73 = arith.maximumf %71, %72 : vector<64x16xf32>
    %c0_51 = arith.constant 0 : index
    %c0_52 = arith.constant 0 : index
    %c0_53 = arith.constant 0 : index
    %74 = vector.load %arg5[%c0_51, %c0_52, %c0_53] : memref<1x64x16xf32, #tpu.memory_space<vmem>>, vector<1x64x16xf32>
    %75 = vector.shape_cast %74 : vector<1x64x16xf32> to vector<64x16xf32>
    %76 = vector.shape_cast %73 : vector<64x16xf32> to vector<1x64x16xf32>
    tpu.vector_store %arg5[%c0_51, %c0_52, %c0_53], %76 {strides = array<i32>} : memref<1x64x16xf32, #tpu.memory_space<vmem>>, vector<1x64x16xf32>,
    return
  }
  func.func @transform_0(%arg0: i32) -> (i32, i32, i32, i32) {
    %c0_i32 = arith.constant 0 : i32
    %c0_i32_0 = arith.constant 0 : i32
    %c0_i32_1 = arith.constant 0 : i32
    %c0_i32_2 = arith.constant 0 : i32
    return %arg0, %c0_i32, %c0_i32_0, %c0_i32_1 : i32, i32, i32, i32
  }
  func.func @transform_1(%arg0: i32) -> (i32, i32, i32, i32) {
    %c0_i32 = arith.constant 0 : i32
    %c0_i32_0 = arith.constant 0 : i32
    %c0_i32_1 = arith.constant 0 : i32
    %c0_i32_2 = arith.constant 0 : i32
    %c0_i32_3 = arith.constant 0 : i32
    return %c0_i32, %c0_i32_0, %c0_i32_1, %c0_i32_2 : i32, i32, i32, i32
  }
  func.func @transform_2(%arg0: i32) -> (i32, i32) {
    %c0_i32 = arith.constant 0 : i32
    %c0_i32_0 = arith.constant 0 : i32
    %c0_i32_1 = arith.constant 0 : i32
    return %c0_i32, %c0_i32_0 : i32, i32
  }
  func.func @transform_3(%arg0: i32) -> (i32, i32) {
    %c0_i32 = arith.constant 0 : i32
    %c0_i32_0 = arith.constant 0 : i32
    %c0_i32_1 = arith.constant 0 : i32
    return %c0_i32, %c0_i32_0 : i32, i32
  }
  func.func @transform_4(%arg0: i32) -> (i32, i32, i32) {
    %c0_i32 = arith.constant 0 : i32
    %c0_i32_0 = arith.constant 0 : i32
    %c0_i32_1 = arith.constant 0 : i32
    return %arg0, %c0_i32, %c0_i32_0 : i32, i32, i32
  }
}

</mosaic_0001>

<bundles_post_ra>
// kernel: _lambda_.54
= control target key start
LH: loop header
LB: loop body
LE: loop exit
PB: predicated region body
PF: predicated region fallthrough
CT: control target
= control target key end

     0   :  { %vm11_vm0 = vcmask 523264   ;;  %v56_v2 = vmov 64.0   ;;  %vm29_vm2 = vcmask 7168   ;;  %s85_s0 = inlined_call_operand.vmem [shape: f32[8,64], index: 0, kind: input, shape index: {}]   ;;  %s86_s1 = inlined_call_operand.vmem [shape: f32[8,1], index: 1, kind: output, shape index: {0}]   ;;  %s87_s2 = inlined_call_operand.vmem [shape: f32[8,1], index: 2, kind: output, shape index: {1}]  }
   0x1   :  { %v10_v0 = vld [vmem:[%s85_s0] sm:$0xff]  ;;  %52 = vrcp.f32 %v56_v2 }
   0x2   :  { %v12_v1 = vsel %vm11_vm0, %v10_v0, 0.0 }
   0x3   :  { %13 = vadd.xlane.f32.xlu0 %v12_v1 }
   0x7   :  { %v53_v3 = vpop.eup %52 }
   0x8   :  { %v16_v4 = vmul.f32 64.0, %v53_v3  ;;  %vm20_vm1 = vweird.f32 %v53_v3 }
   0xa   :  { %v17_v5 = vsub.f32 1.0, %v16_v4 }
   0xc   :  { %v18_v6 = vmul.f32 %v53_v3, %v17_v5 }
   0xe   :  { %v19_v7 = vadd.f32 %v53_v3, %v18_v6 }
  0x10   :  { %v21_v8 = vsel %vm20_vm1, %v53_v3, %v19_v7 }
  0x76   :  { %v14_v9 = vpop.xlane.xlu0 %13 }
  0x77   :  { %v22_v10 = vmul.f32 %v21_v8, %v14_v9 }
  0x79   :  { %v23_v11 = vsub.f32 %v10_v0, %v22_v10  ;;  %30 = vst.msk [vmem:[%s86_s1] sm:$0xff] %vm29_vm2, %v22_v10 }
  0x7b   :  { %v24_v12 = vmul.f32 %v23_v11, %v23_v11 }
  0x7d   :  { %v25_v13 = vsel %vm11_vm0, %v24_v12, 0.0 }
  0x7e   :  { %26 = vadd.xlane.f32.xlu0 %v25_v13 }
  0xf1   :  { %v27_v14 = vpop.xlane.xlu0 %26 }
  0xf2   :  { %v28_v15 = vmul.f32 %v27_v14, %v21_v8 }
  0xf4   :  { %v31_v16 = vadd.f32 1e-05, %v28_v15 }
  0xf6   :  { %54 = vrsqrt.f32 %v31_v16  ;;  %vm38_vm4 = vweird.f32 %v31_v16 }
  0xfc   :  { %v55_v17 = vpop.eup %54 }
  0xfd   :  { %v33_v18 = vmul.f32 %v55_v17, %v31_v16  ;;  %vm39_vm3 = vweird.f32 %v55_v17 }
  0xfe   :  { %vm40_vm5 = vmor %vm38_vm4, %vm39_vm3 }
  0xff   :  { %v34_v19 = vmul.f32 %v55_v17, %v33_v18 }
 0x101   :  { %v35_v20 = vmul.f32 0.5, %v34_v19 }
 0x103   :  { %v36_v21 = vsub.f32 1.5, %v35_v20 }
 0x105   :  { %v37_v22 = vmul.f32 %v55_v17, %v36_v21 }
 0x107   :  { %v41_v23 = vsel %vm40_vm5, %v55_v17, %v37_v22 }
 0x108   :  { %42 = vst.msk [vmem:[%s87_s2] sm:$0xff] %vm29_vm2, %v41_v23 }

// kernel: _lambda_.46
= control target key start
LH: loop header
LB: loop body
LE: loop exit
PB: predicated region body
PF: predicated region fallthrough
CT: control target
= control target key end

     0   :  { %vm15_vm0 = vcmask 523264   ;;  %v67_v2 = vmov 64.0   ;;  %s103_s0 = inlined_call_operand.vmem [shape: f32[8,64], index: 0, kind: input, shape index: {}]   ;;  %s104_s1 = inlined_call_operand.vmem [shape: f32[1,64], index: 1, kind: input, shape index: {}]   ;;  %s105_s2 = inlined_call_operand.vmem [shape: f32[1,64], index: 2, kind: input, shape index: {}]   ;;  %s106_s3 = inlined_call_operand.vmem [shape: f32[8,64], index: 3, kind: output, shape index: {}]  }
   0x1   :  { %v14_v0 = vld [vmem:[%s103_s0] sm:$0xff]  ;;  %63 = vrcp.f32 %v67_v2 }
   0x2   :  { %v16_v1 = vsel %vm15_vm0, %v14_v0, 0.0  ;;  %v61_v23 = vld [vmem:[%s104_s1] ss:$0 sm:$0xff] }
   0x3   :  { %17 = vadd.xlane.f32.xlu0 %v16_v1  ;;  %v62_v25 = vld [vmem:[%s105_s2] ss:$0 sm:$0xff] }
   0x7   :  { %v64_v3 = vpop.eup %63 }
   0x8   :  { %v20_v4 = vmul.f32 64.0, %v64_v3  ;;  %vm24_vm1 = vweird.f32 %v64_v3 }
   0xa   :  { %v21_v5 = vsub.f32 1.0, %v20_v4 }
   0xc   :  { %v22_v6 = vmul.f32 %v64_v3, %v21_v5 }
   0xe   :  { %v23_v7 = vadd.f32 %v64_v3, %v22_v6 }
  0x10   :  { %v25_v8 = vsel %vm24_vm1, %v64_v3, %v23_v7 }
  0x76   :  { %v18_v9 = vpop.xlane.xlu0 %17 }
  0x77   :  { %v26_v10 = vmul.f32 %v25_v8, %v18_v9 }
  0x79   :  { %v27_v11 = vsub.f32 %v14_v0, %v26_v10 }
  0x7b   :  { %v28_v12 = vmul.f32 %v27_v11, %v27_v11 }
  0x7d   :  { %v29_v13 = vsel %vm15_vm0, %v28_v12, 0.0 }
  0x7e   :  { %30 = vadd.xlane.f32.xlu0 %v29_v13 }
  0xf1   :  { %v31_v14 = vpop.xlane.xlu0 %30 }
  0xf2   :  { %v32_v15 = vmul.f32 %v31_v14, %v25_v8 }
  0xf4   :  { %v33_v16 = vadd.f32 1e-05, %v32_v15 }
  0xf6   :  { %65 = vrsqrt.f32 %v33_v16  ;;  %vm40_vm3 = vweird.f32 %v33_v16 }
  0xfc   :  { %v66_v17 = vpop.eup %65 }
  0xfd   :  { %v35_v18 = vmul.f32 %v66_v17, %v33_v16  ;;  %vm41_vm2 = vweird.f32 %v66_v17 }
  0xfe   :  { %vm42_vm4 = vmor %vm40_vm3, %vm41_vm2 }
  0xff   :  { %v36_v19 = vmul.f32 %v66_v17, %v35_v18 }
 0x101   :  { %v37_v20 = vmul.f32 0.5, %v36_v19 }
 0x103   :  { %v38_v21 = vsub.f32 1.5, %v37_v20 }
 0x105   :  { %v39_v22 = vmul.f32 %v66_v17, %v38_v21 }
 0x107   :  { %v43_v24 = vsel %vm42_vm4, %v66_v17, %v39_v22 }
 0x108   :  { %v44_v26 = vmul.f32 %v43_v24, %v27_v11 }
 0x10a   :  { %v49_v27 = vmul.f32 %v61_v23, %v44_v26 }
 0x10c   :  { %v54_v28 = vadd.f32 %v62_v25, %v49_v27 }
 0x10e   :  { %55 = vst.msk [vmem:[%s106_s3] sm:$0xff] %vm15_vm0, %v54_v28 }

// kernel: _lambda_.55
= control target key start
LH: loop header
LB: loop body
LE: loop exit
PB: predicated region body
PF: predicated region fallthrough
CT: control target
= control target key end

     0   :  { %v180_v0 = vmov 0   ;;  %vm98_vm0 = vcmask 523264   ;;  %s285_s4 = inlined_call_operand.vmem [shape: f32[8,1], index: 4, kind: input, shape index: {}]   ;;  %s286_s2 = inlined_call_operand.vmem [shape: f32[1,64], index: 2, kind: input, shape index: {}]   ;;  %s287_s3 = inlined_call_operand.vmem [shape: f32[1,64], index: 3, kind: input, shape index: {}]   ;;  %s288_s5 = inlined_call_operand.vmem [shape: f32[8,1], index: 5, kind: input, shape index: {}]   ;;  %s289_s1 = inlined_call_operand.vmem [shape: bf16[64,192], index: 1, kind: input, shape index: {}]   ;;  %s290_s0 = inlined_call_operand.vmem [shape: f32[8,64], index: 0, kind: input, shape index: {}]   ;;  %s291_s6 = inlined_call_operand.vmem [shape: f32[8,192], index: 6, kind: output, shape index: {}]  }
   0x1   :  { %177 = vset.pattern.permute.xlu0 %v180_v0  ;;  %v25_v1 = vld [vmem:[%s285_s4] sm:$0xff]  ;;  %v160_v3 = vld [vmem:[%s289_s1 + $0x30] sm:$0xf]  ;;  %v175_v4 = vld [vmem:[%s289_s1 + $0x34] sm:$0xf0] }
   0x2   :  { %28 = vperm.xlu0 %177, %v25_v1   ;;  %v32_v2 = vld [vmem:[%s288_s5] sm:$0xff]  ;;  %v174_v5 = vld [vmem:[%s289_s1 + $0x34] sm:$0xf]  ;;  %v161_v6 = vor.u32 %v175_v4, %v160_v3  ;;  %v162_v7 = vld [vmem:[%s289_s1 + $0x38] sm:$0xf0] }
   0x3   :  { %v165_v8 = vor.u32 %v174_v5, %v162_v7  ;;  %v152_v9 = vld [vmem:[%s289_s1 + $0x20] sm:$0xf]  ;;  %v173_v10 = vld [vmem:[%s289_s1 + $0x24] sm:$0xf0]  ;;  %v172_v11 = vld [vmem:[%s289_s1 + $0x24] sm:$0xf] }
   0x4   :  { %106 = vmatpush.bf16.msra.mxu0 %v161_v6  ;;  %v153_v12 = vor.u32 %v173_v10, %v152_v9  ;;  %v154_v13 = vld [vmem:[%s289_s1 + $0x28] sm:$0xf0]  ;;  %v144_v15 = vld [vmem:[%s289_s1 + $0x10] sm:$0xf]  ;;  %v171_v16 = vld [vmem:[%s289_s1 + $0x14] sm:$0xf0] }
   0x5   :  { %119 = vmatpush.bf16.msra.mxu1 %v165_v8  ;;  %v157_v14 = vor.u32 %v172_v11, %v154_v13  ;;  %v170_v17 = vld [vmem:[%s289_s1 + $0x14] sm:$0xf]  ;;  %v145_v18 = vor.u32 %v171_v16, %v144_v15  ;;  %v146_v19 = vld [vmem:[%s289_s1 + $0x18] sm:$0xf0]  ;;  %v136_v21 = vld [vmem:[%s289_s1] sm:$0xf] }
   0x6   :  { %v149_v20 = vor.u32 %v170_v17, %v146_v19  ;;  %v169_v22 = vld [vmem:[%s289_s1 + $0x4] sm:$0xf0]  ;;  %v168_v23 = vld [vmem:[%s289_s1 + $0x4] sm:$0xf]  ;;  %v138_v25 = vld [vmem:[%s289_s1 + $0x8] sm:$0xf0] }
   0x7   :  { %v137_v24 = vor.u32 %v169_v22, %v136_v21  ;;  %v141_v26 = vor.u32 %v168_v23, %v138_v25  ;;  %v24_v28 = vld [vmem:[%s290_s0] sm:$0xff] }
   0x8   :  { %107 = vmatpush.bf16.msra.mxu0 %v153_v12  ;;  %v178_v30 = vld [vmem:[%s286_s2] ss:$0 sm:$0xff] }
   0x9   :  { %120 = vmatpush.bf16.msra.mxu1 %v157_v14  ;;  %v179_v33 = vld [vmem:[%s287_s3] ss:$0 sm:$0xff] }
   0xa   :  { %35 = vperm.xlu0 %177, %v32_v2  }
   0xc   :  { %108 = vmatpush.bf16.msra.mxu0 %v145_v18 }
   0xd   :  { %121 = vmatpush.bf16.msra.mxu1 %v149_v20 }
  0x10   :  { %109 = vmatpush.bf16.msra.mxu0 %v137_v24 }
  0x11   :  { %122 = vmatpush.bf16.msra.mxu1 %v141_v26 }
  0x74   :  { %v29_v27 = vpop.permute.xlu0 %28 }
  0x75   :  { %v31_v29 = vsub.f32 %v24_v28, %v29_v27 }
  0x7c   :  { %v36_v31 = vpop.permute.xlu0 %35 }
  0x7d   :  { %v38_v32 = vmul.f32 %v36_v31, %v31_v29 }
  0x7f   :  { %v43_v34 = vmul.f32 %v178_v30, %v38_v32 }
  0x81   :  { %v48_v35 = vadd.f32 %v179_v33, %v43_v34 }
  0x83   :  { %v49_v36 = vpack.c.bf16 %v48_v35, %v48_v35 }
  0x85   :  { %166 = vmatmul.msk.bf16.vlgmr.msra.gmra.mxu0 %vm98_vm0, %v49_v36  ;;  %167 = vmatmul.msk.bf16.vlgmr.msra.gmra.mxu1 %vm98_vm0, %v49_v36 }
 0x102   :  { %v111_v37 = vpop.f32.mrf.mxu0  ;;  %v124_v38 = vpop.f32.mrf.mxu1 }
 0x103   :  { %128 = vst [vmem:[%s291_s6] sm:$0xff] %v111_v37 }
 0x104   :  { %129 = vst.msk [vmem:[%s291_s6 + $0x8] sm:$0xff] %vm98_vm0, %v124_v38 }
 0x10a   :  { %v113_v39 = vpop.f32.mrf.mxu0  ;;  %v126_v40 = vpop.f32.mrf.mxu1 }

// kernel: _lambda_.56
= control target key start
LH: loop header
LB: loop body
LE: loop exit
PB: predicated region body
PF: predicated region fallthrough
CT: control target
= control target key end

     0   :  { %s357_s6 = smov 0   ;;  %s389_s0 = inlined_call_operand.vmem [shape: f32[2,4,192], index: 0, kind: input, shape index: {}]   ;;  %s390_s1 = inlined_call_operand.vmem [shape: f32[2,4,64], index: 1, kind: output, shape index: {}]  }
   0x1 LB: > { %s302_s7 = sadd.s32 4294967295, %s342_s6   ;;  %p306_p0 = scmp.ge.s32.totalorder %s342_s6, 1  ;;  %s342_s6 = sphi %s357_s6, %s11_s6  }
   0x2   : > { %p87_p1 = scmp.lt.s32.totalorder %s342_s6, 3 }
   0x4   : > { %p88_p2 = pnand %p306_p0, %p87_p1 }
   0x5   : > { %p106_p3 = scmp.lt.s32.totalorder (!%p88_p2), %s302_s7, 1  ;;  %s344_s12 = smov (!%p88_p2), 32  }
   0x6   : > { %91 = sbr.rel (%p88_p2) target bundleno = 779 (0x30b), region = 24  ;;  %s345_s13 = smov (!%p88_p2), 64  }
   0x7   : > { %s346_s14 = smov (!%p88_p2), 96  }
   0xb   : > { %s392_s7 = smov (!%p106_p3, %s302_s7), 1  ;;  %vm126_vm0 = vcmask 261120   ;;  %vm147_vm1 = vcmask 27648   ;;  %vm164_vm2 = vcmask 1041408   ;;  %vm160_vm3 = vcmask 31744  }
   0xc   : > { %s316_s8 = sshll.u32 %s392_s7, 3  ;;  %s309_s15 = sshll.u32 %s392_s7, 2  ;;  %vm247_vm4 = vcmask 519168  }
   0xd   : > { %s110_s11 = scalar_lea.vmem %s389_s0, %s316_s8  ;;  %s114_s18 = scalar_lea.vmem %s390_s1, %s309_s15 }
   0xe   : > { %v116_v0 = vld [vmem:[%s110_s11] sm:$0xff] }
   0xf   : > { %v117_v1 = vpack.c.bf16 %v116_v0, %v116_v0  ;;  %119 = vst [vmem:[#allocation1] ss:$2 sm:$0xff] %v116_v0 }
  0x11   : > { %189 = vrot.lane.b32.xlu0 %v117_v1, %s344_s12  ;;  %124 = vrot.lane.b32.xlu1 %v117_v1, %s345_s13 }
  0x16   : > { %v120_v2 = vld.sshfl [vmem:[#allocation1 + $0x8] sm:$0xff pattern:$0x75316420] }
  0x17   : > { %181 = vst [vmem:[#allocation1] ss:$2 sm:$0xff] %v116_v0  ;;  %v122_v30 = vpack.c.bf16 %v120_v2, %v120_v2 }
  0x19   : > { %187 = vrot.lane.b32.xlu0 %v117_v1, %s346_s14  ;;  %v166_v31 = vsel %vm164_vm2, %v122_v30, 0 }
  0x1a   : > { %175 = vmatpush.bf16.msra.mxu1 %v166_v31 }
  0x1e   : > { %v182_v16 = vld.sshfl [vmem:[#allocation1 + $0x8] sm:$0xff pattern:$0x75316420] }
  0x21   : > { %183 = vrot.lane.b32.xlu0 %v182_v16, %s346_s14 }
  0x83   : > { %v190_v3 = vpop.permute.xlu0 %189  ;;  %v125_v4 = vpop.permute.xlu1 %124 }
  0x84   : > { %v195_v5 = vsel %vm126_vm0, %v190_v3, 0  ;;  %v131_v6 = vsel %vm126_vm0, %v125_v4, 0 }
  0x85   : > { %204 = vmatpush.bf16.xpose.msra.mxu2 %v195_v5  ;;  %140 = vmatpush.bf16.xpose.msra.mxu0 %v131_v6 }
  0x8b   : > { %v188_v7 = vpop.permute.xlu0 %187 }
  0x8c   : > { %312 = vmatmul.msk.bf16.vlgmr.msra.gmra.mxu2 %vm126_vm0, %v188_v7  ;;  %310 = vmatmul.msk.bf16.vlgmr.msra.gmra.mxu0 %vm126_vm0, %v117_v1 }
  0x93   : > { %v184_v27 = vpop.permute.xlu0 %183 }
  0x94   : > { %v186_v28 = vpack.c.bf16 %v184_v27, %v184_v27 }
  0x96   : > { %v227_v29 = vsel %vm164_vm2, %v186_v28, 0 }
  0x97   : > { %236 = vmatpush.bf16.msra.mxu3 %v227_v29 }
 0x109   : > { %v142_v8 = vpop.f32.mrf.mxu0 }
 0x10a   : > { %v146_v9 = vmul.f32 0.17677669, %v142_v8 }
 0x10c   : > { %v148_v10 = vsel %vm147_vm1, %v146_v9, -inf }
 0x10d   : > { %149 = vmax.xlane.f32.xlu2 %v148_v10 }
 0x10f   : > { %v206_v11 = vpop.f32.mrf.mxu2 }
 0x110   : > { %v210_v12 = vmul.f32 0.17677669, %v206_v11 }
 0x111   : > { %v144_v13 = vpop.f32.mrf.mxu0 }
 0x112   : > { %v211_v14 = vsel %vm147_vm1, %v210_v12, -inf }
 0x113   : > { %212 = vmax.xlane.f32.xlu1 %v211_v14 }
 0x117   : > { %v208_v15 = vpop.f32.mrf.mxu2 }
 0x180   : > { %v150_v17 = vpop.xlane.xlu2 %149 }
 0x181   : > { %v151_v20 = vsub.f32 %v146_v9, %v150_v17 }
 0x183   : > { %v152_v22 = vmul.f32 1.442695, %v151_v20 }
 0x186   : > { %v213_v18 = vpop.xlane.xlu1 %212 }
 0x187   : > { %v214_v19 = vsub.f32 %v210_v12, %v213_v18 }
 0x189   : > { %v215_v21 = vmul.f32 1.442695, %v214_v19 }
 0x18b   : > { %328 = vpow2.f32 %v215_v21 }
 0x18c   : > { %330 = vpow2.f32 %v152_v22 }
 0x191   : > { %v329_v23 = vpop.eup %328 }
 0x192   : > { %v217_v24 = vsel %vm147_vm1, %v329_v23, 0.0  ;;  %v331_v25 = vpop.eup %330 }
 0x193   : > { %218 = vadd.xlane.f32.xlu2 %v217_v24  ;;  %v154_v26 = vsel %vm147_vm1, %v331_v25, 0.0 }
 0x19b   : > { %155 = vadd.xlane.f32.xlu2 %v154_v26 }
 0x206   : > { %v219_v32 = vpop.xlane.xlu2 %218 }
 0x207   : > { %332 = vrcp.f32 %v219_v32 }
 0x20d   : > { %v333_v33 = vpop.eup %332 }
 0x20e   : > { %v156_v34 = vpop.xlane.xlu2 %155  ;;  %v221_v35 = vmul.f32 %v333_v33, %v329_v23 }
 0x20f   : > { %334 = vrcp.f32 %v156_v34 }
 0x210   : > { %v222_v36 = vpack.c.bf16 %v221_v35, %v221_v35 }
 0x212   : > { %313 = vmatmul.msk.bf16.vlgmr.msra.gmra.mxu3 %vm160_vm3, %v222_v36 }
 0x215   : > { %v335_v37 = vpop.eup %334 }
 0x216   : > { %v158_v38 = vmul.f32 %v335_v37, %v331_v25 }
 0x218   : > { %v159_v39 = vpack.c.bf16 %v158_v38, %v158_v38 }
 0x21a   : > { %311 = vmatmul.msk.bf16.vlgmr.msra.gmra.mxu1 %vm160_vm3, %v159_v39 }
 0x295   : > { %v238_v40 = vpop.f32.mrf.mxu3 }
 0x296   : > { %243 = vrot.lane.b32.xlu0 %v238_v40, %s344_s12 }
 0x297   : > { %v177_v41 = vpop.f32.mrf.mxu1 }
 0x29d   : > { %v240_v42 = vpop.f32.mrf.mxu3 }
 0x29f   : > { %v179_v43 = vpop.f32.mrf.mxu1 }
 0x308   : > { %v244_v44 = vpop.permute.xlu0 %243 }
 0x309   : > { %v246_v45 = vsel %vm126_vm0, %v177_v41, %v244_v44 }
 0x30a   : > { %248 = vst.msk [vmem:[%s114_s18] sm:$0xf] %vm247_vm4, %v246_v45 }
 0x30b PF: > { %s11_s6 = sadd.s32 1, %s342_s6  }
 0x30c   : > { %p8_p4 = scmp.ge.s32.totalorder %s11_s6, 4  }
 0x30e   :  { %10 = sbr.rel (!%p8_p4) target bundleno = 1 (0x1), region = 54 }

// kernel: _lambda_.57
= control target key start
LH: loop header
LB: loop body
LE: loop exit
PB: predicated region body
PF: predicated region fallthrough
CT: control target
= control target key end

     0   :  { %vm55_vm0 = vcmask 523264   ;;  %s169_s1 = inlined_call_operand.vmem [shape: bf16[64,64], index: 1, kind: input, shape index: {}]   ;;  %s170_s2 = inlined_call_operand.vmem [shape: f32[1,64], index: 2, kind: input, shape index: {}]   ;;  %s171_s3 = inlined_call_operand.vmem [shape: f32[1,64], index: 3, kind: input, shape index: {}]   ;;  %s172_s0 = inlined_call_operand.vmem [shape: f32[8,64], index: 0, kind: input, shape index: {}]   ;;  %s173_s4 = inlined_call_operand.vmem [shape: f32[8,64], index: 4, kind: input, shape index: {}]   ;;  %s174_s5 = inlined_call_operand.vmem [shape: f32[8,64], index: 5, kind: output, shape index: {}]  }
   0x1   :  { %v109_v0 = vld [vmem:[%s169_s1 + $0x18] sm:$0xff]  ;;  %v108_v1 = vld [vmem:[%s169_s1 + $0x10] sm:$0xff]  ;;  %v107_v2 = vld [vmem:[%s169_s1 + $0x8] sm:$0xff] }
   0x2   :  { %63 = vmatpush.bf16.msra.mxu0 %v109_v0  ;;  %v106_v3 = vld [vmem:[%s169_s1] sm:$0xff] }
   0x3   :  { %v21_v4 = vld [vmem:[%s172_s0] sm:$0xff] }
   0x4   :  { %v22_v5 = vpack.c.bf16 %v21_v4, %v21_v4  ;;  %v110_v6 = vld [vmem:[%s170_s2] ss:$0 sm:$0xff] }
   0x5   :  { %v111_v7 = vld [vmem:[%s171_s3] ss:$0 sm:$0xff] }
   0x6   :  { %64 = vmatpush.bf16.msra.mxu0 %v108_v1  ;;  %v82_v10 = vld [vmem:[%s173_s4] sm:$0xff] }
   0xa   :  { %65 = vmatpush.bf16.msra.mxu0 %v107_v2 }
   0xe   :  { %66 = vmatpush.bf16.msra.mxu0 %v106_v3 }
  0x11   :  { %105 = vmatmul.msk.bf16.vlgmr.msra.gmra.mxu0 %vm55_vm0, %v22_v5 }
  0x8e   :  { %v68_v8 = vpop.f32.mrf.mxu0 }
  0x8f   :  { %v76_v9 = vmul.f32 %v110_v6, %v68_v8 }
  0x91   :  { %v81_v11 = vadd.f32 %v111_v7, %v76_v9 }
  0x93   :  { %v83_v12 = vadd.f32 %v82_v10, %v81_v11 }
  0x95   :  { %84 = vst.msk [vmem:[%s174_s5] sm:$0xff] %vm55_vm0, %v83_v12 }
  0x96   :  { %v70_v13 = vpop.f32.mrf.mxu0 }

// kernel: _lambda_.59
= control target key start
LH: loop header
LB: loop body
LE: loop exit
PB: predicated region body
PF: predicated region fallthrough
CT: control target
= control target key end

     0   :  { %v296_v0 = vmov 0   ;;  %vm104_vm0 = vcmask 523264   ;;  %s435_s4 = inlined_call_operand.vmem [shape: f32[8,1], index: 4, kind: input, shape index: {}]   ;;  %s436_s2 = inlined_call_operand.vmem [shape: f32[1,64], index: 2, kind: input, shape index: {}]   ;;  %s437_s3 = inlined_call_operand.vmem [shape: f32[1,64], index: 3, kind: input, shape index: {}]   ;;  %s438_s5 = inlined_call_operand.vmem [shape: f32[8,1], index: 5, kind: input, shape index: {}]   ;;  %s439_s1 = inlined_call_operand.vmem [shape: bf16[64,256], index: 1, kind: input, shape index: {}]   ;;  %s440_s0 = inlined_call_operand.vmem [shape: f32[8,64], index: 0, kind: input, shape index: {}]   ;;  %s441_s6 = inlined_call_operand.vmem [shape: f32[1,256], index: 6, kind: input, shape index: {}]   ;;  %s442_s7 = inlined_call_operand.vmem [shape: f32[1,256], index: 7, kind: input, shape index: {}]   ;;  %s443_s8 = inlined_call_operand.vmem [shape: f32[8,256], index: 8, kind: output, shape index: {}]  }
   0x1   :  { %289 = vset.pattern.permute.xlu0 %v296_v0  ;;  %v31_v1 = vld [vmem:[%s435_s4] sm:$0xff]  ;;  %v270_v3 = vld [vmem:[%s439_s1 + $0x30] sm:$0xf]  ;;  %v287_v4 = vld [vmem:[%s439_s1 + $0x34] sm:$0xf0] }
   0x2   :  { %34 = vperm.xlu0 %289, %v31_v1   ;;  %v38_v2 = vld [vmem:[%s438_s5] sm:$0xff]  ;;  %v286_v5 = vld [vmem:[%s439_s1 + $0x34] sm:$0xf]  ;;  %v271_v6 = vor.u32 %v287_v4, %v270_v3  ;;  %v272_v7 = vld [vmem:[%s439_s1 + $0x38] sm:$0xf0] }
   0x3   :  { %v275_v8 = vor.u32 %v286_v5, %v272_v7  ;;  %v262_v9 = vld [vmem:[%s439_s1 + $0x20] sm:$0xf]  ;;  %v285_v10 = vld [vmem:[%s439_s1 + $0x24] sm:$0xf0]  ;;  %v284_v11 = vld [vmem:[%s439_s1 + $0x24] sm:$0xf] }
   0x4   :  { %112 = vmatpush.bf16.msra.mxu0 %v271_v6  ;;  %v263_v12 = vor.u32 %v285_v10, %v262_v9  ;;  %v264_v13 = vld [vmem:[%s439_s1 + $0x28] sm:$0xf0]  ;;  %v254_v15 = vld [vmem:[%s439_s1 + $0x10] sm:$0xf]  ;;  %v283_v16 = vld [vmem:[%s439_s1 + $0x14] sm:$0xf0] }
   0x5   :  { %125 = vmatpush.bf16.msra.mxu1 %v275_v8  ;;  %v267_v14 = vor.u32 %v284_v11, %v264_v13  ;;  %v282_v17 = vld [vmem:[%s439_s1 + $0x14] sm:$0xf]  ;;  %v255_v18 = vor.u32 %v283_v16, %v254_v15  ;;  %v256_v19 = vld [vmem:[%s439_s1 + $0x18] sm:$0xf0]  ;;  %v246_v21 = vld [vmem:[%s439_s1] sm:$0xf] }
   0x6   :  { %v259_v20 = vor.u32 %v282_v17, %v256_v19  ;;  %v281_v22 = vld [vmem:[%s439_s1 + $0x4] sm:$0xf0]  ;;  %v280_v23 = vld [vmem:[%s439_s1 + $0x4] sm:$0xf]  ;;  %v248_v25 = vld [vmem:[%s439_s1 + $0x8] sm:$0xf0] }
   0x7   :  { %v247_v24 = vor.u32 %v281_v22, %v246_v21  ;;  %v251_v26 = vor.u32 %v280_v23, %v248_v25  ;;  %v30_v28 = vld [vmem:[%s440_s0] sm:$0xff] }
   0x8   :  { %113 = vmatpush.bf16.msra.mxu0 %v263_v12  ;;  %v290_v30 = vld [vmem:[%s436_s2] ss:$0 sm:$0xff] }
   0x9   :  { %126 = vmatpush.bf16.msra.mxu1 %v267_v14  ;;  %v291_v33 = vld [vmem:[%s437_s3] ss:$0 sm:$0xff] }
   0xa   :  { %41 = vperm.xlu0 %289, %v38_v2   ;;  %v134_v37 = vld [vmem:[%s441_s6] sm:$0x3] }
   0xb   :  { %v142_v38 = vld [vmem:[%s442_s7] sm:$0x3]  ;;  %v136_v39 = vperm.slane %v134_v37, 0  ;;  %v137_v40 = vperm.slane %v134_v37, 1 }
   0xc   :  { %114 = vmatpush.bf16.msra.mxu0 %v255_v18  ;;  %v144_v41 = vperm.slane %v142_v38, 0  ;;  %v145_v42 = vperm.slane %v142_v38, 1 }
   0xd   :  { %127 = vmatpush.bf16.msra.mxu1 %v259_v20 }
  0x10   :  { %115 = vmatpush.bf16.msra.mxu0 %v247_v24 }
  0x11   :  { %128 = vmatpush.bf16.msra.mxu1 %v251_v26 }
  0x74   :  { %v35_v27 = vpop.permute.xlu0 %34 }
  0x75   :  { %v37_v29 = vsub.f32 %v30_v28, %v35_v27 }
  0x7c   :  { %v42_v31 = vpop.permute.xlu0 %41 }
  0x7d   :  { %v44_v32 = vmul.f32 %v42_v31, %v37_v29 }
  0x7f   :  { %v49_v34 = vmul.f32 %v290_v30, %v44_v32 }
  0x81   :  { %v54_v35 = vadd.f32 %v291_v33, %v49_v34 }
  0x83   :  { %v55_v36 = vpack.c.bf16 %v54_v35, %v54_v35 }
  0x85   :  { %276 = vmatmul.msk.bf16.vlgmr.msra.gmra.mxu0 %vm104_vm0, %v55_v36  ;;  %277 = vmatmul.msk.bf16.vlgmr.msra.gmra.mxu1 %vm104_vm0, %v55_v36 }
 0x102   :  { %v117_v43 = vpop.f32.mrf.mxu0  ;;  %v130_v44 = vpop.f32.mrf.mxu1 }
 0x103   :  { %v140_v45 = vmul.f32 %v136_v39, %v117_v43  ;;  %v141_v46 = vmul.f32 %v137_v40, %v130_v44 }
 0x105   :  { %v411_v47 = vadd.f32 %v144_v41, %v140_v45  ;;  %v413_v48 = vadd.f32 %v145_v42, %v141_v46 }
 0x107   :  { %v416_v49 = vmul.f32 0.70710677, %v411_v47  ;;  %v419_v50 = vmul.f32 0.70710677, %v413_v48 }
 0x109   :  { %v154_v51 = vmul.f32 %v416_v49, %v416_v49  ;;  %v194_v52 = vmul.f32 %v419_v50, %v419_v50 }
 0x10a   :  { %v119_v53 = vpop.f32.mrf.mxu0  ;;  %v132_v54 = vpop.f32.mrf.mxu1 }
 0x10b   :  { %v155_v55 = vmin.f32 %v154_v51, 16.0  ;;  %v195_v56 = vmin.f32 %v194_v52, 16.0 }
 0x10d   :  { %v156_v57 = vmul.f32 2.1237322e-06, %v155_v55  ;;  %v167_v58 = vmul.f32 3.8918573e-05, %v155_v55  ;;  %v196_v59 = vmul.f32 2.1237322e-06, %v195_v56 }
 0x10e   :  { %v207_v60 = vmul.f32 3.8918573e-05, %v195_v56 }
 0x10f   :  { %v157_v61 = vadd.f32 0.00028619796, %v156_v57  ;;  %v168_v62 = vadd.f32 0.001143296, %v167_v58  ;;  %v197_v63 = vadd.f32 0.00028619796, %v196_v59 }
 0x110   :  { %v208_v0 = vadd.f32 0.001143296, %v207_v60 }
 0x111   :  { %v158_v1 = vmul.f32 %v157_v61, %v155_v55  ;;  %v169_v2 = vmul.f32 %v168_v62, %v155_v55  ;;  %v198_v3 = vmul.f32 %v197_v63, %v195_v56  ;;  %v150_v63 = vmul.f32 0.5, %v411_v47 }
 0x112   :  { %v209_v4 = vmul.f32 %v208_v0, %v195_v56 }
 0x113   :  { %v159_v5 = vadd.f32 0.0036580483, %v158_v1  ;;  %v170_v6 = vadd.f32 0.014752088, %v169_v2  ;;  %v199_v9 = vadd.f32 0.0036580483, %v198_v3 }
 0x114   :  { %v210_v7 = vadd.f32 0.014752088, %v209_v4  ;;  %v151_v1 = vmul.f32 0.5, %v413_v48 }
 0x115   :  { %v171_v8 = vmul.f32 %v170_v6, %v155_v55  ;;  %v160_v11 = vmul.f32 %v159_v5, %v155_v55  ;;  %v200_v15 = vmul.f32 %v199_v9, %v195_v56 }
 0x116   :  { %v211_v10 = vmul.f32 %v210_v7, %v195_v56 }
 0x117   :  { %v172_v12 = vadd.f32 0.112945676, %v171_v8  ;;  %v161_v17 = vadd.f32 0.05243302, %v160_v11  ;;  %v201_v21 = vadd.f32 0.05243302, %v200_v15 }
 0x118   :  { %v212_v13 = vadd.f32 0.112945676, %v211_v10 }
 0x119   :  { %v173_v14 = vmul.f32 %v172_v12, %v155_v55  ;;  %v162_v23 = vmul.f32 %v161_v17, %v155_v55  ;;  %v202_v26 = vmul.f32 %v201_v21, %v195_v56 }
 0x11a   :  { %v213_v16 = vmul.f32 %v212_v13, %v195_v56 }
 0x11b   :  { %v174_v18 = vadd.f32 0.4994258, %v173_v14  ;;  %v163_v27 = vadd.f32 0.18741608, %v162_v23  ;;  %v203_v28 = vadd.f32 0.18741608, %v202_v26 }
 0x11c   :  { %v214_v19 = vadd.f32 0.4994258, %v213_v16 }
 0x11d   :  { %v175_v20 = vmul.f32 %v174_v18, %v155_v55  ;;  %v164_v30 = vmul.f32 %v163_v27, %v155_v55  ;;  %v204_v33 = vmul.f32 %v203_v28, %v195_v56 }
 0x11e   :  { %v215_v22 = vmul.f32 %v214_v19, %v195_v56 }
 0x11f   :  { %v176_v24 = vadd.f32 1.0, %v175_v20  ;;  %v165_v36 = vadd.f32 1.1283791, %v164_v30  ;;  %v205_v42 = vadd.f32 1.1283791, %v204_v33 }
 0x120   :  { %v216_v25 = vadd.f32 1.0, %v215_v22 }
 0x121   :  { %292 = vrcp.f32 %v176_v24  ;;  %v188_v37 = vand.u32 2147483648, %v176_v24  ;;  %v186_v40 = vand.u32 2147483647, %v176_v24  ;;  %vm182_vm3 = vweird.f32 %v176_v24 }
 0x122   :  { %294 = vrcp.f32 %v216_v25  ;;  %v228_v41 = vand.u32 2147483648, %v216_v25  ;;  %v226_v44 = vand.u32 2147483647, %v216_v25  ;;  %vm222_vm5 = vweird.f32 %v216_v25 }
 0x123   :  { %v189_v46 = vor.u32 1.1754944e-38, %v188_v37  ;;  %v166_v52 = vmul.f32 %v165_v36, %v416_v49  ;;  %vm187_vm6 = vcmp.eq.f32.partialorder %v186_v40, 8.507059e+37  ;;  %v206_v56 = vmul.f32 %v205_v42, %v419_v50 }
 0x124   :  { %v229_v54 = vor.u32 1.1754944e-38, %v228_v41  ;;  %vm227_vm8 = vcmp.eq.f32.partialorder %v226_v44, 8.507059e+37 }
 0x127   :  { %v293_v29 = vpop.eup %292 }
 0x128   :  { %v295_v31 = vpop.eup %294  ;;  %v178_v32 = vmul.f32 %v293_v29, %v176_v24  ;;  %vm183_vm1 = vweird.f32 %v293_v29 }
 0x129   :  { %v218_v34 = vmul.f32 %v295_v31, %v216_v25  ;;  %vm223_vm2 = vweird.f32 %v295_v31  ;;  %vm184_vm4 = vmor %vm182_vm3, %vm183_vm1 }
 0x12a   :  { %v179_v35 = vsub.f32 1.0, %v178_v32  ;;  %vm224_vm7 = vmor %vm222_vm5, %vm223_vm2 }
 0x12b   :  { %v219_v38 = vsub.f32 1.0, %v218_v34 }
 0x12c   :  { %v180_v39 = vmul.f32 %v293_v29, %v179_v35 }
 0x12d   :  { %v220_v43 = vmul.f32 %v295_v31, %v219_v38 }
 0x12e   :  { %v181_v45 = vadd.f32 %v293_v29, %v180_v39 }
 0x12f   :  { %v221_v51 = vadd.f32 %v295_v31, %v220_v43 }
 0x130   :  { %v185_v53 = vsel %vm184_vm4, %v293_v29, %v181_v45 }
 0x131   :  { %v190_v55 = vsel %vm187_vm6, %v189_v46, %v185_v53  ;;  %v225_v57 = vsel %vm224_vm7, %v295_v31, %v221_v51 }
 0x132   :  { %v191_v58 = vmul.f32 %v190_v55, %v166_v52  ;;  %v230_v59 = vsel %vm227_vm8, %v229_v54, %v225_v57 }
 0x133   :  { %v231_v60 = vmul.f32 %v230_v59, %v206_v56 }
 0x134   :  { %v278_v61 = vclamps-f32 %v191_v58, 1.0 }
 0x135   :  { %v279_v62 = vclamps-f32 %v231_v60, 1.0 }
 0x136   :  { %v234_v0 = vadd.f32 1.0, %v278_v61 }
 0x137   :  { %v235_v49 = vadd.f32 1.0, %v279_v62 }
 0x138   :  { %v236_v2 = vmul.f32 %v234_v0, %v150_v63 }
 0x139   :  { %v237_v3 = vmul.f32 %v235_v49, %v151_v1 }
 0x13a   :  { %238 = vst [vmem:[%s443_s8] sm:$0xff] %v236_v2 }
 0x13b   :  { %239 = vst [vmem:[%s443_s8 + $0x8] sm:$0xff] %v237_v3 }

// kernel: _lambda_.60
= control target key start
LH: loop header
LB: loop body
LE: loop exit
PB: predicated region body
PF: predicated region fallthrough
CT: control target
= control target key end

     0   :  { %vm190_vm0 = vcmask 523264   ;;  %s374_s1 = inlined_call_operand.vmem [shape: bf16[256,64], index: 1, kind: input, shape index: {}]   ;;  %s375_s0 = inlined_call_operand.vmem [shape: f32[8,256], index: 0, kind: input, shape index: {}]   ;;  %s376_s2 = inlined_call_operand.vmem [shape: f32[1,64], index: 2, kind: input, shape index: {}]   ;;  %s377_s3 = inlined_call_operand.vmem [shape: f32[1,64], index: 3, kind: input, shape index: {}]   ;;  %s378_s4 = inlined_call_operand.vmem [shape: f32[8,64], index: 4, kind: input, shape index: {}]   ;;  %s379_s5 = inlined_call_operand.vmem [shape: f32[8,64], index: 5, kind: output, shape index: {}]  }
   0x1   :  { %v267_v0 = vld [vmem:[%s374_s1 + $0x38] sm:$0xff]  ;;  %v266_v2 = vld [vmem:[%s374_s1 + $0x30] sm:$0xff]  ;;  %v265_v4 = vld [vmem:[%s374_s1 + $0x28] sm:$0xff] }
   0x2   :  { %v275_v1 = vld [vmem:[%s374_s1 + $0x78] sm:$0xff]  ;;  %152 = vmatpush.bf16.msra.mxu0 %v267_v0  ;;  %v274_v3 = vld [vmem:[%s374_s1 + $0x70] sm:$0xff]  ;;  %v273_v5 = vld [vmem:[%s374_s1 + $0x68] sm:$0xff] }
   0x3   :  { %165 = vmatpush.bf16.msra.mxu1 %v275_v1  ;;  %v264_v6 = vld [vmem:[%s374_s1 + $0x20] sm:$0xff]  ;;  %v263_v8 = vld [vmem:[%s374_s1 + $0x18] sm:$0xff]  ;;  %v262_v10 = vld [vmem:[%s374_s1 + $0x10] sm:$0xff] }
   0x4   :  { %v272_v7 = vld [vmem:[%s374_s1 + $0x60] sm:$0xff]  ;;  %v271_v9 = vld [vmem:[%s374_s1 + $0x58] sm:$0xff]  ;;  %v270_v11 = vld [vmem:[%s374_s1 + $0x50] sm:$0xff] }
   0x5   :  { %v261_v12 = vld [vmem:[%s374_s1 + $0x8] sm:$0xff]  ;;  %v260_v14 = vld [vmem:[%s374_s1] sm:$0xff] }
   0x6   :  { %153 = vmatpush.bf16.msra.mxu0 %v266_v2  ;;  %v269_v13 = vld [vmem:[%s374_s1 + $0x48] sm:$0xff]  ;;  %v268_v15 = vld [vmem:[%s374_s1 + $0x40] sm:$0xff] }
   0x7   :  { %166 = vmatpush.bf16.msra.mxu1 %v274_v3  ;;  %v20_v16 = vld [vmem:[%s375_s0] sm:$0xff]  ;;  %v21_v17 = vld [vmem:[%s375_s0 + $0x8] sm:$0xff] }
   0x8   :  { %v22_v18 = vpack.c.bf16 %v20_v16, %v20_v16  ;;  %v23_v19 = vpack.c.bf16 %v21_v17, %v21_v17  ;;  %v276_v20 = vld [vmem:[%s376_s2] ss:$0 sm:$0xff] }
   0x9   :  { %v277_v24 = vld [vmem:[%s377_s3] ss:$0 sm:$0xff] }
   0xa   :  { %154 = vmatpush.bf16.msra.mxu0 %v265_v4  ;;  %v188_v26 = vld [vmem:[%s378_s4] sm:$0xff] }
   0xb   :  { %167 = vmatpush.bf16.msra.mxu1 %v273_v5 }
   0xe   :  { %155 = vmatpush.bf16.msra.mxu0 %v264_v6 }
   0xf   :  { %168 = vmatpush.bf16.msra.mxu1 %v272_v7 }
  0x12   :  { %156 = vmatpush.bf16.msra.mxu0 %v263_v8 }
  0x13   :  { %169 = vmatpush.bf16.msra.mxu1 %v271_v9 }
  0x16   :  { %157 = vmatpush.bf16.msra.mxu0 %v262_v10 }
  0x17   :  { %170 = vmatpush.bf16.msra.mxu1 %v270_v11 }
  0x1a   :  { %158 = vmatpush.bf16.msra.mxu0 %v261_v12 }
  0x1b   :  { %171 = vmatpush.bf16.msra.mxu1 %v269_v13 }
  0x1e   :  { %159 = vmatpush.bf16.msra.mxu0 %v260_v14 }
  0x1f   :  { %172 = vmatpush.bf16.msra.mxu1 %v268_v15 }
  0x21   :  { %160 = vmatmul.bf16.vlgmr.msra.gmra.mxu0 %v22_v18 }
  0x22   :  { %173 = vmatmul.bf16.vlgmr.msra.gmra.mxu1 %v23_v19 }
  0x9e   :  { %v161_v21 = vpop.f32.mrf.mxu0 }
  0x9f   :  { %v174_v22 = vpop.f32.mrf.mxu1 }
  0xa0   :  { %v175_v23 = vadd.f32 %v174_v22, %v161_v21 }
  0xa2   :  { %v182_v25 = vmul.f32 %v276_v20, %v175_v23 }
  0xa4   :  { %v187_v27 = vadd.f32 %v277_v24, %v182_v25 }
  0xa6   :  { %v189_v28 = vadd.f32 %v188_v26, %v187_v27  ;;  %v163_v29 = vpop.f32.mrf.mxu0 }
  0xa7   :  { %v176_v30 = vpop.f32.mrf.mxu1 }
  0xa8   :  { %191 = vst.msk [vmem:[%s379_s5] sm:$0xff] %vm190_vm0, %v189_v28 }

// kernel: _lambda_.63
= control target key start
LH: loop header
LB: loop body
LE: loop exit
PB: predicated region body
PF: predicated region fallthrough
CT: control target
= control target key end

     0   :  { %vm14_vm0 = vcmask 130048   ;;  %v134_v8 = vmov 16.0   ;;  %vm62_vm2 = vcmask 7168   ;;  %s202_s0 = inlined_call_operand.vmem [shape: f32[32,16], index: 0, kind: input, shape index: {}]   ;;  %s203_s1 = inlined_call_operand.vmem [shape: f32[32,1], index: 1, kind: output, shape index: {0}]   ;;  %s204_s2 = inlined_call_operand.vmem [shape: f32[32,1], index: 2, kind: output, shape index: {1}]  }
   0x1   :  { %v12_v0 = vld [vmem:[%s202_s0 + $0x10] sm:$0xff]  ;;  %v10_v1 = vld [vmem:[%s202_s0] sm:$0xff]  ;;  %v13_v4 = vld [vmem:[%s202_s0 + $0x18] sm:$0xff]  ;;  %124 = vrcp.f32 %v134_v8 }
   0x2   :  { %v21_v2 = vsel %vm14_vm0, %v12_v0, 0.0  ;;  %v15_v3 = vsel %vm14_vm0, %v10_v1, 0.0  ;;  %v11_v5 = vld [vmem:[%s202_s0 + $0x8] sm:$0xff]  ;;  %v24_v6 = vsel %vm14_vm0, %v13_v4, 0.0 }
   0x3   :  { %22 = vadd.xlane.f32.xlu1 %v21_v2  ;;  %16 = vadd.xlane.f32.xlu0 %v15_v3  ;;  %v18_v7 = vsel %vm14_vm0, %v11_v5, 0.0 }
   0x7   :  { %v125_v9 = vpop.eup %124 }
   0x8   :  { %v28_v10 = vmul.f32 16.0, %v125_v9  ;;  %vm32_vm1 = vweird.f32 %v125_v9 }
   0xa   :  { %v29_v11 = vsub.f32 1.0, %v28_v10 }
   0xb   :  { %25 = vadd.xlane.f32.xlu1 %v24_v6  ;;  %19 = vadd.xlane.f32.xlu0 %v18_v7 }
   0xc   :  { %v30_v12 = vmul.f32 %v125_v9, %v29_v11 }
   0xe   :  { %v31_v13 = vadd.f32 %v125_v9, %v30_v12 }
  0x10   :  { %v33_v14 = vsel %vm32_vm1, %v125_v9, %v31_v13 }
  0x76   :  { %v23_v15 = vpop.xlane.xlu1 %22  ;;  %v17_v16 = vpop.xlane.xlu0 %16 }
  0x77   :  { %v36_v17 = vmul.f32 %v33_v14, %v23_v15  ;;  %v34_v18 = vmul.f32 %v33_v14, %v17_v16 }
  0x79   :  { %v40_v19 = vsub.f32 %v12_v0, %v36_v17  ;;  %65 = vst.msk [vmem:[%s203_s1 + $0x10] sm:$0xff] %vm62_vm2, %v36_v17  ;;  %v38_v20 = vsub.f32 %v10_v1, %v34_v18 }
  0x7a   :  { %63 = vst.msk [vmem:[%s203_s1] sm:$0xff] %vm62_vm2, %v34_v18 }
  0x7b   :  { %v44_v21 = vmul.f32 %v40_v19, %v40_v19  ;;  %v42_v22 = vmul.f32 %v38_v20, %v38_v20 }
  0x7d   :  { %v52_v23 = vsel %vm14_vm0, %v44_v21, 0.0  ;;  %v46_v24 = vsel %vm14_vm0, %v42_v22, 0.0 }
  0x7e   :  { %v26_v25 = vpop.xlane.xlu1 %25  ;;  %53 = vadd.xlane.f32.xlu0 %v52_v23  ;;  %47 = vadd.xlane.f32.xlu2 %v46_v24  ;;  %v20_v26 = vpop.xlane.xlu0 %19 }
  0x7f   :  { %v37_v27 = vmul.f32 %v33_v14, %v26_v25  ;;  %v35_v28 = vmul.f32 %v33_v14, %v20_v26 }
  0x81   :  { %v41_v29 = vsub.f32 %v13_v4, %v37_v27  ;;  %66 = vst.msk [vmem:[%s203_s1 + $0x18] sm:$0xff] %vm62_vm2, %v37_v27  ;;  %v39_v30 = vsub.f32 %v11_v5, %v35_v28 }
  0x82   :  { %64 = vst.msk [vmem:[%s203_s1 + $0x8] sm:$0xff] %vm62_vm2, %v35_v28 }
  0x83   :  { %v45_v31 = vmul.f32 %v41_v29, %v41_v29  ;;  %v43_v32 = vmul.f32 %v39_v30, %v39_v30 }
  0x85   :  { %v55_v33 = vsel %vm14_vm0, %v45_v31, 0.0  ;;  %v49_v34 = vsel %vm14_vm0, %v43_v32, 0.0 }
  0x86   :  { %56 = vadd.xlane.f32.xlu1 %v55_v33  ;;  %50 = vadd.xlane.f32.xlu2 %v49_v34 }
  0xf1   :  { %v48_v35 = vpop.xlane.xlu2 %47  ;;  %v54_v36 = vpop.xlane.xlu0 %53 }
  0xf2   :  { %v58_v37 = vmul.f32 %v48_v35, %v33_v14  ;;  %v60_v38 = vmul.f32 %v54_v36, %v33_v14 }
  0xf4   :  { %v67_v39 = vadd.f32 1e-05, %v58_v37  ;;  %v69_v40 = vadd.f32 1e-05, %v60_v38 }
  0xf6   :  { %126 = vrsqrt.f32 %v67_v39  ;;  %vm77_vm5 = vweird.f32 %v67_v39  ;;  %vm97_vm7 = vweird.f32 %v69_v40 }
  0xf7   :  { %128 = vrsqrt.f32 %v69_v40 }
  0xf9   :  { %v57_v41 = vpop.xlane.xlu1 %56  ;;  %v51_v42 = vpop.xlane.xlu2 %50 }
  0xfa   :  { %v61_v43 = vmul.f32 %v57_v41, %v33_v14  ;;  %v59_v44 = vmul.f32 %v51_v42, %v33_v14 }
  0xfc   :  { %v127_v45 = vpop.eup %126  ;;  %v70_v46 = vadd.f32 1e-05, %v61_v43  ;;  %v68_v47 = vadd.f32 1e-05, %v59_v44 }
  0xfd   :  { %v129_v48 = vpop.eup %128  ;;  %v72_v49 = vmul.f32 %v127_v45, %v67_v39  ;;  %vm78_vm3 = vweird.f32 %v127_v45 }
  0xfe   :  { %v92_v50 = vmul.f32 %v129_v48, %v69_v40  ;;  %130 = vrsqrt.f32 %v70_v46  ;;  %vm98_vm4 = vweird.f32 %v129_v48  ;;  %vm79_vm6 = vmor %vm77_vm5, %vm78_vm3  ;;  %vm107_vm11 = vweird.f32 %v70_v46 }
  0xff   :  { %v73_v51 = vmul.f32 %v127_v45, %v72_v49  ;;  %132 = vrsqrt.f32 %v68_v47  ;;  %vm99_vm8 = vmor %vm97_vm7, %vm98_vm4  ;;  %vm87_vm13 = vweird.f32 %v68_v47 }
 0x100   :  { %v93_v52 = vmul.f32 %v129_v48, %v92_v50 }
 0x101   :  { %v74_v53 = vmul.f32 0.5, %v73_v51 }
 0x102   :  { %v94_v54 = vmul.f32 0.5, %v93_v52 }
 0x103   :  { %v75_v55 = vsub.f32 1.5, %v74_v53 }
 0x104   :  { %v131_v56 = vpop.eup %130  ;;  %v95_v57 = vsub.f32 1.5, %v94_v54 }
 0x105   :  { %v133_v58 = vpop.eup %132  ;;  %v76_v59 = vmul.f32 %v127_v45, %v75_v55  ;;  %v102_v60 = vmul.f32 %v131_v56, %v70_v46  ;;  %vm108_vm9 = vweird.f32 %v131_v56 }
 0x106   :  { %v96_v61 = vmul.f32 %v129_v48, %v95_v57  ;;  %v82_v62 = vmul.f32 %v133_v58, %v68_v47  ;;  %vm88_vm10 = vweird.f32 %v133_v58  ;;  %vm109_vm12 = vmor %vm107_vm11, %vm108_vm9 }
 0x107   :  { %v80_v63 = vsel %vm79_vm6, %v127_v45, %v76_v59  ;;  %v103_v0 = vmul.f32 %v131_v56, %v102_v60  ;;  %vm89_vm14 = vmor %vm87_vm13, %vm88_vm10 }
 0x108   :  { %111 = vst.msk [vmem:[%s204_s2] sm:$0xff] %vm62_vm2, %v80_v63  ;;  %v100_v1 = vsel %vm99_vm8, %v129_v48, %v96_v61  ;;  %v83_v2 = vmul.f32 %v133_v58, %v82_v62 }
 0x109   :  { %113 = vst.msk [vmem:[%s204_s2 + $0x10] sm:$0xff] %vm62_vm2, %v100_v1  ;;  %v104_v3 = vmul.f32 0.5, %v103_v0 }
 0x10a   :  { %v84_v4 = vmul.f32 0.5, %v83_v2 }
 0x10b   :  { %v105_v5 = vsub.f32 1.5, %v104_v3 }
 0x10c   :  { %v85_v6 = vsub.f32 1.5, %v84_v4 }
 0x10d   :  { %v106_v7 = vmul.f32 %v131_v56, %v105_v5 }
 0x10e   :  { %v86_v8 = vmul.f32 %v133_v58, %v85_v6 }
 0x10f   :  { %v110_v9 = vsel %vm109_vm12, %v131_v56, %v106_v7 }
 0x110   :  { %114 = vst.msk [vmem:[%s204_s2 + $0x18] sm:$0xff] %vm62_vm2, %v110_v9  ;;  %v90_v10 = vsel %vm89_vm14, %v133_v58, %v86_v8 }
 0x111   :  { %112 = vst.msk [vmem:[%s204_s2 + $0x8] sm:$0xff] %vm62_vm2, %v90_v10 }

// kernel: _lambda_.64
= control target key start
LH: loop header
LB: loop body
LE: loop exit
PB: predicated region body
PF: predicated region fallthrough
CT: control target
= control target key end

     0   :  { %v182_v0 = vmov 0   ;;  %vm116_vm0 = vcmask 130048   ;;  %s297_s4 = inlined_call_operand.vmem [shape: f32[32,1], index: 4, kind: input, shape index: {}]   ;;  %s298_s5 = inlined_call_operand.vmem [shape: f32[32,1], index: 5, kind: input, shape index: {}]   ;;  %s299_s2 = inlined_call_operand.vmem [shape: f32[1,16], index: 2, kind: input, shape index: {}]   ;;  %s300_s3 = inlined_call_operand.vmem [shape: f32[1,16], index: 3, kind: input, shape index: {}]   ;;  %s301_s6 = inlined_call_operand.vmem [shape: f32[1,16], index: 6, kind: input, shape index: {}]   ;;  %s302_s7 = inlined_call_operand.vmem [shape: f32[1,16], index: 7, kind: input, shape index: {}]   ;;  %s303_s1 = inlined_call_operand.vmem [shape: bf16[16,16], index: 1, kind: input, shape index: {}]   ;;  %s304_s0 = inlined_call_operand.vmem [shape: f32[32,16], index: 0, kind: input, shape index: {}]   ;;  %s305_s8 = inlined_call_operand.vmem [shape: f32[32,16], index: 8, kind: output, shape index: {}]  }
   0x1   :  { %176 = vset.pattern.permute.xlu1 %v182_v0  ;;  %175 = vset.pattern.permute.xlu0 %v182_v0  ;;  %v36_v1 = vld [vmem:[%s297_s4 + $0x10] sm:$0xff]  ;;  %v34_v2 = vld [vmem:[%s297_s4] sm:$0xff]  ;;  %v37_v4 = vld [vmem:[%s297_s4 + $0x18] sm:$0xff] }
   0x2   :  { %50 = vperm.xlu1 %176, %v36_v1   ;;  %40 = vperm.xlu0 %175, %v34_v2   ;;  %v62_v3 = vld [vmem:[%s298_s5] sm:$0xff]  ;;  %v35_v5 = vld [vmem:[%s297_s4 + $0x8] sm:$0xff]  ;;  %v65_v7 = vld [vmem:[%s298_s5 + $0x18] sm:$0xff] }
   0x3   :  { %177 = vset.pattern.permute.xlu2 %v182_v0  ;;  %v63_v6 = vld [vmem:[%s298_s5 + $0x8] sm:$0xff]  ;;  %v64_v8 = vld [vmem:[%s298_s5 + $0x10] sm:$0xff]  ;;  %v172_v9 = vld [vmem:[%s303_s1] sm:$0xff] }
   0x4   :  { %68 = vperm.xlu2 %177, %v62_v3   ;;  %130 = vmatpush.bf16.msra.mxu0 %v172_v9  ;;  %v30_v13 = vld [vmem:[%s304_s0] sm:$0xff]  ;;  %v31_v15 = vld [vmem:[%s304_s0 + $0x8] sm:$0xff]  ;;  %v32_v25 = vld [vmem:[%s304_s0 + $0x10] sm:$0xff] }
   0x5   :  { %173 = vmatpush.bf16.msra.mxu1 %v172_v9  ;;  %v178_v17 = vld [vmem:[%s299_s2] ss:$0 sm:$0xff]  ;;  %v33_v26 = vld [vmem:[%s304_s0 + $0x18] sm:$0xff] }
   0x6   :  { %v179_v24 = vld [vmem:[%s300_s3] ss:$0 sm:$0xff] }
   0x7   :  { %v180_v42 = vld [vmem:[%s301_s6] ss:$0 sm:$0xff] }
   0x8   :  { %v181_v43 = vld [vmem:[%s302_s7] ss:$0 sm:$0xff] }
   0xa   :  { %55 = vperm.xlu1 %176, %v37_v4   ;;  %45 = vperm.xlu0 %175, %v35_v5  }
   0xc   :  { %73 = vperm.xlu2 %177, %v63_v6  }
  0x12   :  { %83 = vperm.xlu1 %176, %v65_v7   ;;  %78 = vperm.xlu0 %175, %v64_v8  }
  0x5e   :  { %v69_v10 = vpop.permute.xlu2 %68 }
  0x66   :  { %v74_v21 = vpop.permute.xlu2 %73 }
  0x74   :  { %v51_v11 = vpop.permute.xlu1 %50  ;;  %v41_v12 = vpop.permute.xlu0 %40 }
  0x75   :  { %v58_v14 = vsub.f32 %v30_v13, %v41_v12  ;;  %v60_v28 = vsub.f32 %v32_v25, %v51_v11 }
  0x77   :  { %v86_v16 = vmul.f32 %v69_v10, %v58_v14 }
  0x79   :  { %v94_v22 = vmul.f32 %v178_v17, %v86_v16 }
  0x7b   :  { %v102_v30 = vadd.f32 %v179_v24, %v94_v22 }
  0x7c   :  { %v56_v18 = vpop.permute.xlu1 %55  ;;  %v46_v19 = vpop.permute.xlu0 %45 }
  0x7d   :  { %v59_v20 = vsub.f32 %v31_v15, %v46_v19  ;;  %v61_v29 = vsub.f32 %v33_v26, %v56_v18 }
  0x7f   :  { %v87_v23 = vmul.f32 %v74_v21, %v59_v20 }
  0x81   :  { %v95_v27 = vmul.f32 %v178_v17, %v87_v23 }
  0x83   :  { %v103_v31 = vadd.f32 %v179_v24, %v95_v27 }
  0x84   :  { %v84_v32 = vpop.permute.xlu1 %83  ;;  %v79_v33 = vpop.permute.xlu0 %78 }
  0x85   :  { %v89_v34 = vmul.f32 %v84_v32, %v61_v29  ;;  %v88_v35 = vmul.f32 %v79_v33, %v60_v28  ;;  %v106_v36 = vpack.c.bf16 %v103_v31, %v102_v30 }
  0x87   :  { %v97_v37 = vmul.f32 %v178_v17, %v89_v34  ;;  %v96_v38 = vmul.f32 %v178_v17, %v88_v35  ;;  %170 = vmatmul.msk.bf16.vlgmr.msra.gmra.mxu0 %vm116_vm0, %v106_v36 }
  0x89   :  { %v105_v39 = vadd.f32 %v179_v24, %v97_v37  ;;  %v104_v40 = vadd.f32 %v179_v24, %v96_v38 }
  0x8b   :  { %v107_v41 = vpack.c.bf16 %v105_v39, %v104_v40 }
  0x8d   :  { %171 = vmatmul.msk.bf16.vlgmr.msra.gmra.mxu1 %vm116_vm0, %v107_v41 }
 0x104   :  { %v132_v44 = vpop.f32.mrf.mxu0 }
 0x105   :  { %v146_v45 = vmul.f32 %v180_v42, %v132_v44 }
 0x107   :  { %v154_v46 = vadd.f32 %v181_v43, %v146_v45 }
 0x109   :  { %158 = vst.msk [vmem:[%s305_s8] sm:$0xff] %vm116_vm0, %v154_v46 }
 0x10a   :  { %v137_v47 = vpop.f32.mrf.mxu1 }
 0x10b   :  { %v148_v48 = vmul.f32 %v180_v42, %v137_v47 }
 0x10c   :  { %v134_v49 = vpop.f32.mrf.mxu0 }
 0x10d   :  { %v156_v50 = vadd.f32 %v181_v43, %v148_v48  ;;  %v147_v51 = vmul.f32 %v180_v42, %v134_v49 }
 0x10f   :  { %160 = vst.msk [vmem:[%s305_s8 + $0x10] sm:$0xff] %vm116_vm0, %v156_v50  ;;  %v155_v52 = vadd.f32 %v181_v43, %v147_v51 }
 0x111   :  { %159 = vst.msk [vmem:[%s305_s8 + $0x8] sm:$0xff] %vm116_vm0, %v155_v52 }
 0x112   :  { %v139_v53 = vpop.f32.mrf.mxu1 }
 0x113   :  { %v149_v54 = vmul.f32 %v180_v42, %v139_v53 }
 0x115   :  { %v157_v55 = vadd.f32 %v181_v43, %v149_v54 }
 0x117   :  { %161 = vst.msk [vmem:[%s305_s8 + $0x18] sm:$0xff] %vm116_vm0, %v157_v55 }

// kernel: _lambda_.66
= control target key start
LH: loop header
LB: loop body
LE: loop exit
PB: predicated region body
PF: predicated region fallthrough
CT: control target
= control target key end

     0   :  { %v159_v0 = vmov 0   ;;  %vm110_vm0 = vcmask 130048   ;;  %vm136_vm1 = vcmask 392192   ;;  %s252_s4 = inlined_call_operand.vmem [shape: f32[32,1], index: 4, kind: input, shape index: {}]   ;;  %s253_s5 = inlined_call_operand.vmem [shape: f32[32,1], index: 5, kind: input, shape index: {}]   ;;  %s254_s2 = inlined_call_operand.vmem [shape: f32[1,16], index: 2, kind: input, shape index: {}]   ;;  %s255_s3 = inlined_call_operand.vmem [shape: f32[1,16], index: 3, kind: input, shape index: {}]   ;;  %s256_s1 = inlined_call_operand.vmem [shape: bf16[16,48], index: 1, kind: input, shape index: {}]   ;;  %s257_s0 = inlined_call_operand.vmem [shape: f32[32,16], index: 0, kind: input, shape index: {}]   ;;  %s258_s6 = inlined_call_operand.vmem [shape: f32[32,48], index: 6, kind: output, shape index: {}]  }
   0x1   :  { %155 = vset.pattern.permute.xlu1 %v159_v0  ;;  %154 = vset.pattern.permute.xlu0 %v159_v0  ;;  %v30_v1 = vld [vmem:[%s252_s4 + $0x10] sm:$0xff]  ;;  %v28_v2 = vld [vmem:[%s252_s4] sm:$0xff]  ;;  %v31_v4 = vld [vmem:[%s252_s4 + $0x18] sm:$0xff] }
   0x2   :  { %44 = vperm.xlu1 %155, %v30_v1   ;;  %34 = vperm.xlu0 %154, %v28_v2   ;;  %v56_v3 = vld [vmem:[%s253_s5] sm:$0xff]  ;;  %v29_v5 = vld [vmem:[%s252_s4 + $0x8] sm:$0xff]  ;;  %v59_v7 = vld [vmem:[%s253_s5 + $0x18] sm:$0xff] }
   0x3   :  { %156 = vset.pattern.permute.xlu2 %v159_v0  ;;  %v57_v6 = vld [vmem:[%s253_s5 + $0x8] sm:$0xff]  ;;  %v58_v8 = vld [vmem:[%s253_s5 + $0x10] sm:$0xff]  ;;  %v151_v9 = vld [vmem:[%s256_s1] sm:$0xff] }
   0x4   :  { %62 = vperm.xlu2 %156, %v56_v3   ;;  %124 = vmatpush.bf16.msra.mxu0 %v151_v9  ;;  %v24_v13 = vld [vmem:[%s257_s0] sm:$0xff]  ;;  %v25_v15 = vld [vmem:[%s257_s0 + $0x8] sm:$0xff]  ;;  %v26_v25 = vld [vmem:[%s257_s0 + $0x10] sm:$0xff] }
   0x5   :  { %152 = vmatpush.bf16.msra.mxu1 %v151_v9  ;;  %v157_v17 = vld [vmem:[%s254_s2] ss:$0 sm:$0xff]  ;;  %v27_v26 = vld [vmem:[%s257_s0 + $0x18] sm:$0xff] }
   0x6   :  { %v158_v24 = vld [vmem:[%s255_s3] ss:$0 sm:$0xff] }
   0xa   :  { %49 = vperm.xlu1 %155, %v31_v4   ;;  %39 = vperm.xlu0 %154, %v29_v5  }
   0xc   :  { %67 = vperm.xlu2 %156, %v57_v6  }
  0x12   :  { %77 = vperm.xlu1 %155, %v59_v7   ;;  %72 = vperm.xlu0 %154, %v58_v8  }
  0x5e   :  { %v63_v10 = vpop.permute.xlu2 %62 }
  0x66   :  { %v68_v21 = vpop.permute.xlu2 %67 }
  0x74   :  { %v45_v11 = vpop.permute.xlu1 %44  ;;  %v35_v12 = vpop.permute.xlu0 %34 }
  0x75   :  { %v52_v14 = vsub.f32 %v24_v13, %v35_v12  ;;  %v54_v28 = vsub.f32 %v26_v25, %v45_v11 }
  0x77   :  { %v80_v16 = vmul.f32 %v63_v10, %v52_v14 }
  0x79   :  { %v88_v22 = vmul.f32 %v157_v17, %v80_v16 }
  0x7b   :  { %v96_v30 = vadd.f32 %v158_v24, %v88_v22 }
  0x7c   :  { %v50_v18 = vpop.permute.xlu1 %49  ;;  %v40_v19 = vpop.permute.xlu0 %39 }
  0x7d   :  { %v53_v20 = vsub.f32 %v25_v15, %v40_v19  ;;  %v55_v29 = vsub.f32 %v27_v26, %v50_v18 }
  0x7f   :  { %v81_v23 = vmul.f32 %v68_v21, %v53_v20 }
  0x81   :  { %v89_v27 = vmul.f32 %v157_v17, %v81_v23 }
  0x83   :  { %v97_v31 = vadd.f32 %v158_v24, %v89_v27 }
  0x84   :  { %v78_v32 = vpop.permute.xlu1 %77  ;;  %v73_v33 = vpop.permute.xlu0 %72 }
  0x85   :  { %v83_v34 = vmul.f32 %v78_v32, %v55_v29  ;;  %v82_v35 = vmul.f32 %v73_v33, %v54_v28  ;;  %v100_v36 = vpack.c.bf16 %v97_v31, %v96_v30 }
  0x87   :  { %v91_v37 = vmul.f32 %v157_v17, %v83_v34  ;;  %v90_v38 = vmul.f32 %v157_v17, %v82_v35  ;;  %149 = vmatmul.msk.bf16.vlgmr.msra.gmra.mxu0 %vm110_vm0, %v100_v36 }
  0x89   :  { %v99_v39 = vadd.f32 %v158_v24, %v91_v37  ;;  %v98_v40 = vadd.f32 %v158_v24, %v90_v38 }
  0x8b   :  { %v101_v41 = vpack.c.bf16 %v99_v39, %v98_v40 }
  0x8d   :  { %150 = vmatmul.msk.bf16.vlgmr.msra.gmra.mxu1 %vm110_vm0, %v101_v41 }
 0x104   :  { %v126_v42 = vpop.f32.mrf.mxu0 }
 0x105   :  { %137 = vst.msk [vmem:[%s258_s6] sm:$0xff] %vm136_vm1, %v126_v42 }
 0x10a   :  { %v131_v43 = vpop.f32.mrf.mxu1 }
 0x10b   :  { %139 = vst.msk [vmem:[%s258_s6 + $0x10] sm:$0xff] %vm136_vm1, %v131_v43 }
 0x10c   :  { %v128_v44 = vpop.f32.mrf.mxu0 }
 0x10d   :  { %138 = vst.msk [vmem:[%s258_s6 + $0x8] sm:$0xff] %vm136_vm1, %v128_v44 }
 0x112   :  { %v133_v45 = vpop.f32.mrf.mxu1 }
 0x113   :  { %140 = vst.msk [vmem:[%s258_s6 + $0x18] sm:$0xff] %vm136_vm1, %v133_v45 }

// kernel: _lambda_.67
= control target key start
LH: loop header
LB: loop body
LE: loop exit
PB: predicated region body
PF: predicated region fallthrough
CT: control target
= control target key end

     0   :  { %s398_s6 = smov 0   ;;  %s440_s0 = inlined_call_operand.vmem [shape: f32[2,16,48], index: 0, kind: input, shape index: {}]   ;;  %s441_s1 = inlined_call_operand.vmem [shape: f32[2,16,16], index: 1, kind: output, shape index: {}]  }
   0x1 LB: > { %s327_s7 = sadd.s32 4294967295, %s380_s6   ;;  %p331_p0 = scmp.ge.s32.totalorder %s380_s6, 1  ;;  %s380_s6 = sphi %s398_s6, %s11_s6  }
   0x2   : > { %p87_p1 = scmp.lt.s32.totalorder %s380_s6, 3 }
   0x4   : > { %p88_p2 = pnand %p331_p0, %p87_p1 }
   0x5   : > { %p107_p3 = scmp.lt.s32.totalorder (!%p88_p2), %s327_s7, 1  ;;  %s382_s12 = smov (!%p88_p2), 104  }
   0x6   : > { %91 = sbr.rel (%p88_p2) target bundleno = 795 (0x31b), region = 24  ;;  %s383_s13 = smov (!%p88_p2), 112  }
   0x7   : > { %s384_s14 = smov (!%p88_p2), 120   ;;  %s385_s15 = smov (!%p88_p2), 96  }
   0x8   : > { %s386_s16 = smov (!%p88_p2), 88   ;;  %s387_s17 = smov (!%p88_p2), 8  }
   0xb   : > { %s443_s7 = smov (!%p107_p3, %s327_s7), 1  ;;  %vm124_vm0 = vcmask 64512   ;;  %vm147_vm1 = vcmask 130048  }
   0xc   : > { %s342_s8 = sshll.u32 %s443_s7, 4 }
   0xd   : > { %s111_s11 = scalar_lea.vmem %s440_s0, %s342_s8  ;;  %s116_s20 = scalar_lea.vmem %s441_s1, %s342_s8 }
   0xe   : > { %v118_v0 = vld [vmem:[%s111_s11] sm:$0xff]  ;;  %v119_v1 = vld [vmem:[%s111_s11 + $0x8] sm:$0xff] }
   0xf   : > { %v120_v2 = vpack.c.bf16 %v119_v1, %v118_v0 }
  0x11   : > { %193 = vrot.lane.b32.xlu0 %v120_v2, %s382_s12  ;;  %122 = vrot.lane.b32.xlu1 %v120_v2, %s383_s13 }
  0x19   : > { %191 = vrot.lane.b32.xlu0 %v120_v2, %s384_s14 }
  0x83   : > { %v194_v3 = vpop.permute.xlu0 %193  ;;  %v123_v4 = vpop.permute.xlu1 %122 }
  0x84   : > { %v199_v5 = vsel %vm124_vm0, %v194_v3, 0  ;;  %v129_v6 = vsel %vm124_vm0, %v123_v4, 0 }
  0x85   : > { %208 = vmatpush.bf16.xpose.msra.mxu2 %v199_v5  ;;  %138 = vmatpush.bf16.xpose.msra.mxu0 %v129_v6 }
  0x8b   : > { %v192_v7 = vpop.permute.xlu0 %191 }
  0x8c   : > { %338 = vmatmul.msk.bf16.vlgmr.msra.gmra.mxu2 %vm124_vm0, %v192_v7  ;;  %336 = vmatmul.msk.bf16.vlgmr.msra.gmra.mxu0 %vm124_vm0, %v120_v2 }
 0x109   : > { %v140_v8 = vpop.f32.mrf.mxu0 }
 0x10a   : > { %v145_v18 = vmul.f32 0.35355338, %v140_v8 }
 0x10c   : > { %v148_v19 = vsel %vm147_vm1, %v145_v18, -inf }
 0x10f   : > { %v210_v9 = vpop.f32.mrf.mxu2 }
 0x110   : > { %v215_v10 = vmul.f32 0.35355338, %v210_v9 }
 0x111   : > { %v142_v11 = vpop.f32.mrf.mxu0 }
 0x112   : > { %v146_v12 = vmul.f32 0.35355338, %v142_v11  ;;  %v217_v13 = vsel %vm147_vm1, %v215_v10, -inf }
 0x113   : > { %218 = vmax.xlane.f32.xlu1 %v217_v13 }
 0x114   : > { %v151_v14 = vsel %vm147_vm1, %v146_v12, -inf }
 0x115   : > { %152 = vmax.xlane.f32.xlu0 %v151_v14 }
 0x117   : > { %v212_v15 = vpop.f32.mrf.mxu2 }
 0x118   : > { %v216_v16 = vmul.f32 0.35355338, %v212_v15 }
 0x11a   : > { %v220_v17 = vsel %vm147_vm1, %v216_v16, -inf }
 0x11b   : > { %221 = vmax.xlane.f32.xlu2 %v220_v17 }
 0x123   : > { %149 = vmax.xlane.f32.xlu2 %v148_v19 }
 0x129   : > { %171 = vrot.lane.b32.xlu0 %v120_v2, %s385_s15 }
 0x186   : > { %v219_v20 = vpop.xlane.xlu1 %218 }
 0x187   : > { %v223_v21 = vsub.f32 %v215_v10, %v219_v20 }
 0x188   : > { %v153_v35 = vpop.xlane.xlu0 %152 }
 0x189   : > { %v225_v22 = vmul.f32 1.442695, %v223_v21  ;;  %v155_v36 = vsub.f32 %v146_v12, %v153_v35 }
 0x18b   : > { %358 = vpow2.f32 %v225_v22  ;;  %v158_v37 = vmul.f32 1.442695, %v155_v36 }
 0x18e   : > { %v222_v23 = vpop.xlane.xlu2 %221 }
 0x18f   : > { %v224_v24 = vsub.f32 %v216_v16, %v222_v23 }
 0x191   : > { %v359_v25 = vpop.eup %358  ;;  %v227_v26 = vmul.f32 1.442695, %v224_v24 }
 0x192   : > { %v229_v27 = vsel %vm147_vm1, %v359_v25, 0.0 }
 0x193   : > { %360 = vpow2.f32 %v227_v26  ;;  %230 = vadd.xlane.f32.xlu2 %v229_v27 }
 0x196   : > { %v150_v28 = vpop.xlane.xlu2 %149 }
 0x197   : > { %v154_v29 = vsub.f32 %v145_v18, %v150_v28 }
 0x199   : > { %v361_v30 = vpop.eup %360  ;;  %v156_v31 = vmul.f32 1.442695, %v154_v29 }
 0x19a   : > { %v232_v32 = vsel %vm147_vm1, %v361_v30, 0.0 }
 0x19b   : > { %362 = vpow2.f32 %v156_v31  ;;  %233 = vadd.xlane.f32.xlu2 %v232_v32  ;;  %v172_v48 = vpop.permute.xlu0 %171 }
 0x19c   : > { %364 = vpow2.f32 %v158_v37  ;;  %184 = vmatpush.bf16.msra.mxu1 %v172_v48 }
 0x1a1   : > { %v363_v33 = vpop.eup %362 }
 0x1a2   : > { %v160_v34 = vsel %vm147_vm1, %v363_v33, 0.0  ;;  %v365_v38 = vpop.eup %364 }
 0x1a3   : > { %161 = vadd.xlane.f32.xlu1 %v160_v34  ;;  %v163_v39 = vsel %vm147_vm1, %v365_v38, 0.0 }
 0x1b3   : > { %240 = vrot.lane.b32.xlu2 %v120_v2, %s386_s16 }
 0x1dc   : > { %164 = vadd.xlane.f32.xlu2 %v163_v39 }
 0x206   : > { %v231_v40 = vpop.xlane.xlu2 %230 }
 0x207   : > { %366 = vrcp.f32 %v231_v40 }
 0x20d   : > { %v367_v42 = vpop.eup %366 }
 0x20e   : > { %v234_v41 = vpop.xlane.xlu2 %233  ;;  %v237_v45 = vmul.f32 %v367_v42, %v359_v25 }
 0x20f   : > { %368 = vrcp.f32 %v234_v41 }
 0x215   : > { %v369_v43 = vpop.eup %368 }
 0x216   : > { %v241_v44 = vpop.permute.xlu2 %240  ;;  %v238_v46 = vmul.f32 %v369_v43, %v361_v30  ;;  %v162_v49 = vpop.xlane.xlu1 %161 }
 0x217   : > { %253 = vmatpush.bf16.msra.mxu3 %v241_v44  ;;  %370 = vrcp.f32 %v162_v49 }
 0x218   : > { %v239_v47 = vpack.c.bf16 %v238_v46, %v237_v45 }
 0x21a   : > { %339 = vmatmul.msk.bf16.vlgmr.msra.gmra.mxu3 %vm147_vm1, %v239_v47 }
 0x21d   : > { %v371_v51 = vpop.eup %370 }
 0x21e   : > { %v168_v53 = vmul.f32 %v371_v51, %v363_v33 }
 0x24f   : > { %v165_v50 = vpop.xlane.xlu2 %164 }
 0x250   : > { %372 = vrcp.f32 %v165_v50 }
 0x256   : > { %v373_v52 = vpop.eup %372 }
 0x257   : > { %v169_v54 = vmul.f32 %v373_v52, %v365_v38 }
 0x259   : > { %v170_v55 = vpack.c.bf16 %v169_v54, %v168_v53 }
 0x25b   : > { %337 = vmatmul.msk.bf16.vlgmr.msra.gmra.mxu1 %vm147_vm1, %v170_v55 }
 0x29d   : > { %v255_v56 = vpop.f32.mrf.mxu3 }
 0x29e   : > { %262 = vrot.lane.b32.xlu1 %v255_v56, %s387_s17 }
 0x2a5   : > { %v257_v57 = vpop.f32.mrf.mxu3 }
 0x2a6   : > { %264 = vrot.lane.b32.xlu0 %v257_v57, %s387_s17 }
 0x2d8   : > { %v186_v58 = vpop.f32.mrf.mxu1 }
 0x2e0   : > { %v188_v61 = vpop.f32.mrf.mxu1 }
 0x310   : > { %v263_v59 = vpop.permute.xlu1 %262 }
 0x311   : > { %v268_v60 = vsel %vm124_vm0, %v186_v58, %v263_v59 }
 0x312   : > { %270 = vst.msk [vmem:[%s116_s20] sm:$0xff] %vm147_vm1, %v268_v60 }
 0x318   : > { %v265_v62 = vpop.permute.xlu0 %264 }
 0x319   : > { %v269_v63 = vsel %vm124_vm0, %v188_v61, %v265_v62 }
 0x31a   : > { %271 = vst.msk [vmem:[%s116_s20 + $0x8] sm:$0xff] %vm147_vm1, %v269_v63 }
 0x31b PF: > { %s11_s6 = sadd.s32 1, %s380_s6  }
 0x31c   : > { %p8_p4 = scmp.ge.s32.totalorder %s11_s6, 4  }
 0x31e   :  { %10 = sbr.rel (!%p8_p4) target bundleno = 1 (0x1), region = 54 }

// kernel: _lambda_.68
= control target key start
LH: loop header
LB: loop body
LE: loop exit
PB: predicated region body
PF: predicated region fallthrough
CT: control target
= control target key end

     0   :  { %vm35_vm0 = vcmask 130048   ;;  %s184_s1 = inlined_call_operand.vmem [shape: bf16[16,16], index: 1, kind: input, shape index: {}]   ;;  %s185_s0 = inlined_call_operand.vmem [shape: f32[32,16], index: 0, kind: input, shape index: {}]   ;;  %s186_s2 = inlined_call_operand.vmem [shape: f32[1,16], index: 2, kind: input, shape index: {}]   ;;  %s187_s3 = inlined_call_operand.vmem [shape: f32[1,16], index: 3, kind: input, shape index: {}]   ;;  %s188_s4 = inlined_call_operand.vmem [shape: f32[32,16], index: 4, kind: input, shape index: {}]   ;;  %s189_s5 = inlined_call_operand.vmem [shape: f32[32,16], index: 5, kind: output, shape index: {}]  }
   0x1   :  { %v99_v0 = vld [vmem:[%s184_s1] sm:$0xff]  ;;  %v22_v2 = vld [vmem:[%s185_s0 + $0x8] sm:$0xff]  ;;  %v23_v4 = vld [vmem:[%s185_s0 + $0x10] sm:$0xff] }
   0x2   :  { %v21_v1 = vld [vmem:[%s185_s0] sm:$0xff]  ;;  %v24_v5 = vld [vmem:[%s185_s0 + $0x18] sm:$0xff]  ;;  %49 = vmatpush.bf16.msra.mxu0 %v99_v0  ;;  %100 = vmatpush.bf16.msra.mxu1 %v99_v0  ;;  %v79_v14 = vld [vmem:[%s188_s4 + $0x10] sm:$0xff] }
   0x3   :  { %v25_v3 = vpack.c.bf16 %v22_v2, %v21_v1  ;;  %v26_v6 = vpack.c.bf16 %v24_v5, %v23_v4  ;;  %v101_v7 = vld [vmem:[%s186_s2] ss:$0 sm:$0xff]  ;;  %v78_v23 = vld [vmem:[%s188_s4 + $0x8] sm:$0xff]  ;;  %v80_v24 = vld [vmem:[%s188_s4 + $0x18] sm:$0xff] }
   0x4   :  { %v102_v8 = vld [vmem:[%s187_s3] ss:$0 sm:$0xff] }
   0x5   :  { %97 = vmatmul.msk.bf16.vlgmr.msra.gmra.mxu0 %vm35_vm0, %v25_v3  ;;  %98 = vmatmul.msk.bf16.vlgmr.msra.gmra.mxu1 %vm35_vm0, %v26_v6  ;;  %v77_v13 = vld [vmem:[%s188_s4] sm:$0xff] }
  0x82   :  { %v51_v9 = vpop.f32.mrf.mxu0  ;;  %v56_v10 = vpop.f32.mrf.mxu1 }
  0x83   :  { %v65_v11 = vmul.f32 %v101_v7, %v51_v9  ;;  %v67_v12 = vmul.f32 %v101_v7, %v56_v10 }
  0x85   :  { %v73_v15 = vadd.f32 %v102_v8, %v65_v11  ;;  %v75_v16 = vadd.f32 %v102_v8, %v67_v12 }
  0x87   :  { %v81_v17 = vadd.f32 %v77_v13, %v73_v15  ;;  %v83_v18 = vadd.f32 %v79_v14, %v75_v16 }
  0x89   :  { %85 = vst.msk [vmem:[%s189_s5] sm:$0xff] %vm35_vm0, %v81_v17 }
  0x8a   :  { %87 = vst.msk [vmem:[%s189_s5 + $0x10] sm:$0xff] %vm35_vm0, %v83_v18  ;;  %v53_v19 = vpop.f32.mrf.mxu0  ;;  %v58_v20 = vpop.f32.mrf.mxu1 }
  0x8b   :  { %v66_v21 = vmul.f32 %v101_v7, %v53_v19  ;;  %v68_v22 = vmul.f32 %v101_v7, %v58_v20 }
  0x8d   :  { %v74_v25 = vadd.f32 %v102_v8, %v66_v21  ;;  %v76_v26 = vadd.f32 %v102_v8, %v68_v22 }
  0x8f   :  { %v82_v27 = vadd.f32 %v78_v23, %v74_v25  ;;  %v84_v28 = vadd.f32 %v80_v24, %v76_v26 }
  0x91   :  { %86 = vst.msk [vmem:[%s189_s5 + $0x8] sm:$0xff] %vm35_vm0, %v82_v27 }
  0x92   :  { %88 = vst.msk [vmem:[%s189_s5 + $0x18] sm:$0xff] %vm35_vm0, %v84_v28 }

// kernel: _lambda_.74
= control target key start
LH: loop header
LB: loop body
LE: loop exit
PB: predicated region body
PF: predicated region fallthrough
CT: control target
= control target key end

     0   :  { %v371_v0 = vmov 0   ;;  %vm116_vm0 = vcmask 130048   ;;  %vm334_vm6 = vcmask 523264   ;;  %s575_s4 = inlined_call_operand.vmem [shape: f32[32,1], index: 4, kind: input, shape index: {}]   ;;  %s576_s5 = inlined_call_operand.vmem [shape: f32[32,1], index: 5, kind: input, shape index: {}]   ;;  %s577_s2 = inlined_call_operand.vmem [shape: f32[1,16], index: 2, kind: input, shape index: {}]   ;;  %s578_s3 = inlined_call_operand.vmem [shape: f32[1,16], index: 3, kind: input, shape index: {}]   ;;  %s579_s6 = inlined_call_operand.vmem [shape: f32[1,64], index: 6, kind: input, shape index: {}]   ;;  %s580_s7 = inlined_call_operand.vmem [shape: f32[1,64], index: 7, kind: input, shape index: {}]   ;;  %s581_s1 = inlined_call_operand.vmem [shape: bf16[16,64], index: 1, kind: input, shape index: {}]   ;;  %s582_s0 = inlined_call_operand.vmem [shape: f32[32,16], index: 0, kind: input, shape index: {}]   ;;  %s583_s8 = inlined_call_operand.vmem [shape: f32[32,64], index: 8, kind: output, shape index: {}]  }
   0x1   :  { %357 = vset.pattern.permute.xlu1 %v371_v0  ;;  %356 = vset.pattern.permute.xlu0 %v371_v0  ;;  %v36_v1 = vld [vmem:[%s575_s4 + $0x10] sm:$0xff]  ;;  %v34_v2 = vld [vmem:[%s575_s4] sm:$0xff]  ;;  %v37_v4 = vld [vmem:[%s575_s4 + $0x18] sm:$0xff] }
   0x2   :  { %50 = vperm.xlu1 %357, %v36_v1   ;;  %40 = vperm.xlu0 %356, %v34_v2   ;;  %v62_v3 = vld [vmem:[%s576_s5] sm:$0xff]  ;;  %v35_v5 = vld [vmem:[%s575_s4 + $0x8] sm:$0xff]  ;;  %v65_v7 = vld [vmem:[%s576_s5 + $0x18] sm:$0xff] }
   0x3   :  { %358 = vset.pattern.permute.xlu2 %v371_v0  ;;  %v63_v6 = vld [vmem:[%s576_s5 + $0x8] sm:$0xff]  ;;  %v64_v8 = vld [vmem:[%s576_s5 + $0x10] sm:$0xff]  ;;  %v353_v9 = vld [vmem:[%s581_s1] sm:$0xff] }
   0x4   :  { %68 = vperm.xlu2 %358, %v62_v3   ;;  %130 = vmatpush.bf16.msra.mxu0 %v353_v9  ;;  %v30_v13 = vld [vmem:[%s582_s0] sm:$0xff]  ;;  %v31_v15 = vld [vmem:[%s582_s0 + $0x8] sm:$0xff]  ;;  %v32_v25 = vld [vmem:[%s582_s0 + $0x10] sm:$0xff] }
   0x5   :  { %354 = vmatpush.bf16.msra.mxu1 %v353_v9  ;;  %v359_v17 = vld [vmem:[%s577_s2] ss:$0 sm:$0xff]  ;;  %v33_v26 = vld [vmem:[%s582_s0 + $0x18] sm:$0xff] }
   0x6   :  { %v360_v24 = vld [vmem:[%s578_s3] ss:$0 sm:$0xff] }
   0x7   :  { %v361_v42 = vld [vmem:[%s579_s6] ss:$0 sm:$0xff] }
   0x8   :  { %v362_v43 = vld [vmem:[%s580_s7] ss:$0 sm:$0xff] }
   0xa   :  { %55 = vperm.xlu1 %357, %v37_v4   ;;  %45 = vperm.xlu0 %356, %v35_v5  }
   0xc   :  { %73 = vperm.xlu2 %358, %v63_v6  }
  0x12   :  { %83 = vperm.xlu1 %357, %v65_v7   ;;  %78 = vperm.xlu0 %356, %v64_v8  }
  0x5e   :  { %v69_v10 = vpop.permute.xlu2 %68 }
  0x66   :  { %v74_v21 = vpop.permute.xlu2 %73 }
  0x74   :  { %v51_v11 = vpop.permute.xlu1 %50  ;;  %v41_v12 = vpop.permute.xlu0 %40 }
  0x75   :  { %v58_v14 = vsub.f32 %v30_v13, %v41_v12  ;;  %v60_v28 = vsub.f32 %v32_v25, %v51_v11 }
  0x77   :  { %v86_v16 = vmul.f32 %v69_v10, %v58_v14 }
  0x79   :  { %v94_v22 = vmul.f32 %v359_v17, %v86_v16 }
  0x7b   :  { %v102_v30 = vadd.f32 %v360_v24, %v94_v22 }
  0x7c   :  { %v56_v18 = vpop.permute.xlu1 %55  ;;  %v46_v19 = vpop.permute.xlu0 %45 }
  0x7d   :  { %v59_v20 = vsub.f32 %v31_v15, %v46_v19  ;;  %v61_v29 = vsub.f32 %v33_v26, %v56_v18 }
  0x7f   :  { %v87_v23 = vmul.f32 %v74_v21, %v59_v20 }
  0x81   :  { %v95_v27 = vmul.f32 %v359_v17, %v87_v23 }
  0x83   :  { %v103_v31 = vadd.f32 %v360_v24, %v95_v27 }
  0x84   :  { %v84_v32 = vpop.permute.xlu1 %83  ;;  %v79_v33 = vpop.permute.xlu0 %78 }
  0x85   :  { %v89_v34 = vmul.f32 %v84_v32, %v61_v29  ;;  %v88_v35 = vmul.f32 %v79_v33, %v60_v28  ;;  %v106_v36 = vpack.c.bf16 %v103_v31, %v102_v30 }
  0x87   :  { %v97_v37 = vmul.f32 %v359_v17, %v89_v34  ;;  %v96_v38 = vmul.f32 %v359_v17, %v88_v35  ;;  %347 = vmatmul.msk.bf16.vlgmr.msra.gmra.mxu0 %vm116_vm0, %v106_v36 }
  0x89   :  { %v105_v39 = vadd.f32 %v360_v24, %v97_v37  ;;  %v104_v40 = vadd.f32 %v360_v24, %v96_v38 }
  0x8b   :  { %v107_v41 = vpack.c.bf16 %v105_v39, %v104_v40 }
  0x8d   :  { %348 = vmatmul.msk.bf16.vlgmr.msra.gmra.mxu1 %vm116_vm0, %v107_v41 }
 0x104   :  { %v132_v44 = vpop.f32.mrf.mxu0 }
 0x105   :  { %v146_v45 = vmul.f32 %v361_v42, %v132_v44 }
 0x107   :  { %v468_v46 = vadd.f32 %v362_v43, %v146_v45 }
 0x109   :  { %v471_v47 = vmul.f32 0.70710677, %v468_v46 }
 0x10a   :  { %v137_v48 = vpop.f32.mrf.mxu1 }
 0x10b   :  { %v166_v49 = vmul.f32 %v471_v47, %v471_v47  ;;  %v148_v50 = vmul.f32 %v361_v42, %v137_v48 }
 0x10c   :  { %v134_v51 = vpop.f32.mrf.mxu0 }
 0x10d   :  { %v475_v52 = vmin.f32 %v166_v49, 16.0  ;;  %v477_v53 = vadd.f32 %v362_v43, %v148_v50  ;;  %v147_v54 = vmul.f32 %v361_v42, %v134_v51 }
 0x10f   :  { %v168_v55 = vmul.f32 2.1237322e-06, %v475_v52  ;;  %v179_v56 = vmul.f32 3.8918573e-05, %v475_v52  ;;  %v481_v57 = vadd.f32 %v362_v43, %v147_v54  ;;  %v484_v58 = vmul.f32 0.70710677, %v477_v53 }
 0x111   :  { %v169_v59 = vadd.f32 0.00028619796, %v168_v55  ;;  %v180_v60 = vadd.f32 0.001143296, %v179_v56  ;;  %v246_v61 = vmul.f32 %v484_v58, %v484_v58  ;;  %v489_v62 = vmul.f32 0.70710677, %v481_v57 }
 0x112   :  { %v139_v63 = vpop.f32.mrf.mxu1 }
 0x113   :  { %v170_v0 = vmul.f32 %v169_v59, %v475_v52  ;;  %v181_v1 = vmul.f32 %v180_v60, %v475_v52  ;;  %v149_v2 = vmul.f32 %v361_v42, %v139_v63  ;;  %v493_v3 = vmin.f32 %v246_v61, 16.0 }
 0x114   :  { %v206_v4 = vmul.f32 %v489_v62, %v489_v62 }
 0x115   :  { %v171_v5 = vadd.f32 0.0036580483, %v170_v0  ;;  %v182_v6 = vadd.f32 0.014752088, %v181_v1  ;;  %v497_v7 = vadd.f32 %v362_v43, %v149_v2  ;;  %v248_v8 = vmul.f32 2.1237322e-06, %v493_v3 }
 0x116   :  { %v259_v9 = vmul.f32 3.8918573e-05, %v493_v3  ;;  %v501_v10 = vmin.f32 %v206_v4, 16.0 }
 0x117   :  { %v172_v11 = vmul.f32 %v171_v5, %v475_v52  ;;  %v183_v12 = vmul.f32 %v182_v6, %v475_v52  ;;  %v506_v13 = vmul.f32 0.70710677, %v497_v7  ;;  %v249_v14 = vadd.f32 0.00028619796, %v248_v8 }
 0x118   :  { %v260_v15 = vadd.f32 0.001143296, %v259_v9  ;;  %v208_v16 = vmul.f32 2.1237322e-06, %v501_v10  ;;  %v219_v18 = vmul.f32 3.8918573e-05, %v501_v10 }
 0x119   :  { %v184_v17 = vadd.f32 0.112945676, %v183_v12  ;;  %v286_v19 = vmul.f32 %v506_v13, %v506_v13  ;;  %v250_v20 = vmul.f32 %v249_v14, %v493_v3  ;;  %v173_v23 = vadd.f32 0.05243302, %v172_v11 }
 0x11a   :  { %v261_v21 = vmul.f32 %v260_v15, %v493_v3  ;;  %v209_v22 = vadd.f32 0.00028619796, %v208_v16  ;;  %v220_v25 = vadd.f32 0.001143296, %v219_v18 }
 0x11b   :  { %v185_v24 = vmul.f32 %v184_v17, %v475_v52  ;;  %v515_v26 = vmin.f32 %v286_v19, 16.0  ;;  %v251_v27 = vadd.f32 0.0036580483, %v250_v20  ;;  %v174_v35 = vmul.f32 %v173_v23, %v475_v52 }
 0x11c   :  { %v262_v28 = vadd.f32 0.014752088, %v261_v21  ;;  %v210_v30 = vmul.f32 %v209_v22, %v501_v10  ;;  %v221_v31 = vmul.f32 %v220_v25, %v501_v10 }
 0x11d   :  { %v186_v29 = vadd.f32 0.4994258, %v185_v24  ;;  %v288_v32 = vmul.f32 2.1237322e-06, %v515_v26  ;;  %v299_v34 = vmul.f32 3.8918573e-05, %v515_v26  ;;  %v252_v38 = vmul.f32 %v251_v27, %v493_v3 }
 0x11e   :  { %v263_v33 = vmul.f32 %v262_v28, %v493_v3  ;;  %v222_v37 = vadd.f32 0.014752088, %v221_v31  ;;  %v211_v42 = vadd.f32 0.0036580483, %v210_v30  ;;  %v175_v48 = vadd.f32 0.18741608, %v174_v35 }
 0x11f   :  { %v187_v36 = vmul.f32 %v186_v29, %v475_v52  ;;  %v300_v40 = vadd.f32 0.001143296, %v299_v34  ;;  %v289_v44 = vadd.f32 0.00028619796, %v288_v32  ;;  %v253_v50 = vadd.f32 0.05243302, %v252_v38 }
 0x120   :  { %v264_v39 = vadd.f32 0.112945676, %v263_v33  ;;  %v223_v43 = vmul.f32 %v222_v37, %v501_v10  ;;  %v212_v54 = vmul.f32 %v211_v42, %v501_v10  ;;  %v176_v60 = vmul.f32 %v175_v48, %v475_v52 }
 0x121   :  { %v188_v41 = vadd.f32 1.0, %v187_v36  ;;  %v301_v49 = vmul.f32 %v300_v40, %v515_v26  ;;  %v290_v56 = vmul.f32 %v289_v44, %v515_v26  ;;  %v254_v0 = vmul.f32 %v253_v50, %v493_v3 }
 0x122   :  { %v265_v45 = vmul.f32 %v264_v39, %v493_v3  ;;  %v224_v55 = vadd.f32 0.112945676, %v223_v43  ;;  %v213_v4 = vadd.f32 0.05243302, %v212_v54  ;;  %v177_v11 = vadd.f32 1.1283791, %v176_v60 }
 0x123   :  { %363 = vrcp.f32 %v188_v41  ;;  %v302_v63 = vadd.f32 0.014752088, %v301_v49  ;;  %v291_v6 = vadd.f32 0.0036580483, %v290_v56  ;;  %v255_v14 = vadd.f32 0.18741608, %v254_v0 }
 0x124   :  { %v266_v51 = vadd.f32 0.4994258, %v265_v45  ;;  %v225_v61 = vmul.f32 %v224_v55, %v501_v10  ;;  %v198_v16 = vand.u32 2147483647, %v188_v41  ;;  %v200_v17 = vand.u32 2147483648, %v188_v41 }
 0x125   :  { %v303_v8 = vmul.f32 %v302_v63, %v515_v26  ;;  %v214_v18 = vmul.f32 %v213_v4, %v501_v10  ;;  %v292_v19 = vmul.f32 %v291_v6, %v515_v26  ;;  %vm194_vm2 = vweird.f32 %v188_v41 }
 0x126   :  { %v267_v59 = vmul.f32 %v266_v51, %v493_v3  ;;  %v226_v5 = vadd.f32 0.4994258, %v225_v61  ;;  %v256_v25 = vmul.f32 %v255_v14, %v493_v3  ;;  %v178_v27 = vmul.f32 %v177_v11, %v471_v47 }
 0x127   :  { %v304_v52 = vadd.f32 0.112945676, %v303_v8  ;;  %v201_v28 = vor.u32 1.1754944e-38, %v200_v17  ;;  %v215_v30 = vadd.f32 0.18741608, %v214_v18  ;;  %vm199_vm4 = vcmp.eq.f32.partialorder %v198_v16, 8.507059e+37 }
 0x128   :  { %v268_v1 = vadd.f32 1.0, %v267_v59  ;;  %v227_v15 = vmul.f32 %v226_v5, %v501_v10  ;;  %v293_v32 = vadd.f32 0.05243302, %v292_v19  ;;  %v257_v37 = vadd.f32 1.1283791, %v256_v25 }
 0x129   :  { %v364_v2 = vpop.eup %363  ;;  %v305_v22 = vmul.f32 %v304_v52, %v515_v26  ;;  %v216_v47 = vmul.f32 %v215_v30, %v501_v10  ;;  %v158_v42 = vmul.f32 0.5, %v468_v46  ;;  %v160_v5 = vmul.f32 0.5, %v477_v53 }
 0x12a   :  { %v190_v9 = vmul.f32 %v364_v2, %v188_v41  ;;  %365 = vrcp.f32 %v268_v1  ;;  %vm195_vm1 = vweird.f32 %v364_v2  ;;  %v538_v21 = vadd.f32 1.0, %v227_v15 }
 0x12b   :  { %vm196_vm3 = vmor %vm194_vm2, %vm195_vm1  ;;  %v306_v33 = vadd.f32 0.4994258, %v305_v22  ;;  %v280_v38 = vand.u32 2147483648, %v268_v1  ;;  %v278_v40 = vand.u32 2147483647, %v268_v1  ;;  %v294_v44 = vmul.f32 %v293_v32, %v515_v26 }
 0x12c   :  { %v191_v12 = vsub.f32 1.0, %v190_v9  ;;  %367 = vrcp.f32 %v538_v21  ;;  %vm274_vm7 = vweird.f32 %v268_v1  ;;  %v258_v51 = vmul.f32 %v257_v37, %v484_v58 }
 0x12d   :  { %v307_v39 = vmul.f32 %v306_v33, %v515_v26  ;;  %v281_v54 = vor.u32 1.1754944e-38, %v280_v38  ;;  %vm279_vm9 = vcmp.eq.f32.partialorder %v278_v40, 8.507059e+37  ;;  %v217_v10 = vadd.f32 1.1283791, %v216_v47 }
 0x12e   :  { %v192_v20 = vmul.f32 %v364_v2, %v191_v12  ;;  %v240_v60 = vand.u32 2147483648, %v538_v21  ;;  %v295_v61 = vadd.f32 0.18741608, %v294_v44  ;;  %vm234_vm11 = vweird.f32 %v538_v21 }
 0x12f   :  { %v308_v45 = vadd.f32 1.0, %v307_v39  ;;  %v218_v6 = vmul.f32 %v217_v10, %v489_v62 }
 0x130   :  { %v366_v23 = vpop.eup %365  ;;  %v193_v24 = vadd.f32 %v364_v2, %v192_v20  ;;  %v241_v8 = vor.u32 1.1754944e-38, %v240_v60  ;;  %v296_v9 = vmul.f32 %v295_v61, %v515_v26  ;;  %v159_v26 = vmul.f32 0.5, %v481_v57 }
 0x131   :  { %v270_v29 = vmul.f32 %v366_v23, %v268_v1  ;;  %vm275_vm5 = vweird.f32 %v366_v23  ;;  %369 = vrcp.f32 %v308_v45  ;;  %v238_v1 = vand.u32 2147483647, %v538_v21 }
 0x132   :  { %v197_v31 = vsel %vm196_vm3, %v364_v2, %v193_v24  ;;  %v368_v41 = vpop.eup %367  ;;  %vm276_vm8 = vmor %vm274_vm7, %vm275_vm5  ;;  %v297_v18 = vadd.f32 1.1283791, %v296_v9  ;;  %v320_v19 = vand.u32 2147483648, %v308_v45  ;;  %v318_v20 = vand.u32 2147483647, %v308_v45 }
 0x133   :  { %v202_v34 = vsel %vm199_vm4, %v201_v28, %v197_v31  ;;  %v271_v35 = vsub.f32 1.0, %v270_v29  ;;  %v230_v49 = vmul.f32 %v368_v41, %v538_v21  ;;  %vm235_vm10 = vweird.f32 %v368_v41 }
 0x134   :  { %v203_v36 = vmul.f32 %v202_v34, %v178_v27  ;;  %vm236_vm12 = vmor %vm234_vm11, %vm235_vm10  ;;  %vm239_vm13 = vcmp.eq.f32.partialorder %v238_v1, 8.507059e+37  ;;  %vm314_vm15 = vweird.f32 %v308_v45  ;;  %v298_v25 = vmul.f32 %v297_v18, %v506_v13 }
 0x135   :  { %v272_v3 = vmul.f32 %v366_v23, %v271_v35  ;;  %v231_v56 = vsub.f32 1.0, %v230_v49  ;;  %vm319_vm1 = vcmp.eq.f32.partialorder %v318_v20, 8.507059e+37  ;;  %v161_v57 = vmul.f32 0.5, %v497_v7 }
 0x136   :  { %v349_v43 = vclamps-f32 %v203_v36, 1.0 }
 0x137   :  { %v273_v48 = vadd.f32 %v366_v23, %v272_v3  ;;  %v232_v0 = vmul.f32 %v368_v41, %v231_v56  ;;  %v370_v4 = vpop.eup %369 }
 0x138   :  { %v326_v50 = vadd.f32 1.0, %v349_v43  ;;  %v310_v14 = vmul.f32 %v370_v4, %v308_v45  ;;  %vm315_vm14 = vweird.f32 %v370_v4 }
 0x139   :  { %v277_v55 = vsel %vm276_vm8, %v366_v23, %v273_v48  ;;  %v233_v2 = vadd.f32 %v368_v41, %v232_v0  ;;  %vm316_vm0 = vmor %vm314_vm15, %vm315_vm14  ;;  %v321_v23 = vor.u32 1.1754944e-38, %v320_v19 }
 0x13a   :  { %v330_v46 = vmul.f32 %v326_v50, %v158_v42  ;;  %v282_v59 = vsel %vm279_vm9, %v281_v54, %v277_v55  ;;  %v311_v17 = vsub.f32 1.0, %v310_v14 }
 0x13b   :  { %v283_v63 = vmul.f32 %v282_v59, %v258_v51  ;;  %v237_v12 = vsel %vm236_vm12, %v368_v41, %v233_v2 }
 0x13c   :  { %335 = vst.msk [vmem:[%s583_s8] sm:$0xff] %vm334_vm6, %v330_v46  ;;  %v242_v15 = vsel %vm239_vm13, %v241_v8, %v237_v12  ;;  %v312_v62 = vmul.f32 %v370_v4, %v311_v17 }
 0x13d   :  { %v351_v58 = vclamps-f32 %v283_v63, 1.0  ;;  %v243_v16 = vmul.f32 %v242_v15, %v218_v6 }
 0x13e   :  { %v313_v22 = vadd.f32 %v370_v4, %v312_v62 }
 0x13f   :  { %v328_v11 = vadd.f32 1.0, %v351_v58  ;;  %v350_v53 = vclamps-f32 %v243_v16, 1.0 }
 0x140   :  { %v317_v27 = vsel %vm316_vm0, %v370_v4, %v313_v22 }
 0x141   :  { %v332_v52 = vmul.f32 %v328_v11, %v160_v5  ;;  %v327_v21 = vadd.f32 1.0, %v350_v53  ;;  %v322_v28 = vsel %vm319_vm1, %v321_v23, %v317_v27 }
 0x142   :  { %v323_v29 = vmul.f32 %v322_v28, %v298_v25 }
 0x143   :  { %337 = vst.msk [vmem:[%s583_s8 + $0x10] sm:$0xff] %vm334_vm6, %v332_v52  ;;  %v331_v24 = vmul.f32 %v327_v21, %v159_v26 }
 0x144   :  { %v352_v30 = vclamps-f32 %v323_v29, 1.0 }
 0x145   :  { %336 = vst.msk [vmem:[%s583_s8 + $0x8] sm:$0xff] %vm334_vm6, %v331_v24 }
 0x146   :  { %v329_v31 = vadd.f32 1.0, %v352_v30 }
 0x148   :  { %v333_v32 = vmul.f32 %v329_v31, %v161_v57 }
 0x14a   :  { %338 = vst.msk [vmem:[%s583_s8 + $0x18] sm:$0xff] %vm334_vm6, %v333_v32 }

// kernel: _lambda_.75
= control target key start
LH: loop header
LB: loop body
LE: loop exit
PB: predicated region body
PF: predicated region fallthrough
CT: control target
= control target key end

     0   :  { %vm59_vm0 = vcmask 523264   ;;  %vm109_vm1 = vcmask 130048   ;;  %s234_s1 = inlined_call_operand.vmem [shape: bf16[64,16], index: 1, kind: input, shape index: {}]   ;;  %s235_s2 = inlined_call_operand.vmem [shape: f32[1,16], index: 2, kind: input, shape index: {}]   ;;  %s236_s3 = inlined_call_operand.vmem [shape: f32[1,16], index: 3, kind: input, shape index: {}]   ;;  %s237_s0 = inlined_call_operand.vmem [shape: f32[32,64], index: 0, kind: input, shape index: {}]   ;;  %s238_s4 = inlined_call_operand.vmem [shape: f32[32,16], index: 4, kind: input, shape index: {}]   ;;  %s239_s5 = inlined_call_operand.vmem [shape: f32[32,16], index: 5, kind: output, shape index: {}]  }
   0x1   :  { %v139_v0 = vld [vmem:[%s234_s1 + $0x18] sm:$0xff]  ;;  %v138_v1 = vld [vmem:[%s234_s1 + $0x10] sm:$0xff]  ;;  %v137_v2 = vld [vmem:[%s234_s1 + $0x8] sm:$0xff] }
   0x2   :  { %70 = vmatpush.bf16.msra.mxu0 %v139_v0  ;;  %140 = vmatpush.bf16.msra.mxu1 %v139_v0  ;;  %v136_v3 = vld [vmem:[%s234_s1] sm:$0xff]  ;;  %v22_v5 = vld [vmem:[%s237_s0 + $0x8] sm:$0xff]  ;;  %v23_v6 = vld [vmem:[%s237_s0 + $0x10] sm:$0xff] }
   0x3   :  { %v21_v4 = vld [vmem:[%s237_s0] sm:$0xff]  ;;  %v24_v7 = vld [vmem:[%s237_s0 + $0x18] sm:$0xff]  ;;  %v103_v17 = vld [vmem:[%s238_s4 + $0x10] sm:$0xff] }
   0x4   :  { %v25_v8 = vpack.c.bf16 %v22_v5, %v21_v4  ;;  %v26_v9 = vpack.c.bf16 %v24_v7, %v23_v6  ;;  %v144_v10 = vld [vmem:[%s235_s2] ss:$0 sm:$0xff]  ;;  %v102_v26 = vld [vmem:[%s238_s4 + $0x8] sm:$0xff]  ;;  %v104_v27 = vld [vmem:[%s238_s4 + $0x18] sm:$0xff] }
   0x5   :  { %v145_v11 = vld [vmem:[%s236_s3] ss:$0 sm:$0xff] }
   0x6   :  { %71 = vmatpush.bf16.msra.mxu0 %v138_v1  ;;  %141 = vmatpush.bf16.msra.mxu1 %v138_v1  ;;  %v101_v16 = vld [vmem:[%s238_s4] sm:$0xff] }
   0xa   :  { %72 = vmatpush.bf16.msra.mxu0 %v137_v2  ;;  %142 = vmatpush.bf16.msra.mxu1 %v137_v2 }
   0xe   :  { %73 = vmatpush.bf16.msra.mxu0 %v136_v3  ;;  %143 = vmatpush.bf16.msra.mxu1 %v136_v3 }
  0x11   :  { %134 = vmatmul.msk.bf16.vlgmr.msra.gmra.mxu0 %vm59_vm0, %v25_v8  ;;  %135 = vmatmul.msk.bf16.vlgmr.msra.gmra.mxu1 %vm59_vm0, %v26_v9 }
  0x8e   :  { %v75_v12 = vpop.f32.mrf.mxu0  ;;  %v80_v13 = vpop.f32.mrf.mxu1 }
  0x8f   :  { %v89_v14 = vmul.f32 %v144_v10, %v75_v12  ;;  %v91_v15 = vmul.f32 %v144_v10, %v80_v13 }
  0x91   :  { %v97_v18 = vadd.f32 %v145_v11, %v89_v14  ;;  %v99_v19 = vadd.f32 %v145_v11, %v91_v15 }
  0x93   :  { %v105_v20 = vadd.f32 %v101_v16, %v97_v18  ;;  %v107_v21 = vadd.f32 %v103_v17, %v99_v19 }
  0x95   :  { %110 = vst.msk [vmem:[%s239_s5] sm:$0xff] %vm109_vm1, %v105_v20 }
  0x96   :  { %112 = vst.msk [vmem:[%s239_s5 + $0x10] sm:$0xff] %vm109_vm1, %v107_v21  ;;  %v77_v22 = vpop.f32.mrf.mxu0  ;;  %v82_v23 = vpop.f32.mrf.mxu1 }
  0x97   :  { %v90_v24 = vmul.f32 %v144_v10, %v77_v22  ;;  %v92_v25 = vmul.f32 %v144_v10, %v82_v23 }
  0x99   :  { %v98_v28 = vadd.f32 %v145_v11, %v90_v24  ;;  %v100_v29 = vadd.f32 %v145_v11, %v92_v25 }
  0x9b   :  { %v106_v30 = vadd.f32 %v102_v26, %v98_v28  ;;  %v108_v31 = vadd.f32 %v104_v27, %v100_v29 }
  0x9d   :  { %111 = vst.msk [vmem:[%s239_s5 + $0x8] sm:$0xff] %vm109_vm1, %v106_v30 }
  0x9e   :  { %113 = vst.msk [vmem:[%s239_s5 + $0x18] sm:$0xff] %vm109_vm1, %v108_v31 }

// kernel: _lambda_.87
= control target key start
LH: loop header
LB: loop body
LE: loop exit
PB: predicated region body
PF: predicated region fallthrough
CT: control target
= control target key end

     0   :  { %vm68_vm0 = vcmask 1043456   ;;  %vm43_vm1 = vcmask 64512   ;;  %vm177_vm2 = vcmask 130048   ;;  %s401_s1 = inlined_call_operand.vmem [shape: bf16[8,16], index: 1, kind: input, shape index: {}]   ;;  %s402_s0 = inlined_call_operand.vmem [shape: f32[128,8], index: 0, kind: input, shape index: {}]   ;;  %s403_s2 = inlined_call_operand.vmem [shape: f32[1,16], index: 2, kind: input, shape index: {}]   ;;  %s404_s3 = inlined_call_operand.vmem [shape: f32[1,16], index: 3, kind: input, shape index: {}]   ;;  %s405_s4 = inlined_call_operand.vmem [shape: f32[128,16], index: 4, kind: output, shape index: {}]  }
   0x1   :  { %v42_v0 = vld [vmem:[%s401_s1] sm:$0xf]  ;;  %v19_v2 = vld [vmem:[%s402_s0 + $0x8] sm:$0xff]  ;;  %v20_v14 = vld [vmem:[%s402_s0 + $0x10] sm:$0xff] }
   0x2   :  { %v18_v1 = vld [vmem:[%s402_s0] sm:$0xff]  ;;  %v70_v3 = vsel %vm68_vm0, %v42_v0, 0  ;;  %v23_v6 = vld [vmem:[%s402_s0 + $0x28] sm:$0xff]  ;;  %v21_v15 = vld [vmem:[%s402_s0 + $0x18] sm:$0xff] }
   0x3   :  { %v34_v4 = vpack.c.bf16 %v19_v2, %v18_v1  ;;  %v22_v5 = vld [vmem:[%s402_s0 + $0x20] sm:$0xff]  ;;  %79 = vmatpush.bf16.msra.mxu0 %v70_v3  ;;  %206 = vmatpush.bf16.msra.mxu1 %v70_v3  ;;  %v27_v9 = vld [vmem:[%s402_s0 + $0x48] sm:$0xff]  ;;  %v24_v16 = vld [vmem:[%s402_s0 + $0x30] sm:$0xff]  ;;  %v35_v22 = vpack.c.bf16 %v21_v15, %v20_v14 }
   0x4   :  { %v26_v7 = vld [vmem:[%s402_s0 + $0x40] sm:$0xff]  ;;  %v36_v8 = vpack.c.bf16 %v23_v6, %v22_v5  ;;  %v31_v11 = vld [vmem:[%s402_s0 + $0x68] sm:$0xff]  ;;  %207 = vmatpush.bf16.msra.mxu2 %v70_v3  ;;  %208 = vmatpush.bf16.msra.mxu3 %v70_v3  ;;  %v25_v17 = vld [vmem:[%s402_s0 + $0x38] sm:$0xff] }
   0x5   :  { %v30_v10 = vld [vmem:[%s402_s0 + $0x60] sm:$0xff]  ;;  %v38_v12 = vpack.c.bf16 %v27_v9, %v26_v7  ;;  %v28_v18 = vld [vmem:[%s402_s0 + $0x50] sm:$0xff]  ;;  %v29_v19 = vld [vmem:[%s402_s0 + $0x58] sm:$0xff]  ;;  %v37_v23 = vpack.c.bf16 %v25_v17, %v24_v16 }
   0x6   :  { %v40_v13 = vpack.c.bf16 %v31_v11, %v30_v10  ;;  %198 = vmatmul.msk.bf16.vlgmr.msra.gmra.mxu0 %vm43_vm1, %v34_v4  ;;  %200 = vmatmul.msk.bf16.vlgmr.msra.gmra.mxu1 %vm43_vm1, %v36_v8  ;;  %v32_v20 = vld [vmem:[%s402_s0 + $0x70] sm:$0xff]  ;;  %v33_v21 = vld [vmem:[%s402_s0 + $0x78] sm:$0xff]  ;;  %v39_v24 = vpack.c.bf16 %v29_v19, %v28_v18  ;;  %v298_v26 = vld [vmem:[%s403_s2] ss:$0 sm:$0xff] }
   0x7   :  { %202 = vmatmul.msk.bf16.vlgmr.msra.gmra.mxu2 %vm43_vm1, %v38_v12  ;;  %v41_v25 = vpack.c.bf16 %v33_v21, %v32_v20  ;;  %v303_v27 = vld [vmem:[%s404_s3] ss:$0 sm:$0xff] }
   0x8   :  { %204 = vmatmul.msk.bf16.vlgmr.msra.gmra.mxu3 %vm43_vm1, %v40_v13 }
  0x16   :  { %199 = vmatmul.msk.bf16.gmra.mxu0 %vm43_vm1, %v35_v22  ;;  %201 = vmatmul.msk.bf16.gmra.mxu1 %vm43_vm1, %v37_v23 }
  0x17   :  { %203 = vmatmul.msk.bf16.gmra.mxu2 %vm43_vm1, %v39_v24 }
  0x18   :  { %205 = vmatmul.msk.bf16.gmra.mxu3 %vm43_vm1, %v41_v25 }
  0x83   :  { %v81_v28 = vpop.f32.mrf.mxu0  ;;  %v91_v29 = vpop.f32.mrf.mxu1 }
  0x84   :  { %v125_v30 = vmul.f32 %v298_v26, %v81_v28  ;;  %v129_v31 = vmul.f32 %v298_v26, %v91_v29 }
  0x86   :  { %v145_v32 = vadd.f32 %v303_v27, %v125_v30  ;;  %v149_v33 = vadd.f32 %v303_v27, %v129_v31 }
  0x88   :  { %v161_v34 = vmax.f32 %v145_v32, 0.0  ;;  %v165_v35 = vmax.f32 %v149_v33, 0.0 }
  0x8a   :  { %178 = vst.msk [vmem:[%s405_s4] sm:$0xff] %vm177_vm2, %v161_v34  ;;  %v101_v36 = vpop.f32.mrf.mxu2 }
  0x8b   :  { %v111_v37 = vpop.f32.mrf.mxu3  ;;  %182 = vst.msk [vmem:[%s405_s4 + $0x20] sm:$0xff] %vm177_vm2, %v165_v35  ;;  %v133_v38 = vmul.f32 %v298_v26, %v101_v36  ;;  %v83_v40 = vpop.f32.mrf.mxu0 }
  0x8c   :  { %v137_v39 = vmul.f32 %v298_v26, %v111_v37  ;;  %v93_v41 = vpop.f32.mrf.mxu1  ;;  %v126_v42 = vmul.f32 %v298_v26, %v83_v40 }
  0x8d   :  { %v130_v43 = vmul.f32 %v298_v26, %v93_v41  ;;  %v153_v44 = vadd.f32 %v303_v27, %v133_v38 }
  0x8e   :  { %v157_v45 = vadd.f32 %v303_v27, %v137_v39  ;;  %v146_v46 = vadd.f32 %v303_v27, %v126_v42 }
  0x8f   :  { %v150_v47 = vadd.f32 %v303_v27, %v130_v43  ;;  %v169_v48 = vmax.f32 %v153_v44, 0.0 }
  0x90   :  { %v173_v49 = vmax.f32 %v157_v45, 0.0  ;;  %v162_v50 = vmax.f32 %v146_v46, 0.0 }
  0x91   :  { %v166_v51 = vmax.f32 %v150_v47, 0.0  ;;  %186 = vst.msk [vmem:[%s405_s4 + $0x40] sm:$0xff] %vm177_vm2, %v169_v48 }
  0x92   :  { %190 = vst.msk [vmem:[%s405_s4 + $0x60] sm:$0xff] %vm177_vm2, %v173_v49  ;;  %v103_v52 = vpop.f32.mrf.mxu2 }
  0x93   :  { %v113_v53 = vpop.f32.mrf.mxu3  ;;  %179 = vst.msk [vmem:[%s405_s4 + $0x8] sm:$0xff] %vm177_vm2, %v162_v50  ;;  %v134_v54 = vmul.f32 %v298_v26, %v103_v52  ;;  %v86_v56 = vpop.f32.mrf.mxu0 }
  0x94   :  { %v138_v55 = vmul.f32 %v298_v26, %v113_v53  ;;  %v96_v57 = vpop.f32.mrf.mxu1  ;;  %183 = vst.msk [vmem:[%s405_s4 + $0x28] sm:$0xff] %vm177_vm2, %v166_v51  ;;  %v127_v58 = vmul.f32 %v298_v26, %v86_v56 }
  0x95   :  { %v131_v59 = vmul.f32 %v298_v26, %v96_v57  ;;  %v154_v60 = vadd.f32 %v303_v27, %v134_v54 }
  0x96   :  { %v158_v61 = vadd.f32 %v303_v27, %v138_v55  ;;  %v147_v62 = vadd.f32 %v303_v27, %v127_v58 }
  0x97   :  { %v151_v63 = vadd.f32 %v303_v27, %v131_v59  ;;  %v170_v0 = vmax.f32 %v154_v60, 0.0 }
  0x98   :  { %v174_v1 = vmax.f32 %v158_v61, 0.0  ;;  %v163_v2 = vmax.f32 %v147_v62, 0.0 }
  0x99   :  { %v167_v3 = vmax.f32 %v151_v63, 0.0  ;;  %187 = vst.msk [vmem:[%s405_s4 + $0x48] sm:$0xff] %vm177_vm2, %v170_v0 }
  0x9a   :  { %191 = vst.msk [vmem:[%s405_s4 + $0x68] sm:$0xff] %vm177_vm2, %v174_v1  ;;  %v106_v4 = vpop.f32.mrf.mxu2 }
  0x9b   :  { %v116_v5 = vpop.f32.mrf.mxu3  ;;  %180 = vst.msk [vmem:[%s405_s4 + $0x10] sm:$0xff] %vm177_vm2, %v163_v2  ;;  %v135_v6 = vmul.f32 %v298_v26, %v106_v4  ;;  %v88_v8 = vpop.f32.mrf.mxu0 }
  0x9c   :  { %v139_v7 = vmul.f32 %v298_v26, %v116_v5  ;;  %v98_v9 = vpop.f32.mrf.mxu1  ;;  %184 = vst.msk [vmem:[%s405_s4 + $0x30] sm:$0xff] %vm177_vm2, %v167_v3  ;;  %v128_v10 = vmul.f32 %v298_v26, %v88_v8 }
  0x9d   :  { %v132_v11 = vmul.f32 %v298_v26, %v98_v9  ;;  %v155_v12 = vadd.f32 %v303_v27, %v135_v6 }
  0x9e   :  { %v159_v13 = vadd.f32 %v303_v27, %v139_v7  ;;  %v148_v14 = vadd.f32 %v303_v27, %v128_v10 }
  0x9f   :  { %v152_v15 = vadd.f32 %v303_v27, %v132_v11  ;;  %v171_v16 = vmax.f32 %v155_v12, 0.0 }
  0xa0   :  { %v175_v17 = vmax.f32 %v159_v13, 0.0  ;;  %v164_v18 = vmax.f32 %v148_v14, 0.0 }
  0xa1   :  { %v168_v19 = vmax.f32 %v152_v15, 0.0  ;;  %188 = vst.msk [vmem:[%s405_s4 + $0x50] sm:$0xff] %vm177_vm2, %v171_v16 }
  0xa2   :  { %192 = vst.msk [vmem:[%s405_s4 + $0x70] sm:$0xff] %vm177_vm2, %v175_v17  ;;  %v108_v20 = vpop.f32.mrf.mxu2 }
  0xa3   :  { %v118_v21 = vpop.f32.mrf.mxu3  ;;  %181 = vst.msk [vmem:[%s405_s4 + $0x18] sm:$0xff] %vm177_vm2, %v164_v18  ;;  %v136_v22 = vmul.f32 %v298_v26, %v108_v20 }
  0xa4   :  { %v140_v23 = vmul.f32 %v298_v26, %v118_v21  ;;  %185 = vst.msk [vmem:[%s405_s4 + $0x38] sm:$0xff] %vm177_vm2, %v168_v19 }
  0xa5   :  { %v156_v24 = vadd.f32 %v303_v27, %v136_v22 }
  0xa6   :  { %v160_v25 = vadd.f32 %v303_v27, %v140_v23 }
  0xa7   :  { %v172_v28 = vmax.f32 %v156_v24, 0.0 }
  0xa8   :  { %v176_v29 = vmax.f32 %v160_v25, 0.0 }
  0xa9   :  { %189 = vst.msk [vmem:[%s405_s4 + $0x58] sm:$0xff] %vm177_vm2, %v172_v28 }
  0xaa   :  { %193 = vst.msk [vmem:[%s405_s4 + $0x78] sm:$0xff] %vm177_vm2, %v176_v29 }

// kernel: _lambda_.89
= control target key start
LH: loop header
LB: loop body
LE: loop exit
PB: predicated region body
PF: predicated region fallthrough
CT: control target
= control target key end

     0   :  { %vm50_vm0 = vcmask 130048   ;;  %vm180_vm1 = vcmask 64512   ;;  %s409_s1 = inlined_call_operand.vmem [shape: bf16[16,8], index: 1, kind: input, shape index: {}]   ;;  %s410_s0 = inlined_call_operand.vmem [shape: f32[128,16], index: 0, kind: input, shape index: {}]   ;;  %s411_s2 = inlined_call_operand.vmem [shape: f32[1,8], index: 2, kind: input, shape index: {}]   ;;  %s412_s3 = inlined_call_operand.vmem [shape: f32[1,8], index: 3, kind: input, shape index: {}]   ;;  %s413_s4 = inlined_call_operand.vmem [shape: f32[128,8], index: 4, kind: output, shape index: {}]  }
   0x1   :  { %v213_v0 = vld [vmem:[%s409_s1] sm:$0xff]  ;;  %v19_v2 = vld [vmem:[%s410_s0 + $0x8] sm:$0xff]  ;;  %v20_v13 = vld [vmem:[%s410_s0 + $0x10] sm:$0xff] }
   0x2   :  { %v18_v1 = vld [vmem:[%s410_s0] sm:$0xff]  ;;  %v23_v5 = vld [vmem:[%s410_s0 + $0x28] sm:$0xff]  ;;  %82 = vmatpush.bf16.msra.mxu0 %v213_v0  ;;  %214 = vmatpush.bf16.msra.mxu1 %v213_v0  ;;  %v21_v14 = vld [vmem:[%s410_s0 + $0x18] sm:$0xff] }
   0x3   :  { %v34_v3 = vpack.c.bf16 %v19_v2, %v18_v1  ;;  %v22_v4 = vld [vmem:[%s410_s0 + $0x20] sm:$0xff]  ;;  %v27_v8 = vld [vmem:[%s410_s0 + $0x48] sm:$0xff]  ;;  %215 = vmatpush.bf16.msra.mxu2 %v213_v0  ;;  %216 = vmatpush.bf16.msra.mxu3 %v213_v0  ;;  %v24_v15 = vld [vmem:[%s410_s0 + $0x30] sm:$0xff]  ;;  %v35_v21 = vpack.c.bf16 %v21_v14, %v20_v13 }
   0x4   :  { %v26_v6 = vld [vmem:[%s410_s0 + $0x40] sm:$0xff]  ;;  %v36_v7 = vpack.c.bf16 %v23_v5, %v22_v4  ;;  %v31_v10 = vld [vmem:[%s410_s0 + $0x68] sm:$0xff]  ;;  %v25_v16 = vld [vmem:[%s410_s0 + $0x38] sm:$0xff] }
   0x5   :  { %v30_v9 = vld [vmem:[%s410_s0 + $0x60] sm:$0xff]  ;;  %v38_v11 = vpack.c.bf16 %v27_v8, %v26_v6  ;;  %205 = vmatmul.msk.bf16.vlgmr.msra.gmra.mxu0 %vm50_vm0, %v34_v3  ;;  %v28_v17 = vld [vmem:[%s410_s0 + $0x50] sm:$0xff]  ;;  %v29_v18 = vld [vmem:[%s410_s0 + $0x58] sm:$0xff]  ;;  %v37_v22 = vpack.c.bf16 %v25_v16, %v24_v15 }
   0x6   :  { %v40_v12 = vpack.c.bf16 %v31_v10, %v30_v9  ;;  %207 = vmatmul.msk.bf16.vlgmr.msra.gmra.mxu1 %vm50_vm0, %v36_v7  ;;  %v32_v19 = vld [vmem:[%s410_s0 + $0x70] sm:$0xff]  ;;  %v33_v20 = vld [vmem:[%s410_s0 + $0x78] sm:$0xff]  ;;  %v39_v23 = vpack.c.bf16 %v29_v18, %v28_v17  ;;  %v306_v25 = vld [vmem:[%s411_s2] ss:$0 sm:$0xff] }
   0x7   :  { %209 = vmatmul.msk.bf16.vlgmr.msra.gmra.mxu2 %vm50_vm0, %v38_v11  ;;  %v41_v24 = vpack.c.bf16 %v33_v20, %v32_v19  ;;  %v311_v26 = vld [vmem:[%s412_s3] ss:$0 sm:$0xff] }
   0x8   :  { %211 = vmatmul.msk.bf16.vlgmr.msra.gmra.mxu3 %vm50_vm0, %v40_v12 }
  0x15   :  { %206 = vmatmul.msk.bf16.gmra.mxu0 %vm50_vm0, %v35_v21 }
  0x16   :  { %208 = vmatmul.msk.bf16.gmra.mxu1 %vm50_vm0, %v37_v22 }
  0x17   :  { %210 = vmatmul.msk.bf16.gmra.mxu2 %vm50_vm0, %v39_v23 }
  0x18   :  { %212 = vmatmul.msk.bf16.gmra.mxu3 %vm50_vm0, %v41_v24 }
  0x82   :  { %v84_v27 = vpop.f32.mrf.mxu0 }
  0x83   :  { %v94_v28 = vpop.f32.mrf.mxu1  ;;  %v128_v29 = vmul.f32 %v306_v25, %v84_v27 }
  0x84   :  { %v132_v30 = vmul.f32 %v306_v25, %v94_v28 }
  0x85   :  { %v148_v31 = vadd.f32 %v311_v26, %v128_v29 }
  0x86   :  { %v152_v32 = vadd.f32 %v311_v26, %v132_v30 }
  0x87   :  { %v164_v33 = vmax.f32 %v148_v31, 0.0 }
  0x88   :  { %v168_v34 = vmax.f32 %v152_v32, 0.0 }
  0x89   :  { %181 = vst.msk [vmem:[%s413_s4] sm:$0xff] %vm180_vm1, %v164_v33 }
  0x8a   :  { %v104_v35 = vpop.f32.mrf.mxu2  ;;  %185 = vst.msk [vmem:[%s413_s4 + $0x20] sm:$0xff] %vm180_vm1, %v168_v34  ;;  %v86_v39 = vpop.f32.mrf.mxu0 }
  0x8b   :  { %v114_v36 = vpop.f32.mrf.mxu3  ;;  %v136_v37 = vmul.f32 %v306_v25, %v104_v35  ;;  %v96_v40 = vpop.f32.mrf.mxu1  ;;  %v129_v41 = vmul.f32 %v306_v25, %v86_v39 }
  0x8c   :  { %v140_v38 = vmul.f32 %v306_v25, %v114_v36  ;;  %v133_v42 = vmul.f32 %v306_v25, %v96_v40 }
  0x8d   :  { %v156_v43 = vadd.f32 %v311_v26, %v136_v37  ;;  %v149_v45 = vadd.f32 %v311_v26, %v129_v41 }
  0x8e   :  { %v160_v44 = vadd.f32 %v311_v26, %v140_v38  ;;  %v153_v46 = vadd.f32 %v311_v26, %v133_v42 }
  0x8f   :  { %v172_v47 = vmax.f32 %v156_v43, 0.0  ;;  %v165_v49 = vmax.f32 %v149_v45, 0.0 }
  0x90   :  { %v176_v48 = vmax.f32 %v160_v44, 0.0  ;;  %v169_v50 = vmax.f32 %v153_v46, 0.0 }
  0x91   :  { %189 = vst.msk [vmem:[%s413_s4 + $0x40] sm:$0xff] %vm180_vm1, %v172_v47 }
  0x92   :  { %193 = vst.msk [vmem:[%s413_s4 + $0x60] sm:$0xff] %vm180_vm1, %v176_v48  ;;  %v106_v51 = vpop.f32.mrf.mxu2  ;;  %v89_v55 = vpop.f32.mrf.mxu0 }
  0x93   :  { %v116_v52 = vpop.f32.mrf.mxu3  ;;  %182 = vst.msk [vmem:[%s413_s4 + $0x8] sm:$0xff] %vm180_vm1, %v165_v49  ;;  %v137_v53 = vmul.f32 %v306_v25, %v106_v51  ;;  %v99_v56 = vpop.f32.mrf.mxu1  ;;  %v130_v57 = vmul.f32 %v306_v25, %v89_v55 }
  0x94   :  { %v141_v54 = vmul.f32 %v306_v25, %v116_v52  ;;  %186 = vst.msk [vmem:[%s413_s4 + $0x28] sm:$0xff] %vm180_vm1, %v169_v50  ;;  %v134_v58 = vmul.f32 %v306_v25, %v99_v56 }
  0x95   :  { %v157_v59 = vadd.f32 %v311_v26, %v137_v53  ;;  %v150_v61 = vadd.f32 %v311_v26, %v130_v57 }
  0x96   :  { %v161_v60 = vadd.f32 %v311_v26, %v141_v54  ;;  %v154_v62 = vadd.f32 %v311_v26, %v134_v58 }
  0x97   :  { %v173_v63 = vmax.f32 %v157_v59, 0.0  ;;  %v166_v1 = vmax.f32 %v150_v61, 0.0 }
  0x98   :  { %v177_v0 = vmax.f32 %v161_v60, 0.0  ;;  %v170_v2 = vmax.f32 %v154_v62, 0.0 }
  0x99   :  { %190 = vst.msk [vmem:[%s413_s4 + $0x48] sm:$0xff] %vm180_vm1, %v173_v63 }
  0x9a   :  { %194 = vst.msk [vmem:[%s413_s4 + $0x68] sm:$0xff] %vm180_vm1, %v177_v0  ;;  %v109_v3 = vpop.f32.mrf.mxu2  ;;  %v91_v7 = vpop.f32.mrf.mxu0 }
  0x9b   :  { %v119_v4 = vpop.f32.mrf.mxu3  ;;  %183 = vst.msk [vmem:[%s413_s4 + $0x10] sm:$0xff] %vm180_vm1, %v166_v1  ;;  %v138_v5 = vmul.f32 %v306_v25, %v109_v3  ;;  %v101_v8 = vpop.f32.mrf.mxu1  ;;  %v131_v9 = vmul.f32 %v306_v25, %v91_v7 }
  0x9c   :  { %v142_v6 = vmul.f32 %v306_v25, %v119_v4  ;;  %187 = vst.msk [vmem:[%s413_s4 + $0x30] sm:$0xff] %vm180_vm1, %v170_v2  ;;  %v135_v10 = vmul.f32 %v306_v25, %v101_v8 }
  0x9d   :  { %v158_v11 = vadd.f32 %v311_v26, %v138_v5  ;;  %v151_v13 = vadd.f32 %v311_v26, %v131_v9 }
  0x9e   :  { %v162_v12 = vadd.f32 %v311_v26, %v142_v6  ;;  %v155_v14 = vadd.f32 %v311_v26, %v135_v10 }
  0x9f   :  { %v174_v15 = vmax.f32 %v158_v11, 0.0  ;;  %v167_v17 = vmax.f32 %v151_v13, 0.0 }
  0xa0   :  { %v178_v16 = vmax.f32 %v162_v12, 0.0  ;;  %v171_v18 = vmax.f32 %v155_v14, 0.0 }
  0xa1   :  { %191 = vst.msk [vmem:[%s413_s4 + $0x50] sm:$0xff] %vm180_vm1, %v174_v15 }
  0xa2   :  { %195 = vst.msk [vmem:[%s413_s4 + $0x70] sm:$0xff] %vm180_vm1, %v178_v16  ;;  %v111_v19 = vpop.f32.mrf.mxu2 }
  0xa3   :  { %v121_v20 = vpop.f32.mrf.mxu3  ;;  %184 = vst.msk [vmem:[%s413_s4 + $0x18] sm:$0xff] %vm180_vm1, %v167_v17  ;;  %v139_v21 = vmul.f32 %v306_v25, %v111_v19 }
  0xa4   :  { %v143_v22 = vmul.f32 %v306_v25, %v121_v20  ;;  %188 = vst.msk [vmem:[%s413_s4 + $0x38] sm:$0xff] %vm180_vm1, %v171_v18 }
  0xa5   :  { %v159_v23 = vadd.f32 %v311_v26, %v139_v21 }
  0xa6   :  { %v163_v24 = vadd.f32 %v311_v26, %v143_v22 }
  0xa7   :  { %v175_v27 = vmax.f32 %v159_v23, 0.0 }
  0xa8   :  { %v179_v28 = vmax.f32 %v163_v24, 0.0 }
  0xa9   :  { %192 = vst.msk [vmem:[%s413_s4 + $0x58] sm:$0xff] %vm180_vm1, %v175_v27 }
  0xaa   :  { %196 = vst.msk [vmem:[%s413_s4 + $0x78] sm:$0xff] %vm180_vm1, %v179_v28 }

// kernel: _lambda_.88
= control target key start
LH: loop header
LB: loop body
LE: loop exit
PB: predicated region body
PF: predicated region fallthrough
CT: control target
= control target key end

     0   :  { %s1077_s15 = smov 0   ;;  %s1401_s0 = inlined_call_operand.vmem [shape: f32[2,10,10,16], index: 0, kind: input, shape index: {}]   ;;  %s1402_s1 = inlined_call_operand.vmem [shape: bf16[3,3,16,16], index: 1, kind: input, shape index: {}]   ;;  %s1403_s2 = inlined_call_operand.vmem [shape: f32[1,16], index: 2, kind: input, shape index: {}]   ;;  %s1404_s3 = inlined_call_operand.vmem [shape: f32[1,16], index: 3, kind: input, shape index: {}]   ;;  %s1405_s4 = inlined_call_operand.vmem [shape: f32[2,64,16], index: 4, kind: output, shape index: {}]  }
   0x1 LB: > { %s922_s16 = sadd.s32 4294967295, %s1050_s15   ;;  %p926_p0 = scmp.ge.s32.totalorder %s1050_s15, 1  ;;  %s1050_s15 = sphi %s1077_s15, %s14_s15  }
   0x2   : > { %p162_p1 = scmp.lt.s32.totalorder %s1050_s15, 3 }
   0x4   : > { %p163_p2 = pnand %p926_p0, %p162_p1 }
   0x5   : > { %p188_p3 = scmp.lt.s32.totalorder (!%p163_p2), %s922_s16, 1 }
   0x6   : > { %166 = sbr.rel (%p163_p2) target bundleno = 305 (0x131), region = 36 }
   0xb   : > { %v1022_v0 = vld [vmem:[%s1402_s1 + $0x8] sm:$0xff]  ;;  %v1023_v1 = vld [vmem:[%s1402_s1 + $0x10] sm:$0xff]  ;;  %v1024_v2 = vld [vmem:[%s1402_s1 + $0x18] sm:$0xff]  ;;  %s1407_s16 = smov (!%p188_p3, %s922_s16), 1  ;;  %vm241_vm0 = vcmask 1046528   ;;  %vm287_vm1 = vcmask 130048  }
   0xc   : > { %v1021_v3 = vld [vmem:[%s1402_s1] sm:$0xff]  ;;  %1030 = vmatpush.bf16.msra.mxu1 %v1022_v0  ;;  %1031 = vmatpush.bf16.msra.mxu2 %v1022_v0  ;;  %s1033_s27 = smul.u32 160, %s1407_s16  ;;  %v1026_v17 = vld [vmem:[%s1402_s1 + $0x28] sm:$0xff]  ;;  %v1027_v42 = vld [vmem:[%s1402_s1 + $0x30] sm:$0xff]  ;;  %vm376_vm2 = vcmask 1045504   ;;  %s1020_s19 = sshll.u32 %s1407_s16, 6 }
   0xd   : > { %v1025_v4 = vld [vmem:[%s1402_s1 + $0x20] sm:$0xff]  ;;  %1032 = vmatpush.bf16.msra.mxu3 %v1022_v0  ;;  %307 = vmatpush.bf16.msra.mxu0 %v1022_v0  ;;  %v1028_v47 = vld [vmem:[%s1402_s1 + $0x38] sm:$0xff]  ;;  %s1344_s22 = scalar_lea.vmem %s1405_s4, %s1020_s19 }
   0xe   : > { %s1106_s30 = scalar_lea.vmem %s1401_s0, %s1033_s27  ;;  %v1029_v51 = vld [vmem:[%s1402_s1 + $0x40] sm:$0xff] }
   0xf   : > { %v1109_v5 = vld [vmem:[%s1106_s30 + $0x20] sm:$0xff]  ;;  %v1112_v6 = vld [vmem:[%s1106_s30 + $0x28] sm:$0x3]  ;;  %v1115_v7 = vld [vmem:[%s1106_s30 + $0x30] sm:$0xff] }
  0x10   : > { %441 = vmatpush.bf16.msrb.mxu2 %v1023_v1  ;;  %354 = vmatpush.bf16.msrb.mxu1 %v1021_v3  ;;  %v1118_v8 = vld [vmem:[%s1106_s30 + $0x38] sm:$0x3]  ;;  %v248_v9 = vrot.slane %v1109_v5, 1  ;;  %v249_v10 = vrot.slane %v1112_v6, 1  ;;  %v251_v11 = vrot.slane %v1115_v7, 1  ;;  %v1124_v12 = vld [vmem:[%s1106_s30 + $0x40] sm:$0xff] }
  0x11   : > { %503 = vmatpush.bf16.msrb.mxu3 %v1024_v2  ;;  %571 = vmatpush.bf16.msrb.mxu0 %v1025_v4  ;;  %v252_v13 = vrot.slane %v1118_v8, 1  ;;  %v1128_v14 = vld [vmem:[%s1106_s30 + $0x48] sm:$0x3]  ;;  %v1131_v15 = vld [vmem:[%s1106_s30 + $0x50] sm:$0xff]  ;;  %v1134_v16 = vld [vmem:[%s1106_s30 + $0x58] sm:$0x3] }
  0x12   : > { %v250_v18 = vsel %vm241_vm0, %v248_v9, %v249_v10  ;;  %v254_v19 = vrot.slane %v1124_v12, 1  ;;  %v255_v20 = vrot.slane %v1128_v14, 1  ;;  %v257_v21 = vrot.slane %v1131_v15, 1  ;;  %v1144_v22 = vld [vmem:[%s1106_s30 + $0x60] sm:$0xff]  ;;  %v1147_v23 = vld [vmem:[%s1106_s30 + $0x68] sm:$0x3] }
  0x13   : > { %v1150_v24 = vsel %vm241_vm0, %v251_v11, %v252_v13  ;;  %v258_v25 = vrot.slane %v1134_v16, 1  ;;  %v1154_v26 = vld [vmem:[%s1106_s30 + $0x70] sm:$0xff]  ;;  %v1157_v27 = vld [vmem:[%s1106_s30 + $0x78] sm:$0x3]  ;;  %v260_v28 = vrot.slane %v1144_v22, 1  ;;  %v261_v29 = vrot.slane %v1147_v23, 1 }
  0x14   : > { %v1162_v30 = vpack.c.bf16 %v1150_v24, %v250_v18  ;;  %v256_v31 = vsel %vm241_vm0, %v254_v19, %v255_v20  ;;  %v263_v32 = vrot.slane %v1154_v26, 1  ;;  %v264_v33 = vrot.slane %v1157_v27, 1  ;;  %v199_v34 = vld [vmem:[%s1106_s30] sm:$0xff]  ;;  %v200_v35 = vld [vmem:[%s1106_s30 + $0x8] sm:$0x3]  ;;  %v201_v36 = vld [vmem:[%s1106_s30 + $0x10] sm:$0xff] }
  0x15   : > { %v1171_v37 = vsel %vm241_vm0, %v257_v21, %v258_v25  ;;  %v1174_v38 = vsel %vm241_vm0, %v260_v28, %v261_v29  ;;  %v202_v39 = vld [vmem:[%s1106_s30 + $0x18] sm:$0x3]  ;;  %v242_v40 = vrot.slane %v199_v34, 1  ;;  %v243_v41 = vrot.slane %v200_v35, 1  ;;  %v216_v29 = vld [vmem:[%s1106_s30 + $0x88] sm:$0x3] }
  0x16   : > { %937 = vmatmul.msk.bf16.vlgmr.msra.gmra.mxu1 %vm287_vm1, %v1162_v30  ;;  %v1183_v43 = vpack.c.bf16 %v1171_v37, %v256_v31  ;;  %v1186_v44 = vsel %vm241_vm0, %v263_v32, %v264_v33  ;;  %v245_v45 = vrot.slane %v201_v36, 1  ;;  %v246_v46 = vrot.slane %v202_v39, 1 }
  0x17   : > { %v1193_v48 = vpack.c.bf16 %v1186_v44, %v1174_v38  ;;  %v244_v49 = vsel %vm241_vm0, %v242_v40, %v243_v41  ;;  %637 = vmatpush.bf16.msra.mxu1 %v1026_v17  ;;  %v378_v53 = vrot.slane %v200_v35, 2  ;;  %v381_v54 = vrot.slane %v202_v39, 2  ;;  %v217_v39 = vld [vmem:[%s1106_s30 + $0x90] sm:$0xff]  ;;  %v218_v40 = vld [vmem:[%s1106_s30 + $0x98] sm:$0x3] }
  0x18   : > { %938 = vmatmul.msk.bf16.vlgmr.msra.gmra.mxu2 %vm287_vm1, %v1183_v43  ;;  %v247_v50 = vsel %vm241_vm0, %v245_v45, %v246_v46  ;;  %v377_v55 = vrot.slane %v199_v34, 2  ;;  %v380_v56 = vrot.slane %v201_v36, 2  ;;  %v219_v59 = vpack.c.bf16 %v201_v36, %v199_v34 }
  0x19   : > { %939 = vmatmul.msk.bf16.vlgmr.msra.gmra.mxu3 %vm287_vm1, %v1193_v48  ;;  %v274_v52 = vpack.c.bf16 %v247_v50, %v244_v49  ;;  %687 = vmatpush.bf16.msra.mxu2 %v1027_v42  ;;  %v471_v61 = vpack.c.bf16 %v1109_v5, %v201_v36  ;;  %v539_v62 = vpack.c.bf16 %v250_v18, %v247_v50  ;;  %v383_v0 = vrot.slane %v1109_v5, 2 }
  0x1a   : > { %743 = vmatpush.bf16.msra.mxu3 %v1028_v47  ;;  %v379_v57 = vsel %vm376_vm2, %v377_v55, %v378_v53  ;;  %v382_v58 = vsel %vm376_vm2, %v380_v56, %v381_v54  ;;  %v222_v63 = vpack.c.bf16 %v1154_v26, %v1144_v22  ;;  %v384_v1 = vrot.slane %v1112_v6, 2 }
  0x1b   : > { %936 = vmatmul.msk.bf16.vlgmr.msra.gmra.mxu0 %vm287_vm1, %v274_v52  ;;  %v409_v60 = vpack.c.bf16 %v382_v58, %v379_v57  ;;  %v386_v2 = vrot.slane %v1115_v7, 2  ;;  %v387_v3 = vrot.slane %v1118_v8, 2  ;;  %v220_v10 = vpack.c.bf16 %v1115_v7, %v1109_v5 }
  0x1c   : > { %797 = vmatpush.bf16.msra.mxu0 %v1029_v51  ;;  %v385_v4 = vsel %vm376_vm2, %v383_v0, %v384_v1  ;;  %v472_v13 = vpack.c.bf16 %v1124_v12, %v1115_v7  ;;  %v540_v17 = vpack.c.bf16 %v256_v31, %v1150_v24  ;;  %v389_v6 = vrot.slane %v1124_v12, 2 }
  0x1d   : > { %v388_v9 = vsel %vm376_vm2, %v386_v2, %v387_v3  ;;  %v390_v8 = vrot.slane %v1128_v14, 2  ;;  %v392_v5 = vrot.slane %v1131_v15, 2  ;;  %v393_v18 = vrot.slane %v1134_v16, 2 }
  0x1e   : > { %v410_v11 = vpack.c.bf16 %v388_v9, %v385_v4  ;;  %v221_v20 = vpack.c.bf16 %v1131_v15, %v1124_v12  ;;  %v473_v24 = vpack.c.bf16 %v1144_v22, %v1131_v15  ;;  %v541_v14 = vpack.c.bf16 %v1174_v38, %v1171_v37  ;;  %v215_v15 = vld [vmem:[%s1106_s30 + $0x80] sm:$0xff] }
  0x1f   : > { %v391_v7 = vsel %vm376_vm2, %v389_v6, %v390_v8  ;;  %v394_v19 = vsel %vm376_vm2, %v392_v5, %v393_v18  ;;  %v395_v16 = vrot.slane %v1144_v22, 2  ;;  %v396_v25 = vrot.slane %v1147_v23, 2 }
  0x20   : > { %v411_v21 = vpack.c.bf16 %v394_v19, %v391_v7  ;;  %v398_v12 = vrot.slane %v1154_v26, 2  ;;  %v399_v28 = vrot.slane %v1157_v27, 2  ;;  %v535_v31 = vrot.slane %v215_v15, 1 }
  0x21   : > { %v536_v32 = vrot.slane %v216_v29, 1  ;;  %v397_v33 = vsel %vm376_vm2, %v395_v16, %v396_v25  ;;  %v474_v37 = vpack.c.bf16 %v215_v15, %v1154_v26  ;;  %v605_v23 = vpack.c.bf16 %v385_v4, %v382_v58 }
  0x22   : > { %v400_v34 = vsel %vm376_vm2, %v398_v12, %v399_v28  ;;  %v606_v26 = vpack.c.bf16 %v391_v7, %v388_v9  ;;  %v607_v27 = vpack.c.bf16 %v397_v33, %v394_v19  ;;  %v602_v38 = vrot.slane %v216_v29, 2 }
  0x23   : > { %v412_v35 = vpack.c.bf16 %v400_v34, %v397_v33  ;;  %v537_v36 = vsel %vm241_vm0, %v535_v31, %v536_v32  ;;  %v719_v41 = vrot.slane %v217_v39, 1  ;;  %v720_v42 = vrot.slane %v218_v40, 1 }
  0x24   : > { %v542_v22 = vpack.c.bf16 %v537_v36, %v1186_v44  ;;  %v773_v44 = vrot.slane %v217_v39, 2  ;;  %v774_v45 = vrot.slane %v218_v40, 2  ;;  %v667_v50 = vpack.c.bf16 %v217_v39, %v215_v15 }
  0x25   : > { %v721_v47 = vsel %vm241_vm0, %v719_v41, %v720_v42 }
  0x26   : > { %944 = vmatmul.msk.bf16.vlgmr.msrb.gmra.mxu1 %vm287_vm1, %v219_v59  ;;  %v775_v51 = vsel %vm376_vm2, %v773_v44, %v774_v45  ;;  %v1331_v44 = vld [vmem:[%s1403_s2] ss:$0 sm:$0xff] }
  0x28   : > { %954 = vmatmul.msk.bf16.vlgmr.msrb.gmra.mxu2 %vm287_vm1, %v409_v60 }
  0x29   : > { %964 = vmatmul.msk.bf16.vlgmr.msrb.gmra.mxu3 %vm287_vm1, %v471_v61 }
  0x2b   : > { %974 = vmatmul.msk.bf16.vlgmr.msrb.gmra.mxu0 %vm287_vm1, %v539_v62 }
  0x36   : > { %945 = vmatmul.msk.bf16.gmra.mxu1 %vm287_vm1, %v220_v10 }
  0x38   : > { %955 = vmatmul.msk.bf16.gmra.mxu2 %vm287_vm1, %v410_v11 }
  0x39   : > { %965 = vmatmul.msk.bf16.gmra.mxu3 %vm287_vm1, %v472_v13 }
  0x3b   : > { %975 = vmatmul.msk.bf16.gmra.mxu0 %vm287_vm1, %v540_v17 }
  0x46   : > { %946 = vmatmul.msk.bf16.gmra.mxu1 %vm287_vm1, %v221_v20 }
  0x48   : > { %956 = vmatmul.msk.bf16.gmra.mxu2 %vm287_vm1, %v411_v21 }
  0x49   : > { %966 = vmatmul.msk.bf16.gmra.mxu3 %vm287_vm1, %v473_v24 }
  0x4b   : > { %976 = vmatmul.msk.bf16.gmra.mxu0 %vm287_vm1, %v541_v14 }
  0x56   : > { %947 = vmatmul.msk.bf16.gmra.mxu1 %vm287_vm1, %v222_v63 }
  0x58   : > { %957 = vmatmul.msk.bf16.gmra.mxu2 %vm287_vm1, %v412_v35 }
  0x59   : > { %967 = vmatmul.msk.bf16.gmra.mxu3 %vm287_vm1, %v474_v37 }
  0x5b   : > { %977 = vmatmul.msk.bf16.gmra.mxu0 %vm287_vm1, %v542_v22 }
  0x66   : > { %984 = vmatmul.msk.bf16.vlgmr.msra.gmra.mxu1 %vm287_vm1, %v605_v23 }
  0x68   : > { %994 = vmatmul.msk.bf16.vlgmr.msra.gmra.mxu2 %vm287_vm1, %v220_v10 }
  0x69   : > { %1004 = vmatmul.msk.bf16.vlgmr.msra.gmra.mxu3 %vm287_vm1, %v1162_v30  ;;  %v601_v30 = vrot.slane %v215_v15, 2 }
  0x6b   : > { %1014 = vmatmul.msk.bf16.vlgmr.msra.gmra.mxu0 %vm287_vm1, %v410_v11 }
  0x76   : > { %985 = vmatmul.msk.bf16.gmra.mxu1 %vm287_vm1, %v606_v26 }
  0x78   : > { %995 = vmatmul.msk.bf16.gmra.mxu2 %vm287_vm1, %v221_v20 }
  0x79   : > { %1005 = vmatmul.msk.bf16.gmra.mxu3 %vm287_vm1, %v1183_v43  ;;  %v603_v43 = vsel %vm376_vm2, %v601_v30, %v602_v38 }
  0x7a   : > { %v608_v46 = vpack.c.bf16 %v603_v43, %v400_v34  ;;  %v777_v52 = vpack.c.bf16 %v775_v51, %v603_v43 }
  0x7b   : > { %1015 = vmatmul.msk.bf16.gmra.mxu0 %vm287_vm1, %v411_v21 }
  0x86   : > { %986 = vmatmul.msk.bf16.gmra.mxu1 %vm287_vm1, %v607_v27 }
  0x88   : > { %996 = vmatmul.msk.bf16.gmra.mxu2 %vm287_vm1, %v222_v63 }
  0x89   : > { %1006 = vmatmul.msk.bf16.gmra.mxu3 %vm287_vm1, %v1193_v48  ;;  %v723_v48 = vpack.c.bf16 %v721_v47, %v537_v36  ;;  %v1336_v47 = vld [vmem:[%s1404_s3] ss:$0 sm:$0xff] }
  0x8b   : > { %1016 = vmatmul.msk.bf16.gmra.mxu0 %vm287_vm1, %v412_v35 }
  0x93   : > { %v314_v49 = vpop.f32.mrf.mxu1 }
  0x96   : > { %987 = vmatmul.msk.bf16.gmra.mxu1 %vm287_vm1, %v608_v46 }
  0x98   : > { %v309_v53 = vpop.f32.mrf.mxu0  ;;  %997 = vmatmul.msk.bf16.gmra.mxu2 %vm287_vm1, %v667_v50 }
  0x99   : > { %1007 = vmatmul.msk.bf16.gmra.mxu3 %vm287_vm1, %v723_v48 }
  0x9b   : > { %1017 = vmatmul.msk.bf16.gmra.mxu0 %vm287_vm1, %v777_v52  ;;  %v1284_v54 = vpop.f32.mrf.mxu2  ;;  %v1286_v55 = vpop.f32.mrf.mxu1 }
  0x9c   : > { %v1288_v56 = vpop.f32.mrf.mxu3 }
  0xa0   : > { %v311_v57 = vpop.f32.mrf.mxu0 }
  0xa3   : > { %v1290_v58 = vpop.f32.mrf.mxu2  ;;  %v356_v59 = vpop.f32.mrf.mxu1 }
  0xa4   : > { %v1292_v60 = vpop.f32.mrf.mxu3  ;;  %v357_v29 = vadd.f32 %v356_v59, %v309_v53 }
  0xa8   : > { %v573_v61 = vpop.f32.mrf.mxu0 }
  0xab   : > { %v443_v62 = vpop.f32.mrf.mxu2  ;;  %v358_v63 = vpop.f32.mrf.mxu1 }
  0xac   : > { %v505_v0 = vpop.f32.mrf.mxu3  ;;  %v463_v31 = vadd.f32 %v443_v62, %v357_v29  ;;  %v359_v37 = vadd.f32 %v358_v63, %v311_v57 }
  0xae   : > { %v525_v35 = vadd.f32 %v505_v0, %v463_v31 }
  0xb0   : > { %v575_v1 = vpop.f32.mrf.mxu0  ;;  %v593_v23 = vadd.f32 %v573_v61, %v525_v35 }
  0xb3   : > { %v445_v2 = vpop.f32.mrf.mxu2  ;;  %v361_v3 = vpop.f32.mrf.mxu1 }
  0xb4   : > { %v507_v4 = vpop.f32.mrf.mxu3  ;;  %v464_v22 = vadd.f32 %v445_v2, %v359_v37  ;;  %v362_v42 = vadd.f32 %v361_v3, %v314_v49 }
  0xb6   : > { %v526_v39 = vadd.f32 %v507_v4, %v464_v22 }
  0xb8   : > { %v578_v9 = vpop.f32.mrf.mxu0  ;;  %v594_v50 = vadd.f32 %v575_v1, %v526_v39 }
  0xbb   : > { %v448_v10 = vpop.f32.mrf.mxu2  ;;  %v363_v11 = vpop.f32.mrf.mxu1 }
  0xbc   : > { %v510_v13 = vpop.f32.mrf.mxu3  ;;  %v465_v45 = vadd.f32 %v448_v10, %v362_v42  ;;  %v364_v63 = vadd.f32 %v363_v11, %v1286_v55 }
  0xbe   : > { %v527_v57 = vadd.f32 %v510_v13, %v465_v45 }
  0xc0   : > { %v1294_v17 = vpop.f32.mrf.mxu0  ;;  %v595_v4 = vadd.f32 %v578_v9, %v527_v57 }
  0xc3   : > { %v450_v6 = vpop.f32.mrf.mxu2  ;;  %v1296_v8 = vpop.f32.mrf.mxu1 }
  0xc4   : > { %v512_v5 = vpop.f32.mrf.mxu3  ;;  %v466_v2 = vadd.f32 %v450_v6, %v364_v63  ;;  %v367_v55 = vadd.f32 %v1296_v8, %v1284_v54 }
  0xc6   : > { %v528_v35 = vadd.f32 %v512_v5, %v466_v2 }
  0xc8   : > { %v1298_v18 = vpop.f32.mrf.mxu0 }
  0xcb   : > { %v1300_v7 = vpop.f32.mrf.mxu2  ;;  %v1302_v19 = vpop.f32.mrf.mxu1 }
  0xcc   : > { %v1304_v20 = vpop.f32.mrf.mxu3 }
  0xd0   : > { %v1306_v21 = vpop.f32.mrf.mxu0 }
  0xd3   : > { %v1308_v24 = vpop.f32.mrf.mxu2  ;;  %v1310_v14 = vpop.f32.mrf.mxu1 }
  0xd4   : > { %v1312_v16 = vpop.f32.mrf.mxu3 }
  0xd8   : > { %v1314_v25 = vpop.f32.mrf.mxu0 }
  0xdb   : > { %v1316_v12 = vpop.f32.mrf.mxu2  ;;  %v1318_v28 = vpop.f32.mrf.mxu1 }
  0xdc   : > { %v1320_v15 = vpop.f32.mrf.mxu3 }
  0xe0   : > { %v1322_v32 = vpop.f32.mrf.mxu0 }
  0xe3   : > { %v1324_v33 = vpop.f32.mrf.mxu2  ;;  %v639_v34 = vpop.f32.mrf.mxu1 }
  0xe4   : > { %v1326_v36 = vpop.f32.mrf.mxu3  ;;  %v659_v27 = vadd.f32 %v639_v34, %v593_v23 }
  0xe8   : > { %v799_v26 = vpop.f32.mrf.mxu0 }
  0xeb   : > { %v689_v30 = vpop.f32.mrf.mxu2  ;;  %v641_v38 = vpop.f32.mrf.mxu1 }
  0xec   : > { %v709_v40 = vadd.f32 %v689_v30, %v659_v27  ;;  %v745_v41 = vpop.f32.mrf.mxu3  ;;  %v660_v52 = vadd.f32 %v641_v38, %v594_v50  ;;  %v596_v27 = vadd.f32 %v1294_v17, %v528_v35 }
  0xee   : > { %v765_v43 = vadd.f32 %v745_v41, %v709_v40 }
  0xf0   : > { %v819_v46 = vadd.f32 %v799_v26, %v765_v43  ;;  %v801_v51 = vpop.f32.mrf.mxu0  ;;  %v467_v26 = vadd.f32 %v1300_v7, %v367_v55  ;;  %v369_v7 = vadd.f32 %v1302_v19, %v1290_v58 }
  0xf2   : > { %v831_v48 = vmul.f32 %v1331_v44, %v819_v46  ;;  %v529_v41 = vadd.f32 %v1304_v20, %v467_v26  ;;  %v468_v46 = vadd.f32 %v1308_v24, %v369_v7  ;;  %v372_v24 = vadd.f32 %v1310_v14, %v1288_v56 }
  0xf3   : > { %v691_v49 = vpop.f32.mrf.mxu2  ;;  %v644_v53 = vpop.f32.mrf.mxu1 }
  0xf4   : > { %v843_v59 = vadd.f32 %v1336_v47, %v831_v48  ;;  %v710_v61 = vadd.f32 %v691_v49, %v660_v52  ;;  %v747_v62 = vpop.f32.mrf.mxu3  ;;  %v661_v29 = vadd.f32 %v644_v53, %v595_v4  ;;  %v597_v50 = vadd.f32 %v1298_v18, %v529_v41 }
  0xf5   : > { %v530_v53 = vadd.f32 %v1312_v16, %v468_v46 }
  0xf6   : > { %v851_v0 = vmax.f32 %v843_v59, 0.0  ;;  %v766_v1 = vadd.f32 %v747_v62, %v710_v61  ;;  %v469_v62 = vadd.f32 %v1316_v12, %v372_v24  ;;  %v374_v12 = vadd.f32 %v1318_v28, %v1292_v60 }
  0xf7   : > { %v598_v63 = vadd.f32 %v1306_v21, %v530_v53 }
  0xf8   : > { %859 = vst.msk [vmem:[%s1344_s22] sm:$0xff] %vm287_vm1, %v851_v0  ;;  %v820_v3 = vadd.f32 %v801_v51, %v766_v1  ;;  %v804_v10 = vpop.f32.mrf.mxu0  ;;  %v470_v21 = vadd.f32 %v1324_v33, %v374_v12 }
  0xfa   : > { %v832_v13 = vmul.f32 %v1331_v44, %v820_v3  ;;  %v531_v3 = vadd.f32 %v1320_v15, %v469_v62 }
  0xfb   : > { %v694_v31 = vpop.f32.mrf.mxu2  ;;  %v646_v34 = vpop.f32.mrf.mxu1 }
  0xfc   : > { %v844_v37 = vadd.f32 %v1336_v47, %v832_v13  ;;  %v711_v22 = vadd.f32 %v694_v31, %v661_v29  ;;  %v750_v23 = vpop.f32.mrf.mxu3  ;;  %v662_v38 = vadd.f32 %v646_v34, %v596_v27  ;;  %v599_v34 = vadd.f32 %v1314_v25, %v531_v3 }
  0xfe   : > { %v852_v11 = vmax.f32 %v844_v37, 0.0  ;;  %v767_v6 = vadd.f32 %v750_v23, %v711_v22  ;;  %v532_v22 = vadd.f32 %v1326_v36, %v470_v21 }
 0x100   : > { %860 = vst.msk [vmem:[%s1344_s22 + $0x8] sm:$0xff] %vm287_vm1, %v852_v11  ;;  %v821_v9 = vadd.f32 %v804_v10, %v767_v6  ;;  %v806_v30 = vpop.f32.mrf.mxu0  ;;  %v600_v25 = vadd.f32 %v1322_v32, %v532_v22 }
 0x102   : > { %v833_v5 = vmul.f32 %v1331_v44, %v821_v9 }
 0x103   : > { %v696_v39 = vpop.f32.mrf.mxu2  ;;  %v649_v40 = vpop.f32.mrf.mxu1 }
 0x104   : > { %v845_v54 = vadd.f32 %v1336_v47, %v833_v5  ;;  %v712_v8 = vadd.f32 %v696_v39, %v662_v38  ;;  %v752_v42 = vpop.f32.mrf.mxu3  ;;  %v663_v48 = vadd.f32 %v649_v40, %v597_v50 }
 0x106   : > { %v853_v43 = vmax.f32 %v845_v54, 0.0  ;;  %v768_v45 = vadd.f32 %v752_v42, %v712_v8 }
 0x108   : > { %861 = vst.msk [vmem:[%s1344_s22 + $0x10] sm:$0xff] %vm287_vm1, %v853_v43  ;;  %v822_v17 = vadd.f32 %v806_v30, %v768_v45  ;;  %v809_v51 = vpop.f32.mrf.mxu0 }
 0x10a   : > { %v834_v20 = vmul.f32 %v1331_v44, %v822_v17 }
 0x10b   : > { %v699_v52 = vpop.f32.mrf.mxu2  ;;  %v651_v49 = vpop.f32.mrf.mxu1 }
 0x10c   : > { %v846_v58 = vadd.f32 %v1336_v47, %v834_v20  ;;  %v713_v19 = vadd.f32 %v699_v52, %v663_v48  ;;  %v755_v57 = vpop.f32.mrf.mxu3  ;;  %v664_v16 = vadd.f32 %v651_v49, %v598_v63 }
 0x10e   : > { %v854_v59 = vmax.f32 %v846_v58, 0.0  ;;  %v769_v61 = vadd.f32 %v755_v57, %v713_v19 }
 0x110   : > { %862 = vst.msk [vmem:[%s1344_s22 + $0x18] sm:$0xff] %vm287_vm1, %v854_v59  ;;  %v823_v18 = vadd.f32 %v809_v51, %v769_v61  ;;  %v811_v1 = vpop.f32.mrf.mxu0 }
 0x112   : > { %v835_v0 = vmul.f32 %v1331_v44, %v823_v18 }
 0x113   : > { %v701_v2 = vpop.f32.mrf.mxu2  ;;  %v654_v10 = vpop.f32.mrf.mxu1 }
 0x114   : > { %v847_v4 = vadd.f32 %v1336_v47, %v835_v0  ;;  %v714_v56 = vadd.f32 %v701_v2, %v664_v16  ;;  %v757_v14 = vpop.f32.mrf.mxu3  ;;  %v665_v35 = vadd.f32 %v654_v10, %v599_v34 }
 0x116   : > { %v855_v13 = vmax.f32 %v847_v4, 0.0  ;;  %v770_v29 = vadd.f32 %v757_v14, %v714_v56 }
 0x118   : > { %863 = vst.msk [vmem:[%s1344_s22 + $0x20] sm:$0xff] %vm287_vm1, %v855_v13  ;;  %v824_v31 = vadd.f32 %v811_v1, %v770_v29  ;;  %v814_v28 = vpop.f32.mrf.mxu0 }
 0x11a   : > { %v836_v15 = vmul.f32 %v1331_v44, %v824_v31 }
 0x11b   : > { %v704_v37 = vpop.f32.mrf.mxu2  ;;  %v656_v33 = vpop.f32.mrf.mxu1 }
 0x11c   : > { %v848_v23 = vadd.f32 %v1336_v47, %v836_v15  ;;  %v715_v55 = vadd.f32 %v704_v37, %v665_v35  ;;  %v760_v60 = vpop.f32.mrf.mxu3  ;;  %v666_v27 = vadd.f32 %v656_v33, %v600_v25 }
 0x11e   : > { %v856_v11 = vmax.f32 %v848_v23, 0.0  ;;  %v771_v6 = vadd.f32 %v760_v60, %v715_v55 }
 0x120   : > { %864 = vst.msk [vmem:[%s1344_s22 + $0x28] sm:$0xff] %vm287_vm1, %v856_v11  ;;  %v825_v26 = vadd.f32 %v814_v28, %v771_v6  ;;  %v816_v41 = vpop.f32.mrf.mxu0 }
 0x122   : > { %v837_v9 = vmul.f32 %v1331_v44, %v825_v26 }
 0x123   : > { %v706_v30 = vpop.f32.mrf.mxu2 }
 0x124   : > { %v849_v36 = vadd.f32 %v1336_v47, %v837_v9  ;;  %v716_v5 = vadd.f32 %v706_v30, %v666_v27  ;;  %v762_v38 = vpop.f32.mrf.mxu3 }
 0x126   : > { %v857_v39 = vmax.f32 %v849_v36, 0.0  ;;  %v772_v40 = vadd.f32 %v762_v38, %v716_v5 }
 0x128   : > { %865 = vst.msk [vmem:[%s1344_s22 + $0x30] sm:$0xff] %vm287_vm1, %v857_v39  ;;  %v826_v54 = vadd.f32 %v816_v41, %v772_v40 }
 0x12a   : > { %v838_v8 = vmul.f32 %v1331_v44, %v826_v54 }
 0x12c   : > { %v850_v42 = vadd.f32 %v1336_v47, %v838_v8 }
 0x12e   : > { %v858_v7 = vmax.f32 %v850_v42, 0.0 }
 0x130   : > { %866 = vst.msk [vmem:[%s1344_s22 + $0x38] sm:$0xff] %vm287_vm1, %v858_v7 }
 0x131 PF: > { %s14_s15 = sadd.s32 1, %s1050_s15  }
 0x132   : > { %p11_p4 = scmp.ge.s32.totalorder %s14_s15, 4  }
 0x134   :  { %13 = sbr.rel (!%p11_p4) target bundleno = 1 (0x1), region = 74 }

</bundles_post_ra>
